<compile_context>
chip_gen: v7x
topology: tpu7x:2x2x1
jax: 0.10.0
libtpu: 0.0.40
codegen_flags: <defaults>
</compile_context>

<pallas_src>
import functools

import jax
import jax.numpy as jnp
from jax.experimental import pallas as pl
from jax.experimental.pallas import tpu as pltpu

BN_EPS = 1e-5
LANE = 128
_RESIDENT_W_BYTES = 16 * 1024 * 1024   # keep weight resident below this size


def _round_up(x, m):
    return (x + m - 1) // m * m


def _default_vmem_limit():
    """~3/4 of physical VMEM: ~96MiB on v5e/v6e (128MiB), 48MiB on v7x (64MiB)."""
    try:
        cap = int(pltpu.get_tpu_info().vmem_capacity_bytes)
        return max(32 * 1024 * 1024, min(cap * 3 // 4, 100 * 1024 * 1024))
    except Exception:
        return 64 * 1024 * 1024


_VMEM_LIMIT = _default_vmem_limit()


def _pick_k_tile(kp, target, align=LANE):
    t = min(target, kp)
    t = (t // align) * align
    while t > align and kp % t:
        t -= align
    return max(t, align)


def _pick_m_tile(m, target=1024):
    """Largest row-tile that divides m (multiple of 8), capped at target."""
    if m <= target:
        return m
    t = (target // 8) * 8
    while t >= 8:
        if m % t == 0:
            return t
        t -= 8
    return m


# ----------------------------------------------------------------------------
# Kernel 1: direct 3x3 stride-1 conv (padding=1) + BN column statistics.
#
# The padded image is passed flattened to (P2, Cp) rows (row index
# r = ph*(W+2) + pw).  For tap (kh, kw) the contribution to "extended" output
# row e = ho*(W+2) + wo is x_flat[e + kh*(W+2) + kw] @ w_tap, so each tap is a
# single large MXU matmul over a row-shifted slice - no im2col, no reshapes.
# Valid rows are then compacted into the (H*W, Pp) output and the BN sums are
# accumulated from the f32 accumulator before the bf16 cast.
# ----------------------------------------------------------------------------
def _conv3x3_s1_stats_kernel(x_ref, w_ref, y_ref, st_ref, *, H, W, R):
    Cp = x_ref.shape[-1]
    Pp = y_ref.shape[-1]
    Wp2 = W + 2

    acc = None
    for kh in range(3):
        for kw in range(3):
            d = kh * Wp2 + kw
            t = kh * 3 + kw
            part = jnp.dot(x_ref[d:d + R, :],
                           w_ref[t * Cp:(t + 1) * Cp, :],
                           preferred_element_type=jnp.float32)
            acc = part if acc is None else acc + part

    s = jnp.zeros((1, Pp), jnp.float32)
    ss = jnp.zeros((1, Pp), jnp.float32)
    for ho in range(H):
        rows = acc[ho * Wp2: ho * Wp2 + W, :]            # (W, Pp) f32, valid rows
        y_ref[ho * W:(ho + 1) * W, :] = rows.astype(y_ref.dtype)
        s = s + jnp.sum(rows, axis=0, keepdims=True)
        ss = ss + jnp.sum(rows * rows, axis=0, keepdims=True)
    st_ref[0:1, :] = s
    st_ref[1:2, :] = ss


def conv3x3_s1_stats(x_img, wmat, *, out_dtype=jnp.bfloat16):
    """Direct 3x3 / stride-1 / padding-1 conv with per-image BN column stats.

    x_img: (N, H, W, Cp) bf16, channels already padded to a LANE multiple.
    wmat:  (9*Cp, Pp) bf16, rows ordered (kh, kw, ci).
    Returns y (N*H*W, Pp) out_dtype, stats (N, 8, Pp) f32 (rows 0/1 = sum/sumsq).
    """
    N, H, W, Cp = x_img.shape
    Pp = wmat.shape[1]
    Wp2 = W + 2
    R = _round_up(H * Wp2 - 2, 8)                # rows of the extended output
    rows_needed = 2 * Wp2 + 2 + R                # deepest shifted read

    x_pad = jnp.pad(x_img, ((0, 0), (1, 1), (1, 1), (0, 0)))
    x_flat = x_pad.reshape(N, (H + 2) * Wp2, Cp)
    extra = max(0, rows_needed - (H + 2) * Wp2)
    if extra:
        x_flat = jnp.pad(x_flat, ((0, 0), (0, extra), (0, 0)))
    P2 = x_flat.shape[1]

    kernel = functools.partial(_conv3x3_s1_stats_kernel, H=H, W=W, R=R)
    y, stats = pl.pallas_call(
        kernel,
        out_shape=(jax.ShapeDtypeStruct((N, H * W, Pp), out_dtype),
                   jax.ShapeDtypeStruct((N, 8, Pp), jnp.float32)),
        grid=(N,),
        in_specs=[pl.BlockSpec((None, P2, Cp), lambda n: (n, 0, 0)),
                  pl.BlockSpec((9 * Cp, Pp), lambda n: (0, 0))],   # resident weight
        out_specs=(pl.BlockSpec((None, H * W, Pp), lambda n: (n, 0, 0)),
                   pl.BlockSpec((None, 8, Pp), lambda n: (n, 0, 0))),
        compiler_params=pltpu.CompilerParams(
            dimension_semantics=("parallel",),
            vmem_limit_bytes=_VMEM_LIMIT),
    )(x_flat, wmat)
    return y.reshape(N * H * W, Pp), stats


# ----------------------------------------------------------------------------
# Kernel 2: matmul + BN statistics (resident weight; K-tiled fallback).
# Used for the strided-conv1 im2col fallback and the 1x1 downsample conv.
# ----------------------------------------------------------------------------
def _matmul_stats_kernel(p_ref, w_ref, y_ref, st_ref):
    acc = jnp.dot(p_ref[...], w_ref[...], preferred_element_type=jnp.float32)
    y_ref[...] = acc.astype(y_ref.dtype)
    st_ref[0:1, :] = jnp.sum(acc, axis=0, keepdims=True)
    st_ref[1:2, :] = jnp.sum(acc * acc, axis=0, keepdims=True)


def _matmul_stats_ktiled_kernel(p_ref, w_ref, y_ref, st_ref, acc_ref):
    k = pl.program_id(1)

    @pl.when(k == 0)
    def _():
        acc_ref[...] = jnp.zeros_like(acc_ref)

    acc_ref[...] += jnp.dot(p_ref[...], w_ref[...],
                            preferred_element_type=jnp.float32)

    @pl.when(k == pl.num_programs(1) - 1)
    def _():
        acc = acc_ref[...]
        y_ref[...] = acc.astype(y_ref.dtype)
        st_ref[0:1, :] = jnp.sum(acc, axis=0, keepdims=True)
        st_ref[1:2, :] = jnp.sum(acc * acc, axis=0, keepdims=True)


def matmul_with_stats(patches, wmat, *, tm=256, tk=512):
    """y = patches @ wmat (bf16 MXU, f32 accum, bf16 out) + per-tile col stats."""
    M, Kp = patches.shape
    Pp = wmat.shape[1]
    tm = min(tm, _round_up(M, 8))
    Mp = _round_up(M, tm)
    if Mp != M:
        patches = jnp.pad(patches, ((0, Mp - M), (0, 0)))
    mt = Mp // tm

    if Kp * Pp * 2 <= _RESIDENT_W_BYTES:
        # Weight resident in VMEM: no K grid axis, no acc scratch.
        y, stats = pl.pallas_call(
            _matmul_stats_kernel,
            out_shape=(jax.ShapeDtypeStruct((Mp, Pp), jnp.bfloat16),
                       jax.ShapeDtypeStruct((mt * 8, Pp), jnp.float32)),
            grid=(mt,),
            in_specs=[pl.BlockSpec((tm, Kp), lambda i: (i, 0)),
                      pl.BlockSpec((Kp, Pp), lambda i: (0, 0))],
            out_specs=(pl.BlockSpec((tm, Pp), lambda i: (i, 0)),
                       pl.BlockSpec((8, Pp), lambda i: (i, 0))),
            compiler_params=pltpu.CompilerParams(
                dimension_semantics=("parallel",),
                vmem_limit_bytes=_VMEM_LIMIT),
        )(patches, wmat)
    else:
        tk = _pick_k_tile(Kp, tk)
        kt = Kp // tk
        y, stats = pl.pallas_call(
            _matmul_stats_ktiled_kernel,
            out_shape=(jax.ShapeDtypeStruct((Mp, Pp), jnp.bfloat16),
                       jax.ShapeDtypeStruct((mt * 8, Pp), jnp.float32)),
            grid=(mt, kt),
            in_specs=[pl.BlockSpec((tm, tk), lambda i, k: (i, k)),
                      pl.BlockSpec((tk, Pp), lambda i, k: (k, 0))],
            out_specs=(pl.BlockSpec((tm, Pp), lambda i, k: (i, 0)),
                       pl.BlockSpec((8, Pp), lambda i, k: (i, 0))),
            scratch_shapes=[pltpu.VMEM((tm, Pp), jnp.float32)],
            compiler_params=pltpu.CompilerParams(
                dimension_semantics=("parallel", "arbitrary"),
                vmem_limit_bytes=_VMEM_LIMIT),
        )(patches, wmat)
    return y, stats.reshape(mt, 8, Pp)


def _bn_scale_shift(stats, gamma_p, beta_p, count, eps=BN_EPS):
    """Fold global batch statistics into per-channel scale/shift (f32)."""
    sums = jnp.sum(stats[:, 0, :], axis=0)
    sumsq = jnp.sum(stats[:, 1, :], axis=0)
    mean = sums / count
    # TODO(synk): Welford-style combine for very large counts (cancellation).
    var = jnp.maximum(sumsq / count - mean * mean, 0.0)
    scale = gamma_p * jax.lax.rsqrt(var + eps)
    shift = beta_p - mean * scale
    return (scale.reshape(1, -1).astype(jnp.float32),
            shift.reshape(1, -1).astype(jnp.float32))


# ----------------------------------------------------------------------------
# Kernel 3: elementwise BN apply (+ fused residual) + ReLU, large M tiles.
# ----------------------------------------------------------------------------
def _bn_relu_kernel(y_ref, s_ref, b_ref, o_ref):
    y = y_ref[...].astype(jnp.float32)
    o_ref[...] = jnp.maximum(y * s_ref[...] + b_ref[...], 0.0).astype(o_ref.dtype)


def _bn_add_relu_kernel(y_ref, s_ref, b_ref, r_ref, rs_ref, rb_ref, o_ref):
    out = y_ref[...].astype(jnp.float32) * s_ref[...] + b_ref[...]
    res = r_ref[...].astype(jnp.float32) * rs_ref[...] + rb_ref[...]
    o_ref[...] = jnp.maximum(out + res, 0.0).astype(o_ref.dtype)


def _bn_add_identity_relu_kernel(y_ref, s_ref, b_ref, r_ref, o_ref):
    out = y_ref[...].astype(jnp.float32) * s_ref[...] + b_ref[...]
    o_ref[...] = jnp.maximum(out + r_ref[...].astype(jnp.float32),
                             0.0).astype(o_ref.dtype)


def _elementwise_call(kernel, arrays, row_args, out_dtype, tm):
    M, Pp = arrays[0].shape
    tm = _pick_m_tile(M, tm)
    mt = M // tm
    in_specs = []
    for is_row in row_args:
        if is_row:
            in_specs.append(pl.BlockSpec((1, Pp), lambda i: (0, 0)))
        else:
            in_specs.append(pl.BlockSpec((tm, Pp), lambda i: (i, 0)))
    return pl.pallas_call(
        kernel,
        out_shape=jax.ShapeDtypeStruct((M, Pp), out_dtype),
        grid=(mt,),
        in_specs=in_specs,
        out_specs=pl.BlockSpec((tm, Pp), lambda i: (i, 0)),
        compiler_params=pltpu.CompilerParams(
            dimension_semantics=("parallel",),
            vmem_limit_bytes=_VMEM_LIMIT),
    )(*arrays)


def bn_relu_apply(y, scale, shift, *, out_dtype=jnp.bfloat16, tm=1024):
    return _elementwise_call(_bn_relu_kernel, (y, scale, shift),
                             (False, True, True), out_dtype, tm)


def bn_add_relu_apply(y, scale, shift, res, rscale, rshift, *,
                      out_dtype=jnp.bfloat16, tm=1024):
    return _elementwise_call(_bn_add_relu_kernel,
                             (y, scale, shift, res, rscale, rshift),
                             (False, True, True, False, True, True),
                             out_dtype, tm)


def bn_add_identity_relu_apply(y, scale, shift, res, *,
                               out_dtype=jnp.bfloat16, tm=1024):
    return _elementwise_call(_bn_add_identity_relu_kernel,
                             (y, scale, shift, res),
                             (False, True, True, False), out_dtype, tm)


# ----------------------------------------------------------------------------
# JAX glue: weight packing, im2col fallback, parameter setup, forward pass.
# ----------------------------------------------------------------------------
def _pack_w3x3_direct(w_oihw, cin_p, pp):
    """(P,Cin,3,3) -> (9*cin_p, pp): tap-major rows, per-tap channel padding."""
    P, Cin = w_oihw.shape[0], w_oihw.shape[1]
    w = jnp.transpose(w_oihw, (2, 3, 1, 0))                 # (3,3,Cin,P)
    w = jnp.pad(w, ((0, 0), (0, 0), (0, cin_p - Cin), (0, pp - P)))
    return w.reshape(9 * cin_p, pp).astype(jnp.bfloat16)


def _pack_w3x3_im2col(w_oihw, kp, pp):
    P, Cin = w_oihw.shape[0], w_oihw.shape[1]
    w = jnp.transpose(w_oihw, (2, 3, 1, 0)).reshape(9 * Cin, P)
    return jnp.pad(w, ((0, kp - 9 * Cin), (0, pp - P))).astype(jnp.bfloat16)


def im2col3x3(x_nhwc, stride):
    """3x3, padding=1 im2col (fallback for strided conv1 only)."""
    N, H, W, C = x_nhwc.shape
    Ho = (H - 1) // stride + 1
    Wo = (W - 1) // stride + 1
    xp = jnp.pad(x_nhwc, ((0, 0), (1, 1), (1, 1), (0, 0)))
    cols = []
    for kh in range(3):
        for kw in range(3):
            cols.append(xp[:, kh:kh + (Ho - 1) * stride + 1:stride,
                           kw:kw + (Wo - 1) * stride + 1:stride, :])
    return jnp.concatenate(cols, axis=-1).reshape(N * Ho * Wo, 9 * C), Ho, Wo


def init_resblock_params(key, inplanes, planes, stride=1):
    ks = jax.random.split(key, 9)
    params = {
        "conv1": 0.1 * jax.random.normal(ks[0], (planes, inplanes, 3, 3), jnp.float32),
        "conv2": 0.1 * jax.random.normal(ks[1], (planes, planes, 3, 3), jnp.float32),
        "gamma1": jax.random.uniform(ks[2], (planes,), jnp.float32, 0.5, 1.5),
        "beta1": 0.1 * jax.random.normal(ks[3], (planes,), jnp.float32),
        "gamma2": jax.random.uniform(ks[4], (planes,), jnp.float32, 0.5, 1.5),
        "beta2": 0.1 * jax.random.normal(ks[5], (planes,), jnp.float32),
    }
    if stride > 1 or inplanes != planes:
        params["conv_ds"] = 0.1 * jax.random.normal(
            ks[6], (planes, inplanes, 1, 1), jnp.float32)
        params["gamma_ds"] = jax.random.uniform(ks[7], (planes,), jnp.float32, 0.5, 1.5)
        params["beta_ds"] = 0.1 * jax.random.normal(ks[8], (planes,), jnp.float32)
    return params


def resblock_forward(x_nchw, params, stride=1):
    """Pallas-backed ResBlock forward. Input/output NCHW (PyTorch layout)."""
    x = jnp.transpose(x_nchw, (0, 2, 3, 1)).astype(jnp.float32)   # NHWC
    N, H, W, Cin = x.shape
    P = params["conv1"].shape[0]
    Pp = _round_up(P, LANE)
    Cinp = _round_up(Cin, LANE)
    Ho = (H - 1) // stride + 1
    Wo = (W - 1) // stride + 1
    M = N * Ho * Wo
    pad_p = Pp - P

    # --- conv1 (3x3, stride, pad=1) + global BN1 statistics ---
    if stride == 1:
        xc = jnp.pad(x, ((0, 0), (0, 0), (0, 0), (0, Cinp - Cin))).astype(jnp.bfloat16)
        w1 = _pack_w3x3_direct(params["conv1"], Cinp, Pp)
        y1, st1 = conv3x3_s1_stats(xc, w1)                         # (M, Pp) bf16
    else:
        # TODO(synk): strided conv1 still uses im2col (input is the smallest tensor).
        patches1, _, _ = im2col3x3(x.astype(jnp.bfloat16), stride)  # (M, 9*Cin)
        K1 = 9 * Cin
        K1p = _round_up(K1, LANE)
        patches1 = jnp.pad(patches1, ((0, 0), (0, K1p - K1)))
        w1 = _pack_w3x3_im2col(params["conv1"], K1p, Pp)
        y1, st1 = matmul_with_stats(patches1, w1)
        y1 = y1[:M]
    g1 = jnp.pad(params["gamma1"], (0, pad_p))    # padded lanes: gamma=beta=0 -> stay 0
    b1 = jnp.pad(params["beta1"], (0, pad_p))
    s1, sh1 = _bn_scale_shift(st1, g1, b1, M)
    h = bn_relu_apply(y1, s1, sh1)                                  # (M, Pp) bf16

    # --- conv2 (3x3, stride=1, pad=1) on h + global BN2 statistics ---
    h_img = h.reshape(N, Ho, Wo, Pp)              # padded channel lanes are exactly 0
    w2 = _pack_w3x3_direct(params["conv2"], Pp, Pp)
    y2, st2 = conv3x3_s1_stats(h_img, w2)                           # (M, Pp) bf16
    g2 = jnp.pad(params["gamma2"], (0, pad_p))
    b2 = jnp.pad(params["beta2"], (0, pad_p))
    s2, sh2 = _bn_scale_shift(st2, g2, b2, M)

    # --- residual branch, fused into the final BN2-apply / add / ReLU kernel ---
    if stride > 1 or Cin != P:
        xs = x[:, ::stride, ::stride, :].reshape(M, Cin)
        xs = jnp.pad(xs, ((0, 0), (0, Cinp - Cin))).astype(jnp.bfloat16)
        wds = jnp.transpose(params["conv_ds"][:, :, 0, 0], (1, 0))   # (Cin, P)
        wds = jnp.pad(wds, ((0, Cinp - Cin), (0, pad_p))).astype(jnp.bfloat16)
        yds, stds = matmul_with_stats(xs, wds)
        yds = yds[:M]                                                # (M, Pp) bf16
        gds = jnp.pad(params["gamma_ds"], (0, pad_p))
        bds = jnp.pad(params["beta_ds"], (0, pad_p))
        rs, rsh = _bn_scale_shift(stds, gds, bds, M)
        out = bn_add_relu_apply(y2, s2, sh2, yds, rs, rsh)           # (M, Pp) bf16
    else:
        res = jnp.pad(x.reshape(M, Cin),
                      ((0, 0), (0, Pp - Cin))).astype(jnp.bfloat16)  # identity, bf16
        out = bn_add_identity_relu_apply(y2, s2, sh2, res)           # (M, Pp) bf16

    out = out[:, :P].reshape(N, Ho, Wo, P)
    return jnp.transpose(out, (0, 3, 1, 2)).astype(jnp.float32)      # NCHW f32


# ----------------------------------------------------------------------------
# Pure-JAX f32 reference (for correctness check)
# ----------------------------------------------------------------------------
def ref_forward(x_nchw, params, stride=1, eps=BN_EPS):
    def conv(x, w, s, pad):
        return jax.lax.conv_general_dilated(
            x, w, (s, s), pad, dimension_numbers=("NCHW", "OIHW", "NCHW"))

    def bn(x, g, b):
        mean = jnp.mean(x, axis=(0, 2, 3), keepdims=True)
        var = jnp.mean((x - mean) ** 2, axis=(0, 2, 3), keepdims=True)
        return (g[None, :, None, None] * (x - mean) * jax.lax.rsqrt(var + eps)
                + b[None, :, None, None])

    Cin = x_nchw.shape[1]
    P = params["conv1"].shape[0]
    out = conv(x_nchw, params["conv1"], stride, ((1, 1), (1, 1)))
    out = jnp.maximum(bn(out, params["gamma1"], params["beta1"]), 0.0)
    out = conv(out, params["conv2"], 1, ((1, 1), (1, 1)))
    out = bn(out, params["gamma2"], params["beta2"])
    if stride > 1 or Cin != P:
        res = conv(x_nchw, params["conv_ds"], stride, ((0, 0), (0, 0)))
        res = bn(res, params["gamma_ds"], params["beta_ds"])
    else:
        res = x_nchw
    return jnp.maximum(out + res, 0.0)


# ----------------------------------------------------------------------------
if __name__ == "__main__":
    key = jax.random.PRNGKey(0)

    def run_case(case_key, N, cin, planes, H, W, stride):
        kx, kp = jax.random.split(case_key)
        x = jax.random.normal(kx, (N, cin, H, W), jnp.float32)
        params = init_resblock_params(kp, cin, planes, stride)

        fwd = jax.jit(functools.partial(resblock_forward, stride=stride))
        out = jax.block_until_ready(fwd(x, params))
        ref = jax.block_until_ready(ref_forward(x, params, stride))

        Ho = (H - 1) // stride + 1
        Wo = (W - 1) // stride + 1
        assert out.shape == (N, planes, Ho, Wo), out.shape
        # bf16 MXU operands / bf16 intermediates -> loosened tolerance vs f32 ref
        rel = float(jnp.linalg.norm(out - ref) / (jnp.linalg.norm(ref) + 1e-12))
        max_abs = float(jnp.max(jnp.abs(out - ref)))
        assert rel < 4e-2 and max_abs < 2.5e-1, (rel, max_abs)

    ks = jax.random.split(key, 3)
    run_case(ks[0], 2, 4, 8, 16, 16, 1)   # channel-change downsample branch
    run_case(ks[1], 2, 8, 8, 16, 16, 1)   # identity residual
    run_case(ks[2], 2, 4, 8, 16, 16, 2)   # strided downsample branch (im2col fallback)

    print("KERNEL_OK")
</pallas_src>

<mosaic_0001>
module attributes {stable_mosaic.version = 11 : i64} {
  func.func @_conv3x3_s1_stats_kernel(%arg0: i32, %arg1: memref<1x326x128xbf16, #tpu.memory_space<vmem>>, %arg2: memref<1152x128xbf16, #tpu.memory_space<vmem>>, %arg3: memref<1x256x128xbf16, #tpu.memory_space<vmem>>, %arg4: memref<1x8x128xf32, #tpu.memory_space<vmem>>) attributes {dimension_semantics = [#tpu.dimension_semantics<parallel>], iteration_bounds = array<i64: 2>, scalar_prefetch = 0 : i64, scratch_operands = 0 : i64, tpu.core_type = #tpu.core_type<tc>, window_params = [{transform_indices = @transform_0, window_bounds = array<i64: 1, 326, 128>}, {pipeline_mode = #tpu.pipeline_mode<synchronous>, transform_indices = @transform_1, window_bounds = array<i64: 1152, 128>}, {transform_indices = @transform_2, window_bounds = array<i64: 1, 256, 128>}, {transform_indices = @transform_3, window_bounds = array<i64: 1, 8, 128>}]} {
    %c0 = arith.constant 0 : index
    %c0_0 = arith.constant 0 : index
    %c0_1 = arith.constant 0 : index
    %0 = vector.load %arg1[%c0, %c0_0, %c0_1] : memref<1x326x128xbf16, #tpu.memory_space<vmem>>, vector<1x288x128xbf16>
    %1 = vector.shape_cast %0 : vector<1x288x128xbf16> to vector<288x128xbf16>
    %c0_2 = arith.constant 0 : index
    %c0_3 = arith.constant 0 : index
    %2 = vector.load %arg2[%c0_2, %c0_3] : memref<1152x128xbf16, #tpu.memory_space<vmem>>, vector<128x128xbf16>
    %cst = arith.constant dense<0.000000e+00> : vector<288x128xf32>
    %3 = tpu.matmul %1, %2, %cst {dimension_numbers = #tpu.dot_dimension_numbers<[1], [0], [0], [1], [0, 0, 1, 1], [], []>} : vector<288x128xbf16>, vector<128x128xbf16>, vector<288x128xf32> -> vector<288x128xf32>
    %c0_4 = arith.constant 0 : index
    %c1 = arith.constant 1 : index
    %c0_5 = arith.constant 0 : index
    %4 = vector.load %arg1[%c0_4, %c1, %c0_5] : memref<1x326x128xbf16, #tpu.memory_space<vmem>>, vector<1x288x128xbf16>
    %5 = vector.shape_cast %4 : vector<1x288x128xbf16> to vector<288x128xbf16>
    %c128 = arith.constant 128 : index
    %c0_6 = arith.constant 0 : index
    %6 = vector.load %arg2[%c128, %c0_6] : memref<1152x128xbf16, #tpu.memory_space<vmem>>, vector<128x128xbf16>
    %cst_7 = arith.constant dense<0.000000e+00> : vector<288x128xf32>
    %7 = tpu.matmul %5, %6, %cst_7 {dimension_numbers = #tpu.dot_dimension_numbers<[1], [0], [0], [1], [0, 0, 1, 1], [], []>} : vector<288x128xbf16>, vector<128x128xbf16>, vector<288x128xf32> -> vector<288x128xf32>
    %8 = arith.addf %3, %7 : vector<288x128xf32>
    %c0_8 = arith.constant 0 : index
    %c2 = arith.constant 2 : index
    %c0_9 = arith.constant 0 : index
    %9 = vector.load %arg1[%c0_8, %c2, %c0_9] : memref<1x326x128xbf16, #tpu.memory_space<vmem>>, vector<1x288x128xbf16>
    %10 = vector.shape_cast %9 : vector<1x288x128xbf16> to vector<288x128xbf16>
    %c256 = arith.constant 256 : index
    %c0_10 = arith.constant 0 : index
    %11 = vector.load %arg2[%c256, %c0_10] : memref<1152x128xbf16, #tpu.memory_space<vmem>>, vector<128x128xbf16>
    %cst_11 = arith.constant dense<0.000000e+00> : vector<288x128xf32>
    %12 = tpu.matmul %10, %11, %cst_11 {dimension_numbers = #tpu.dot_dimension_numbers<[1], [0], [0], [1], [0, 0, 1, 1], [], []>} : vector<288x128xbf16>, vector<128x128xbf16>, vector<288x128xf32> -> vector<288x128xf32>
    %13 = arith.addf %8, %12 : vector<288x128xf32>
    %c0_12 = arith.constant 0 : index
    %c18 = arith.constant 18 : index
    %c0_13 = arith.constant 0 : index
    %14 = vector.load %arg1[%c0_12, %c18, %c0_13] : memref<1x326x128xbf16, #tpu.memory_space<vmem>>, vector<1x288x128xbf16>
    %15 = vector.shape_cast %14 : vector<1x288x128xbf16> to vector<288x128xbf16>
    %c384 = arith.constant 384 : index
    %c0_14 = arith.constant 0 : index
    %16 = vector.load %arg2[%c384, %c0_14] : memref<1152x128xbf16, #tpu.memory_space<vmem>>, vector<128x128xbf16>
    %cst_15 = arith.constant dense<0.000000e+00> : vector<288x128xf32>
    %17 = tpu.matmul %15, %16, %cst_15 {dimension_numbers = #tpu.dot_dimension_numbers<[1], [0], [0], [1], [0, 0, 1, 1], [], []>} : vector<288x128xbf16>, vector<128x128xbf16>, vector<288x128xf32> -> vector<288x128xf32>
    %18 = arith.addf %13, %17 : vector<288x128xf32>
    %c0_16 = arith.constant 0 : index
    %c19 = arith.constant 19 : index
    %c0_17 = arith.constant 0 : index
    %19 = vector.load %arg1[%c0_16, %c19, %c0_17] : memref<1x326x128xbf16, #tpu.memory_space<vmem>>, vector<1x288x128xbf16>
    %20 = vector.shape_cast %19 : vector<1x288x128xbf16> to vector<288x128xbf16>
    %c512 = arith.constant 512 : index
    %c0_18 = arith.constant 0 : index
    %21 = vector.load %arg2[%c512, %c0_18] : memref<1152x128xbf16, #tpu.memory_space<vmem>>, vector<128x128xbf16>
    %cst_19 = arith.constant dense<0.000000e+00> : vector<288x128xf32>
    %22 = tpu.matmul %20, %21, %cst_19 {dimension_numbers = #tpu.dot_dimension_numbers<[1], [0], [0], [1], [0, 0, 1, 1], [], []>} : vector<288x128xbf16>, vector<128x128xbf16>, vector<288x128xf32> -> vector<288x128xf32>
    %23 = arith.addf %18, %22 : vector<288x128xf32>
    %c0_20 = arith.constant 0 : index
    %c20 = arith.constant 20 : index
    %c0_21 = arith.constant 0 : index
    %24 = vector.load %arg1[%c0_20, %c20, %c0_21] : memref<1x326x128xbf16, #tpu.memory_space<vmem>>, vector<1x288x128xbf16>
    %25 = vector.shape_cast %24 : vector<1x288x128xbf16> to vector<288x128xbf16>
    %c640 = arith.constant 640 : index
    %c0_22 = arith.constant 0 : index
    %26 = vector.load %arg2[%c640, %c0_22] : memref<1152x128xbf16, #tpu.memory_space<vmem>>, vector<128x128xbf16>
    %cst_23 = arith.constant dense<0.000000e+00> : vector<288x128xf32>
    %27 = tpu.matmul %25, %26, %cst_23 {dimension_numbers = #tpu.dot_dimension_numbers<[1], [0], [0], [1], [0, 0, 1, 1], [], []>} : vector<288x128xbf16>, vector<128x128xbf16>, vector<288x128xf32> -> vector<288x128xf32>
    %28 = arith.addf %23, %27 : vector<288x128xf32>
    %c0_24 = arith.constant 0 : index
    %c36 = arith.constant 36 : index
    %c0_25 = arith.constant 0 : index
    %29 = vector.load %arg1[%c0_24, %c36, %c0_25] : memref<1x326x128xbf16, #tpu.memory_space<vmem>>, vector<1x288x128xbf16>
    %30 = vector.shape_cast %29 : vector<1x288x128xbf16> to vector<288x128xbf16>
    %c768 = arith.constant 768 : index
    %c0_26 = arith.constant 0 : index
    %31 = vector.load %arg2[%c768, %c0_26] : memref<1152x128xbf16, #tpu.memory_space<vmem>>, vector<128x128xbf16>
    %cst_27 = arith.constant dense<0.000000e+00> : vector<288x128xf32>
    %32 = tpu.matmul %30, %31, %cst_27 {dimension_numbers = #tpu.dot_dimension_numbers<[1], [0], [0], [1], [0, 0, 1, 1], [], []>} : vector<288x128xbf16>, vector<128x128xbf16>, vector<288x128xf32> -> vector<288x128xf32>
    %33 = arith.addf %28, %32 : vector<288x128xf32>
    %c0_28 = arith.constant 0 : index
    %c37 = arith.constant 37 : index
    %c0_29 = arith.constant 0 : index
    %34 = vector.load %arg1[%c0_28, %c37, %c0_29] : memref<1x326x128xbf16, #tpu.memory_space<vmem>>, vector<1x288x128xbf16>
    %35 = vector.shape_cast %34 : vector<1x288x128xbf16> to vector<288x128xbf16>
    %c896 = arith.constant 896 : index
    %c0_30 = arith.constant 0 : index
    %36 = vector.load %arg2[%c896, %c0_30] : memref<1152x128xbf16, #tpu.memory_space<vmem>>, vector<128x128xbf16>
    %cst_31 = arith.constant dense<0.000000e+00> : vector<288x128xf32>
    %37 = tpu.matmul %35, %36, %cst_31 {dimension_numbers = #tpu.dot_dimension_numbers<[1], [0], [0], [1], [0, 0, 1, 1], [], []>} : vector<288x128xbf16>, vector<128x128xbf16>, vector<288x128xf32> -> vector<288x128xf32>
    %38 = arith.addf %33, %37 : vector<288x128xf32>
    %c0_32 = arith.constant 0 : index
    %c38 = arith.constant 38 : index
    %c0_33 = arith.constant 0 : index
    %39 = vector.load %arg1[%c0_32, %c38, %c0_33] : memref<1x326x128xbf16, #tpu.memory_space<vmem>>, vector<1x288x128xbf16>
    %40 = vector.shape_cast %39 : vector<1x288x128xbf16> to vector<288x128xbf16>
    %c1024 = arith.constant 1024 : index
    %c0_34 = arith.constant 0 : index
    %41 = vector.load %arg2[%c1024, %c0_34] : memref<1152x128xbf16, #tpu.memory_space<vmem>>, vector<128x128xbf16>
    %cst_35 = arith.constant dense<0.000000e+00> : vector<288x128xf32>
    %42 = tpu.matmul %40, %41, %cst_35 {dimension_numbers = #tpu.dot_dimension_numbers<[1], [0], [0], [1], [0, 0, 1, 1], [], []>} : vector<288x128xbf16>, vector<128x128xbf16>, vector<288x128xf32> -> vector<288x128xf32>
    %43 = arith.addf %38, %42 : vector<288x128xf32>
    %cst_36 = arith.constant 0.000000e+00 : f32
    %44 = vector.broadcast %cst_36 : f32 to vector<1x128xf32>
    %cst_37 = arith.constant 0.000000e+00 : f32
    %45 = vector.broadcast %cst_37 : f32 to vector<1x128xf32>
    %46 = vector.extract_strided_slice %43 {offsets = [0, 0], sizes = [16, 128], strides = [1, 1]} : vector<288x128xf32> to vector<16x128xf32>
    %47 = arith.truncf %46 : vector<16x128xf32> to vector<16x128xbf16>
    %c0_38 = arith.constant 0 : index
    %c0_39 = arith.constant 0 : index
    %c0_40 = arith.constant 0 : index
    %48 = vector.load %arg3[%c0_38, %c0_39, %c0_40] : memref<1x256x128xbf16, #tpu.memory_space<vmem>>, vector<1x16x128xbf16>
    %49 = vector.shape_cast %48 : vector<1x16x128xbf16> to vector<16x128xbf16>
    %50 = vector.shape_cast %47 : vector<16x128xbf16> to vector<1x16x128xbf16>
    tpu.vector_store %arg3[%c0_38, %c0_39, %c0_40], %50 {strides = array<i32>} : memref<1x256x128xbf16, #tpu.memory_space<vmem>>, vector<1x16x128xbf16>,
    %cst_41 = arith.constant dense<0.000000e+00> : vector<128xf32>
    %51 = vector.multi_reduction <add>, %46, %cst_41 [0] : vector<16x128xf32> to vector<128xf32>
    %52 = vector.shape_cast %51 : vector<128xf32> to vector<1x128xf32>
    %53 = arith.addf %44, %52 : vector<1x128xf32>
    %54 = arith.mulf %46, %46 : vector<16x128xf32>
    %cst_42 = arith.constant dense<0.000000e+00> : vector<128xf32>
    %55 = vector.multi_reduction <add>, %54, %cst_42 [0] : vector<16x128xf32> to vector<128xf32>
    %56 = vector.shape_cast %55 : vector<128xf32> to vector<1x128xf32>
    %57 = arith.addf %45, %56 : vector<1x128xf32>
    %58 = vector.extract_strided_slice %43 {offsets = [18, 0], sizes = [16, 128], strides = [1, 1]} : vector<288x128xf32> to vector<16x128xf32>
    %59 = arith.truncf %58 : vector<16x128xf32> to vector<16x128xbf16>
    %c0_43 = arith.constant 0 : index
    %c16 = arith.constant 16 : index
    %c0_44 = arith.constant 0 : index
    %60 = vector.load %arg3[%c0_43, %c16, %c0_44] : memref<1x256x128xbf16, #tpu.memory_space<vmem>>, vector<1x16x128xbf16>
    %61 = vector.shape_cast %60 : vector<1x16x128xbf16> to vector<16x128xbf16>
    %62 = vector.shape_cast %59 : vector<16x128xbf16> to vector<1x16x128xbf16>
    tpu.vector_store %arg3[%c0_43, %c16, %c0_44], %62 {strides = array<i32>} : memref<1x256x128xbf16, #tpu.memory_space<vmem>>, vector<1x16x128xbf16>,
    %cst_45 = arith.constant dense<0.000000e+00> : vector<128xf32>
    %63 = vector.multi_reduction <add>, %58, %cst_45 [0] : vector<16x128xf32> to vector<128xf32>
    %64 = vector.shape_cast %63 : vector<128xf32> to vector<1x128xf32>
    %65 = arith.addf %53, %64 : vector<1x128xf32>
    %66 = arith.mulf %58, %58 : vector<16x128xf32>
    %cst_46 = arith.constant dense<0.000000e+00> : vector<128xf32>
    %67 = vector.multi_reduction <add>, %66, %cst_46 [0] : vector<16x128xf32> to vector<128xf32>
    %68 = vector.shape_cast %67 : vector<128xf32> to vector<1x128xf32>
    %69 = arith.addf %57, %68 : vector<1x128xf32>
    %70 = vector.extract_strided_slice %43 {offsets = [36, 0], sizes = [16, 128], strides = [1, 1]} : vector<288x128xf32> to vector<16x128xf32>
    %71 = arith.truncf %70 : vector<16x128xf32> to vector<16x128xbf16>
    %c0_47 = arith.constant 0 : index
    %c32 = arith.constant 32 : index
    %c0_48 = arith.constant 0 : index
    %72 = vector.load %arg3[%c0_47, %c32, %c0_48] : memref<1x256x128xbf16, #tpu.memory_space<vmem>>, vector<1x16x128xbf16>
    %73 = vector.shape_cast %72 : vector<1x16x128xbf16> to vector<16x128xbf16>
    %74 = vector.shape_cast %71 : vector<16x128xbf16> to vector<1x16x128xbf16>
    tpu.vector_store %arg3[%c0_47, %c32, %c0_48], %74 {strides = array<i32>} : memref<1x256x128xbf16, #tpu.memory_space<vmem>>, vector<1x16x128xbf16>,
    %cst_49 = arith.constant dense<0.000000e+00> : vector<128xf32>
    %75 = vector.multi_reduction <add>, %70, %cst_49 [0] : vector<16x128xf32> to vector<128xf32>
    %76 = vector.shape_cast %75 : vector<128xf32> to vector<1x128xf32>
    %77 = arith.addf %65, %76 : vector<1x128xf32>
    %78 = arith.mulf %70, %70 : vector<16x128xf32>
    %cst_50 = arith.constant dense<0.000000e+00> : vector<128xf32>
    %79 = vector.multi_reduction <add>, %78, %cst_50 [0] : vector<16x128xf32> to vector<128xf32>
    %80 = vector.shape_cast %79 : vector<128xf32> to vector<1x128xf32>
    %81 = arith.addf %69, %80 : vector<1x128xf32>
    %82 = vector.extract_strided_slice %43 {offsets = [54, 0], sizes = [16, 128], strides = [1, 1]} : vector<288x128xf32> to vector<16x128xf32>
    %83 = arith.truncf %82 : vector<16x128xf32> to vector<16x128xbf16>
    %c0_51 = arith.constant 0 : index
    %c48 = arith.constant 48 : index
    %c0_52 = arith.constant 0 : index
    %84 = vector.load %arg3[%c0_51, %c48, %c0_52] : memref<1x256x128xbf16, #tpu.memory_space<vmem>>, vector<1x16x128xbf16>
    %85 = vector.shape_cast %84 : vector<1x16x128xbf16> to vector<16x128xbf16>
    %86 = vector.shape_cast %83 : vector<16x128xbf16> to vector<1x16x128xbf16>
    tpu.vector_store %arg3[%c0_51, %c48, %c0_52], %86 {strides = array<i32>} : memref<1x256x128xbf16, #tpu.memory_space<vmem>>, vector<1x16x128xbf16>,
    %cst_53 = arith.constant dense<0.000000e+00> : vector<128xf32>
    %87 = vector.multi_reduction <add>, %82, %cst_53 [0] : vector<16x128xf32> to vector<128xf32>
    %88 = vector.shape_cast %87 : vector<128xf32> to vector<1x128xf32>
    %89 = arith.addf %77, %88 : vector<1x128xf32>
    %90 = arith.mulf %82, %82 : vector<16x128xf32>
    %cst_54 = arith.constant dense<0.000000e+00> : vector<128xf32>
    %91 = vector.multi_reduction <add>, %90, %cst_54 [0] : vector<16x128xf32> to vector<128xf32>
    %92 = vector.shape_cast %91 : vector<128xf32> to vector<1x128xf32>
    %93 = arith.addf %81, %92 : vector<1x128xf32>
    %94 = vector.extract_strided_slice %43 {offsets = [72, 0], sizes = [16, 128], strides = [1, 1]} : vector<288x128xf32> to vector<16x128xf32>
    %95 = arith.truncf %94 : vector<16x128xf32> to vector<16x128xbf16>
    %c0_55 = arith.constant 0 : index
    %c64 = arith.constant 64 : index
    %c0_56 = arith.constant 0 : index
    %96 = vector.load %arg3[%c0_55, %c64, %c0_56] : memref<1x256x128xbf16, #tpu.memory_space<vmem>>, vector<1x16x128xbf16>
    %97 = vector.shape_cast %96 : vector<1x16x128xbf16> to vector<16x128xbf16>
    %98 = vector.shape_cast %95 : vector<16x128xbf16> to vector<1x16x128xbf16>
    tpu.vector_store %arg3[%c0_55, %c64, %c0_56], %98 {strides = array<i32>} : memref<1x256x128xbf16, #tpu.memory_space<vmem>>, vector<1x16x128xbf16>,
    %cst_57 = arith.constant dense<0.000000e+00> : vector<128xf32>
    %99 = vector.multi_reduction <add>, %94, %cst_57 [0] : vector<16x128xf32> to vector<128xf32>
    %100 = vector.shape_cast %99 : vector<128xf32> to vector<1x128xf32>
    %101 = arith.addf %89, %100 : vector<1x128xf32>
    %102 = arith.mulf %94, %94 : vector<16x128xf32>
    %cst_58 = arith.constant dense<0.000000e+00> : vector<128xf32>
    %103 = vector.multi_reduction <add>, %102, %cst_58 [0] : vector<16x128xf32> to vector<128xf32>
    %104 = vector.shape_cast %103 : vector<128xf32> to vector<1x128xf32>
    %105 = arith.addf %93, %104 : vector<1x128xf32>
    %106 = vector.extract_strided_slice %43 {offsets = [90, 0], sizes = [16, 128], strides = [1, 1]} : vector<288x128xf32> to vector<16x128xf32>
    %107 = arith.truncf %106 : vector<16x128xf32> to vector<16x128xbf16>
    %c0_59 = arith.constant 0 : index
    %c80 = arith.constant 80 : index
    %c0_60 = arith.constant 0 : index
    %108 = vector.load %arg3[%c0_59, %c80, %c0_60] : memref<1x256x128xbf16, #tpu.memory_space<vmem>>, vector<1x16x128xbf16>
    %109 = vector.shape_cast %108 : vector<1x16x128xbf16> to vector<16x128xbf16>
    %110 = vector.shape_cast %107 : vector<16x128xbf16> to vector<1x16x128xbf16>
    tpu.vector_store %arg3[%c0_59, %c80, %c0_60], %110 {strides = array<i32>} : memref<1x256x128xbf16, #tpu.memory_space<vmem>>, vector<1x16x128xbf16>,
    %cst_61 = arith.constant dense<0.000000e+00> : vector<128xf32>
    %111 = vector.multi_reduction <add>, %106, %cst_61 [0] : vector<16x128xf32> to vector<128xf32>
    %112 = vector.shape_cast %111 : vector<128xf32> to vector<1x128xf32>
    %113 = arith.addf %101, %112 : vector<1x128xf32>
    %114 = arith.mulf %106, %106 : vector<16x128xf32>
    %cst_62 = arith.constant dense<0.000000e+00> : vector<128xf32>
    %115 = vector.multi_reduction <add>, %114, %cst_62 [0] : vector<16x128xf32> to vector<128xf32>
    %116 = vector.shape_cast %115 : vector<128xf32> to vector<1x128xf32>
    %117 = arith.addf %105, %116 : vector<1x128xf32>
    %118 = vector.extract_strided_slice %43 {offsets = [108, 0], sizes = [16, 128], strides = [1, 1]} : vector<288x128xf32> to vector<16x128xf32>
    %119 = arith.truncf %118 : vector<16x128xf32> to vector<16x128xbf16>
    %c0_63 = arith.constant 0 : index
    %c96 = arith.constant 96 : index
    %c0_64 = arith.constant 0 : index
    %120 = vector.load %arg3[%c0_63, %c96, %c0_64] : memref<1x256x128xbf16, #tpu.memory_space<vmem>>, vector<1x16x128xbf16>
    %121 = vector.shape_cast %120 : vector<1x16x128xbf16> to vector<16x128xbf16>
    %122 = vector.shape_cast %119 : vector<16x128xbf16> to vector<1x16x128xbf16>
    tpu.vector_store %arg3[%c0_63, %c96, %c0_64], %122 {strides = array<i32>} : memref<1x256x128xbf16, #tpu.memory_space<vmem>>, vector<1x16x128xbf16>,
    %cst_65 = arith.constant dense<0.000000e+00> : vector<128xf32>
    %123 = vector.multi_reduction <add>, %118, %cst_65 [0] : vector<16x128xf32> to vector<128xf32>
    %124 = vector.shape_cast %123 : vector<128xf32> to vector<1x128xf32>
    %125 = arith.addf %113, %124 : vector<1x128xf32>
    %126 = arith.mulf %118, %118 : vector<16x128xf32>
    %cst_66 = arith.constant dense<0.000000e+00> : vector<128xf32>
    %127 = vector.multi_reduction <add>, %126, %cst_66 [0] : vector<16x128xf32> to vector<128xf32>
    %128 = vector.shape_cast %127 : vector<128xf32> to vector<1x128xf32>
    %129 = arith.addf %117, %128 : vector<1x128xf32>
    %130 = vector.extract_strided_slice %43 {offsets = [126, 0], sizes = [16, 128], strides = [1, 1]} : vector<288x128xf32> to vector<16x128xf32>
    %131 = arith.truncf %130 : vector<16x128xf32> to vector<16x128xbf16>
    %c0_67 = arith.constant 0 : index
    %c112 = arith.constant 112 : index
    %c0_68 = arith.constant 0 : index
    %132 = vector.load %arg3[%c0_67, %c112, %c0_68] : memref<1x256x128xbf16, #tpu.memory_space<vmem>>, vector<1x16x128xbf16>
    %133 = vector.shape_cast %132 : vector<1x16x128xbf16> to vector<16x128xbf16>
    %134 = vector.shape_cast %131 : vector<16x128xbf16> to vector<1x16x128xbf16>
    tpu.vector_store %arg3[%c0_67, %c112, %c0_68], %134 {strides = array<i32>} : memref<1x256x128xbf16, #tpu.memory_space<vmem>>, vector<1x16x128xbf16>,
    %cst_69 = arith.constant dense<0.000000e+00> : vector<128xf32>
    %135 = vector.multi_reduction <add>, %130, %cst_69 [0] : vector<16x128xf32> to vector<128xf32>
    %136 = vector.shape_cast %135 : vector<128xf32> to vector<1x128xf32>
    %137 = arith.addf %125, %136 : vector<1x128xf32>
    %138 = arith.mulf %130, %130 : vector<16x128xf32>
    %cst_70 = arith.constant dense<0.000000e+00> : vector<128xf32>
    %139 = vector.multi_reduction <add>, %138, %cst_70 [0] : vector<16x128xf32> to vector<128xf32>
    %140 = vector.shape_cast %139 : vector<128xf32> to vector<1x128xf32>
    %141 = arith.addf %129, %140 : vector<1x128xf32>
    %142 = vector.extract_strided_slice %43 {offsets = [144, 0], sizes = [16, 128], strides = [1, 1]} : vector<288x128xf32> to vector<16x128xf32>
    %143 = arith.truncf %142 : vector<16x128xf32> to vector<16x128xbf16>
    %c0_71 = arith.constant 0 : index
    %c128_72 = arith.constant 128 : index
    %c0_73 = arith.constant 0 : index
    %144 = vector.load %arg3[%c0_71, %c128_72, %c0_73] : memref<1x256x128xbf16, #tpu.memory_space<vmem>>, vector<1x16x128xbf16>
    %145 = vector.shape_cast %144 : vector<1x16x128xbf16> to vector<16x128xbf16>
    %146 = vector.shape_cast %143 : vector<16x128xbf16> to vector<1x16x128xbf16>
    tpu.vector_store %arg3[%c0_71, %c128_72, %c0_73], %146 {strides = array<i32>} : memref<1x256x128xbf16, #tpu.memory_space<vmem>>, vector<1x16x128xbf16>,
    %cst_74 = arith.constant dense<0.000000e+00> : vector<128xf32>
    %147 = vector.multi_reduction <add>, %142, %cst_74 [0] : vector<16x128xf32> to vector<128xf32>
    %148 = vector.shape_cast %147 : vector<128xf32> to vector<1x128xf32>
    %149 = arith.addf %137, %148 : vector<1x128xf32>
    %150 = arith.mulf %142, %142 : vector<16x128xf32>
    %cst_75 = arith.constant dense<0.000000e+00> : vector<128xf32>
    %151 = vector.multi_reduction <add>, %150, %cst_75 [0] : vector<16x128xf32> to vector<128xf32>
    %152 = vector.shape_cast %151 : vector<128xf32> to vector<1x128xf32>
    %153 = arith.addf %141, %152 : vector<1x128xf32>
    %154 = vector.extract_strided_slice %43 {offsets = [162, 0], sizes = [16, 128], strides = [1, 1]} : vector<288x128xf32> to vector<16x128xf32>
    %155 = arith.truncf %154 : vector<16x128xf32> to vector<16x128xbf16>
    %c0_76 = arith.constant 0 : index
    %c144 = arith.constant 144 : index
    %c0_77 = arith.constant 0 : index
    %156 = vector.load %arg3[%c0_76, %c144, %c0_77] : memref<1x256x128xbf16, #tpu.memory_space<vmem>>, vector<1x16x128xbf16>
    %157 = vector.shape_cast %156 : vector<1x16x128xbf16> to vector<16x128xbf16>
    %158 = vector.shape_cast %155 : vector<16x128xbf16> to vector<1x16x128xbf16>
    tpu.vector_store %arg3[%c0_76, %c144, %c0_77], %158 {strides = array<i32>} : memref<1x256x128xbf16, #tpu.memory_space<vmem>>, vector<1x16x128xbf16>,
    %cst_78 = arith.constant dense<0.000000e+00> : vector<128xf32>
    %159 = vector.multi_reduction <add>, %154, %cst_78 [0] : vector<16x128xf32> to vector<128xf32>
    %160 = vector.shape_cast %159 : vector<128xf32> to vector<1x128xf32>
    %161 = arith.addf %149, %160 : vector<1x128xf32>
    %162 = arith.mulf %154, %154 : vector<16x128xf32>
    %cst_79 = arith.constant dense<0.000000e+00> : vector<128xf32>
    %163 = vector.multi_reduction <add>, %162, %cst_79 [0] : vector<16x128xf32> to vector<128xf32>
    %164 = vector.shape_cast %163 : vector<128xf32> to vector<1x128xf32>
    %165 = arith.addf %153, %164 : vector<1x128xf32>
    %166 = vector.extract_strided_slice %43 {offsets = [180, 0], sizes = [16, 128], strides = [1, 1]} : vector<288x128xf32> to vector<16x128xf32>
    %167 = arith.truncf %166 : vector<16x128xf32> to vector<16x128xbf16>
    %c0_80 = arith.constant 0 : index
    %c160 = arith.constant 160 : index
    %c0_81 = arith.constant 0 : index
    %168 = vector.load %arg3[%c0_80, %c160, %c0_81] : memref<1x256x128xbf16, #tpu.memory_space<vmem>>, vector<1x16x128xbf16>
    %169 = vector.shape_cast %168 : vector<1x16x128xbf16> to vector<16x128xbf16>
    %170 = vector.shape_cast %167 : vector<16x128xbf16> to vector<1x16x128xbf16>
    tpu.vector_store %arg3[%c0_80, %c160, %c0_81], %170 {strides = array<i32>} : memref<1x256x128xbf16, #tpu.memory_space<vmem>>, vector<1x16x128xbf16>,
    %cst_82 = arith.constant dense<0.000000e+00> : vector<128xf32>
    %171 = vector.multi_reduction <add>, %166, %cst_82 [0] : vector<16x128xf32> to vector<128xf32>
    %172 = vector.shape_cast %171 : vector<128xf32> to vector<1x128xf32>
    %173 = arith.addf %161, %172 : vector<1x128xf32>
    %174 = arith.mulf %166, %166 : vector<16x128xf32>
    %cst_83 = arith.constant dense<0.000000e+00> : vector<128xf32>
    %175 = vector.multi_reduction <add>, %174, %cst_83 [0] : vector<16x128xf32> to vector<128xf32>
    %176 = vector.shape_cast %175 : vector<128xf32> to vector<1x128xf32>
    %177 = arith.addf %165, %176 : vector<1x128xf32>
    %178 = vector.extract_strided_slice %43 {offsets = [198, 0], sizes = [16, 128], strides = [1, 1]} : vector<288x128xf32> to vector<16x128xf32>
    %179 = arith.truncf %178 : vector<16x128xf32> to vector<16x128xbf16>
    %c0_84 = arith.constant 0 : index
    %c176 = arith.constant 176 : index
    %c0_85 = arith.constant 0 : index
    %180 = vector.load %arg3[%c0_84, %c176, %c0_85] : memref<1x256x128xbf16, #tpu.memory_space<vmem>>, vector<1x16x128xbf16>
    %181 = vector.shape_cast %180 : vector<1x16x128xbf16> to vector<16x128xbf16>
    %182 = vector.shape_cast %179 : vector<16x128xbf16> to vector<1x16x128xbf16>
    tpu.vector_store %arg3[%c0_84, %c176, %c0_85], %182 {strides = array<i32>} : memref<1x256x128xbf16, #tpu.memory_space<vmem>>, vector<1x16x128xbf16>,
    %cst_86 = arith.constant dense<0.000000e+00> : vector<128xf32>
    %183 = vector.multi_reduction <add>, %178, %cst_86 [0] : vector<16x128xf32> to vector<128xf32>
    %184 = vector.shape_cast %183 : vector<128xf32> to vector<1x128xf32>
    %185 = arith.addf %173, %184 : vector<1x128xf32>
    %186 = arith.mulf %178, %178 : vector<16x128xf32>
    %cst_87 = arith.constant dense<0.000000e+00> : vector<128xf32>
    %187 = vector.multi_reduction <add>, %186, %cst_87 [0] : vector<16x128xf32> to vector<128xf32>
    %188 = vector.shape_cast %187 : vector<128xf32> to vector<1x128xf32>
    %189 = arith.addf %177, %188 : vector<1x128xf32>
    %190 = vector.extract_strided_slice %43 {offsets = [216, 0], sizes = [16, 128], strides = [1, 1]} : vector<288x128xf32> to vector<16x128xf32>
    %191 = arith.truncf %190 : vector<16x128xf32> to vector<16x128xbf16>
    %c0_88 = arith.constant 0 : index
    %c192 = arith.constant 192 : index
    %c0_89 = arith.constant 0 : index
    %192 = vector.load %arg3[%c0_88, %c192, %c0_89] : memref<1x256x128xbf16, #tpu.memory_space<vmem>>, vector<1x16x128xbf16>
    %193 = vector.shape_cast %192 : vector<1x16x128xbf16> to vector<16x128xbf16>
    %194 = vector.shape_cast %191 : vector<16x128xbf16> to vector<1x16x128xbf16>
    tpu.vector_store %arg3[%c0_88, %c192, %c0_89], %194 {strides = array<i32>} : memref<1x256x128xbf16, #tpu.memory_space<vmem>>, vector<1x16x128xbf16>,
    %cst_90 = arith.constant dense<0.000000e+00> : vector<128xf32>
    %195 = vector.multi_reduction <add>, %190, %cst_90 [0] : vector<16x128xf32> to vector<128xf32>
    %196 = vector.shape_cast %195 : vector<128xf32> to vector<1x128xf32>
    %197 = arith.addf %185, %196 : vector<1x128xf32>
    %198 = arith.mulf %190, %190 : vector<16x128xf32>
    %cst_91 = arith.constant dense<0.000000e+00> : vector<128xf32>
    %199 = vector.multi_reduction <add>, %198, %cst_91 [0] : vector<16x128xf32> to vector<128xf32>
    %200 = vector.shape_cast %199 : vector<128xf32> to vector<1x128xf32>
    %201 = arith.addf %189, %200 : vector<1x128xf32>
    %202 = vector.extract_strided_slice %43 {offsets = [234, 0], sizes = [16, 128], strides = [1, 1]} : vector<288x128xf32> to vector<16x128xf32>
    %203 = arith.truncf %202 : vector<16x128xf32> to vector<16x128xbf16>
    %c0_92 = arith.constant 0 : index
    %c208 = arith.constant 208 : index
    %c0_93 = arith.constant 0 : index
    %204 = vector.load %arg3[%c0_92, %c208, %c0_93] : memref<1x256x128xbf16, #tpu.memory_space<vmem>>, vector<1x16x128xbf16>
    %205 = vector.shape_cast %204 : vector<1x16x128xbf16> to vector<16x128xbf16>
    %206 = vector.shape_cast %203 : vector<16x128xbf16> to vector<1x16x128xbf16>
    tpu.vector_store %arg3[%c0_92, %c208, %c0_93], %206 {strides = array<i32>} : memref<1x256x128xbf16, #tpu.memory_space<vmem>>, vector<1x16x128xbf16>,
    %cst_94 = arith.constant dense<0.000000e+00> : vector<128xf32>
    %207 = vector.multi_reduction <add>, %202, %cst_94 [0] : vector<16x128xf32> to vector<128xf32>
    %208 = vector.shape_cast %207 : vector<128xf32> to vector<1x128xf32>
    %209 = arith.addf %197, %208 : vector<1x128xf32>
    %210 = arith.mulf %202, %202 : vector<16x128xf32>
    %cst_95 = arith.constant dense<0.000000e+00> : vector<128xf32>
    %211 = vector.multi_reduction <add>, %210, %cst_95 [0] : vector<16x128xf32> to vector<128xf32>
    %212 = vector.shape_cast %211 : vector<128xf32> to vector<1x128xf32>
    %213 = arith.addf %201, %212 : vector<1x128xf32>
    %214 = vector.extract_strided_slice %43 {offsets = [252, 0], sizes = [16, 128], strides = [1, 1]} : vector<288x128xf32> to vector<16x128xf32>
    %215 = arith.truncf %214 : vector<16x128xf32> to vector<16x128xbf16>
    %c0_96 = arith.constant 0 : index
    %c224 = arith.constant 224 : index
    %c0_97 = arith.constant 0 : index
    %216 = vector.load %arg3[%c0_96, %c224, %c0_97] : memref<1x256x128xbf16, #tpu.memory_space<vmem>>, vector<1x16x128xbf16>
    %217 = vector.shape_cast %216 : vector<1x16x128xbf16> to vector<16x128xbf16>
    %218 = vector.shape_cast %215 : vector<16x128xbf16> to vector<1x16x128xbf16>
    tpu.vector_store %arg3[%c0_96, %c224, %c0_97], %218 {strides = array<i32>} : memref<1x256x128xbf16, #tpu.memory_space<vmem>>, vector<1x16x128xbf16>,
    %cst_98 = arith.constant dense<0.000000e+00> : vector<128xf32>
    %219 = vector.multi_reduction <add>, %214, %cst_98 [0] : vector<16x128xf32> to vector<128xf32>
    %220 = vector.shape_cast %219 : vector<128xf32> to vector<1x128xf32>
    %221 = arith.addf %209, %220 : vector<1x128xf32>
    %222 = arith.mulf %214, %214 : vector<16x128xf32>
    %cst_99 = arith.constant dense<0.000000e+00> : vector<128xf32>
    %223 = vector.multi_reduction <add>, %222, %cst_99 [0] : vector<16x128xf32> to vector<128xf32>
    %224 = vector.shape_cast %223 : vector<128xf32> to vector<1x128xf32>
    %225 = arith.addf %213, %224 : vector<1x128xf32>
    %226 = vector.extract_strided_slice %43 {offsets = [270, 0], sizes = [16, 128], strides = [1, 1]} : vector<288x128xf32> to vector<16x128xf32>
    %227 = arith.truncf %226 : vector<16x128xf32> to vector<16x128xbf16>
    %c0_100 = arith.constant 0 : index
    %c240 = arith.constant 240 : index
    %c0_101 = arith.constant 0 : index
    %228 = vector.load %arg3[%c0_100, %c240, %c0_101] : memref<1x256x128xbf16, #tpu.memory_space<vmem>>, vector<1x16x128xbf16>
    %229 = vector.shape_cast %228 : vector<1x16x128xbf16> to vector<16x128xbf16>
    %230 = vector.shape_cast %227 : vector<16x128xbf16> to vector<1x16x128xbf16>
    tpu.vector_store %arg3[%c0_100, %c240, %c0_101], %230 {strides = array<i32>} : memref<1x256x128xbf16, #tpu.memory_space<vmem>>, vector<1x16x128xbf16>,
    %cst_102 = arith.constant dense<0.000000e+00> : vector<128xf32>
    %231 = vector.multi_reduction <add>, %226, %cst_102 [0] : vector<16x128xf32> to vector<128xf32>
    %232 = vector.shape_cast %231 : vector<128xf32> to vector<1x128xf32>
    %233 = arith.addf %221, %232 : vector<1x128xf32>
    %234 = arith.mulf %226, %226 : vector<16x128xf32>
    %cst_103 = arith.constant dense<0.000000e+00> : vector<128xf32>
    %235 = vector.multi_reduction <add>, %234, %cst_103 [0] : vector<16x128xf32> to vector<128xf32>
    %236 = vector.shape_cast %235 : vector<128xf32> to vector<1x128xf32>
    %237 = arith.addf %225, %236 : vector<1x128xf32>
    %c0_104 = arith.constant 0 : index
    %c0_105 = arith.constant 0 : index
    %c0_106 = arith.constant 0 : index
    %238 = vector.load %arg4[%c0_104, %c0_105, %c0_106] : memref<1x8x128xf32, #tpu.memory_space<vmem>>, vector<1x1x128xf32>
    %239 = vector.shape_cast %238 : vector<1x1x128xf32> to vector<1x128xf32>
    %240 = vector.shape_cast %233 : vector<1x128xf32> to vector<1x1x128xf32>
    tpu.vector_store %arg4[%c0_104, %c0_105, %c0_106], %240 {strides = array<i32>} : memref<1x8x128xf32, #tpu.memory_space<vmem>>, vector<1x1x128xf32>,
    %c0_107 = arith.constant 0 : index
    %c1_108 = arith.constant 1 : index
    %c0_109 = arith.constant 0 : index
    %241 = vector.load %arg4[%c0_107, %c1_108, %c0_109] : memref<1x8x128xf32, #tpu.memory_space<vmem>>, vector<1x1x128xf32>
    %242 = vector.shape_cast %241 : vector<1x1x128xf32> to vector<1x128xf32>
    %243 = vector.shape_cast %237 : vector<1x128xf32> to vector<1x1x128xf32>
    tpu.vector_store %arg4[%c0_107, %c1_108, %c0_109], %243 {strides = array<i32>} : memref<1x8x128xf32, #tpu.memory_space<vmem>>, vector<1x1x128xf32>,
    return
  }
  func.func @transform_0(%arg0: i32) -> (i32, i32, i32) {
    %c0_i32 = arith.constant 0 : i32
    %c0_i32_0 = arith.constant 0 : i32
    %c0_i32_1 = arith.constant 0 : i32
    return %arg0, %c0_i32, %c0_i32_0 : i32, i32, i32
  }
  func.func @transform_1(%arg0: i32) -> (i32, i32) {
    %c0_i32 = arith.constant 0 : i32
    %c0_i32_0 = arith.constant 0 : i32
    %c0_i32_1 = arith.constant 0 : i32
    return %c0_i32, %c0_i32_0 : i32, i32
  }
  func.func @transform_2(%arg0: i32) -> (i32, i32, i32) {
    %c0_i32 = arith.constant 0 : i32
    %c0_i32_0 = arith.constant 0 : i32
    %c0_i32_1 = arith.constant 0 : i32
    return %arg0, %c0_i32, %c0_i32_0 : i32, i32, i32
  }
  func.func @transform_3(%arg0: i32) -> (i32, i32, i32) {
    %c0_i32 = arith.constant 0 : i32
    %c0_i32_0 = arith.constant 0 : i32
    %c0_i32_1 = arith.constant 0 : i32
    return %arg0, %c0_i32, %c0_i32_0 : i32, i32, i32
  }
}

module attributes {stable_mosaic.version = 11 : i64} {
  func.func @_bn_relu_kernel(%arg0: i32, %arg1: memref<512x128xbf16, #tpu.memory_space<vmem>>, %arg2: memref<1x128xf32, #tpu.memory_space<vmem>>, %arg3: memref<1x128xf32, #tpu.memory_space<vmem>>, %arg4: memref<512x128xbf16, #tpu.memory_space<vmem>>) attributes {dimension_semantics = [#tpu.dimension_semantics<parallel>], iteration_bounds = array<i64: 1>, scalar_prefetch = 0 : i64, scratch_operands = 0 : i64, tpu.core_type = #tpu.core_type<tc>, window_params = [{transform_indices = @transform_0, window_bounds = array<i64: 512, 128>}, {pipeline_mode = #tpu.pipeline_mode<synchronous>, transform_indices = @transform_1, window_bounds = array<i64: 1, 128>}, {pipeline_mode = #tpu.pipeline_mode<synchronous>, transform_indices = @transform_2, window_bounds = array<i64: 1, 128>}, {transform_indices = @transform_3, window_bounds = array<i64: 512, 128>}]} {
    %c0 = arith.constant 0 : index
    %c0_0 = arith.constant 0 : index
    %0 = vector.load %arg1[%c0, %c0_0] : memref<512x128xbf16, #tpu.memory_space<vmem>>, vector<512x128xbf16>
    %1 = arith.extf %0 : vector<512x128xbf16> to vector<512x128xf32>
    %c0_1 = arith.constant 0 : index
    %c0_2 = arith.constant 0 : index
    %2 = vector.load %arg2[%c0_1, %c0_2] : memref<1x128xf32, #tpu.memory_space<vmem>>, vector<1x128xf32>
    %3 = vector.broadcast %2 : vector<1x128xf32> to vector<512x128xf32>
    %4 = arith.mulf %1, %3 : vector<512x128xf32>
    %c0_3 = arith.constant 0 : index
    %c0_4 = arith.constant 0 : index
    %5 = vector.load %arg3[%c0_3, %c0_4] : memref<1x128xf32, #tpu.memory_space<vmem>>, vector<1x128xf32>
    %6 = vector.broadcast %5 : vector<1x128xf32> to vector<512x128xf32>
    %7 = arith.addf %4, %6 : vector<512x128xf32>
    %cst = arith.constant 0.000000e+00 : f32
    %8 = vector.broadcast %cst : f32 to vector<512x128xf32>
    %9 = arith.maximumf %7, %8 : vector<512x128xf32>
    %10 = arith.truncf %9 : vector<512x128xf32> to vector<512x128xbf16>
    %c0_5 = arith.constant 0 : index
    %c0_6 = arith.constant 0 : index
    %11 = vector.load %arg4[%c0_5, %c0_6] : memref<512x128xbf16, #tpu.memory_space<vmem>>, vector<512x128xbf16>
    tpu.vector_store %arg4[%c0_5, %c0_6], %10 {strides = array<i32>} : memref<512x128xbf16, #tpu.memory_space<vmem>>, vector<512x128xbf16>,
    return
  }
  func.func @transform_0(%arg0: i32) -> (i32, i32) {
    %c0_i32 = arith.constant 0 : i32
    %c0_i32_0 = arith.constant 0 : i32
    return %arg0, %c0_i32 : i32, i32
  }
  func.func @transform_1(%arg0: i32) -> (i32, i32) {
    %c0_i32 = arith.constant 0 : i32
    %c0_i32_0 = arith.constant 0 : i32
    %c0_i32_1 = arith.constant 0 : i32
    return %c0_i32, %c0_i32_0 : i32, i32
  }
  func.func @transform_2(%arg0: i32) -> (i32, i32) {
    %c0_i32 = arith.constant 0 : i32
    %c0_i32_0 = arith.constant 0 : i32
    %c0_i32_1 = arith.constant 0 : i32
    return %c0_i32, %c0_i32_0 : i32, i32
  }
  func.func @transform_3(%arg0: i32) -> (i32, i32) {
    %c0_i32 = arith.constant 0 : i32
    %c0_i32_0 = arith.constant 0 : i32
    return %arg0, %c0_i32 : i32, i32
  }
}

module attributes {stable_mosaic.version = 11 : i64} {
  func.func @_matmul_stats_kernel(%arg0: i32, %arg1: memref<256x128xbf16, #tpu.memory_space<vmem>>, %arg2: memref<128x128xbf16, #tpu.memory_space<vmem>>, %arg3: memref<256x128xbf16, #tpu.memory_space<vmem>>, %arg4: memref<8x128xf32, #tpu.memory_space<vmem>>) attributes {dimension_semantics = [#tpu.dimension_semantics<parallel>], iteration_bounds = array<i64: 2>, scalar_prefetch = 0 : i64, scratch_operands = 0 : i64, tpu.core_type = #tpu.core_type<tc>, window_params = [{transform_indices = @transform_0, window_bounds = array<i64: 256, 128>}, {pipeline_mode = #tpu.pipeline_mode<synchronous>, transform_indices = @transform_1, window_bounds = array<i64: 128, 128>}, {transform_indices = @transform_2, window_bounds = array<i64: 256, 128>}, {transform_indices = @transform_3, window_bounds = array<i64: 8, 128>}]} {
    %c0 = arith.constant 0 : index
    %c0_0 = arith.constant 0 : index
    %0 = vector.load %arg1[%c0, %c0_0] : memref<256x128xbf16, #tpu.memory_space<vmem>>, vector<256x128xbf16>
    %c0_1 = arith.constant 0 : index
    %c0_2 = arith.constant 0 : index
    %1 = vector.load %arg2[%c0_1, %c0_2] : memref<128x128xbf16, #tpu.memory_space<vmem>>, vector<128x128xbf16>
    %cst = arith.constant dense<0.000000e+00> : vector<256x128xf32>
    %2 = tpu.matmul %0, %1, %cst {dimension_numbers = #tpu.dot_dimension_numbers<[1], [0], [0], [1], [0, 0, 1, 1], [], []>} : vector<256x128xbf16>, vector<128x128xbf16>, vector<256x128xf32> -> vector<256x128xf32>
    %3 = arith.truncf %2 : vector<256x128xf32> to vector<256x128xbf16>
    %c0_3 = arith.constant 0 : index
    %c0_4 = arith.constant 0 : index
    %4 = vector.load %arg3[%c0_3, %c0_4] : memref<256x128xbf16, #tpu.memory_space<vmem>>, vector<256x128xbf16>
    tpu.vector_store %arg3[%c0_3, %c0_4], %3 {strides = array<i32>} : memref<256x128xbf16, #tpu.memory_space<vmem>>, vector<256x128xbf16>,
    %cst_5 = arith.constant dense<0.000000e+00> : vector<128xf32>
    %5 = vector.multi_reduction <add>, %2, %cst_5 [0] : vector<256x128xf32> to vector<128xf32>
    %6 = vector.shape_cast %5 : vector<128xf32> to vector<1x128xf32>
    %c0_6 = arith.constant 0 : index
    %c0_7 = arith.constant 0 : index
    %7 = vector.load %arg4[%c0_6, %c0_7] : memref<8x128xf32, #tpu.memory_space<vmem>>, vector<1x128xf32>
    tpu.vector_store %arg4[%c0_6, %c0_7], %6 {strides = array<i32>} : memref<8x128xf32, #tpu.memory_space<vmem>>, vector<1x128xf32>,
    %8 = arith.mulf %2, %2 : vector<256x128xf32>
    %cst_8 = arith.constant dense<0.000000e+00> : vector<128xf32>
    %9 = vector.multi_reduction <add>, %8, %cst_8 [0] : vector<256x128xf32> to vector<128xf32>
    %10 = vector.shape_cast %9 : vector<128xf32> to vector<1x128xf32>
    %c1 = arith.constant 1 : index
    %c0_9 = arith.constant 0 : index
    %11 = vector.load %arg4[%c1, %c0_9] : memref<8x128xf32, #tpu.memory_space<vmem>>, vector<1x128xf32>
    tpu.vector_store %arg4[%c1, %c0_9], %10 {strides = array<i32>} : memref<8x128xf32, #tpu.memory_space<vmem>>, vector<1x128xf32>,
    return
  }
  func.func @transform_0(%arg0: i32) -> (i32, i32) {
    %c0_i32 = arith.constant 0 : i32
    %c0_i32_0 = arith.constant 0 : i32
    return %arg0, %c0_i32 : i32, i32
  }
  func.func @transform_1(%arg0: i32) -> (i32, i32) {
    %c0_i32 = arith.constant 0 : i32
    %c0_i32_0 = arith.constant 0 : i32
    %c0_i32_1 = arith.constant 0 : i32
    return %c0_i32, %c0_i32_0 : i32, i32
  }
  func.func @transform_2(%arg0: i32) -> (i32, i32) {
    %c0_i32 = arith.constant 0 : i32
    %c0_i32_0 = arith.constant 0 : i32
    return %arg0, %c0_i32 : i32, i32
  }
  func.func @transform_3(%arg0: i32) -> (i32, i32) {
    %c0_i32 = arith.constant 0 : i32
    %c0_i32_0 = arith.constant 0 : i32
    return %arg0, %c0_i32 : i32, i32
  }
}

module attributes {stable_mosaic.version = 11 : i64} {
  func.func @_bn_add_relu_kernel(%arg0: i32, %arg1: memref<512x128xbf16, #tpu.memory_space<vmem>>, %arg2: memref<1x128xf32, #tpu.memory_space<vmem>>, %arg3: memref<1x128xf32, #tpu.memory_space<vmem>>, %arg4: memref<512x128xbf16, #tpu.memory_space<vmem>>, %arg5: memref<1x128xf32, #tpu.memory_space<vmem>>, %arg6: memref<1x128xf32, #tpu.memory_space<vmem>>, %arg7: memref<512x128xbf16, #tpu.memory_space<vmem>>) attributes {dimension_semantics = [#tpu.dimension_semantics<parallel>], iteration_bounds = array<i64: 1>, scalar_prefetch = 0 : i64, scratch_operands = 0 : i64, tpu.core_type = #tpu.core_type<tc>, window_params = [{transform_indices = @transform_0, window_bounds = array<i64: 512, 128>}, {pipeline_mode = #tpu.pipeline_mode<synchronous>, transform_indices = @transform_1, window_bounds = array<i64: 1, 128>}, {pipeline_mode = #tpu.pipeline_mode<synchronous>, transform_indices = @transform_2, window_bounds = array<i64: 1, 128>}, {transform_indices = @transform_3, window_bounds = array<i64: 512, 128>}, {pipeline_mode = #tpu.pipeline_mode<synchronous>, transform_indices = @transform_4, window_bounds = array<i64: 1, 128>}, {pipeline_mode = #tpu.pipeline_mode<synchronous>, transform_indices = @transform_5, window_bounds = array<i64: 1, 128>}, {transform_indices = @transform_6, window_bounds = array<i64: 512, 128>}]} {
    %c0 = arith.constant 0 : index
    %c0_0 = arith.constant 0 : index
    %0 = vector.load %arg1[%c0, %c0_0] : memref<512x128xbf16, #tpu.memory_space<vmem>>, vector<512x128xbf16>
    %1 = arith.extf %0 : vector<512x128xbf16> to vector<512x128xf32>
    %c0_1 = arith.constant 0 : index
    %c0_2 = arith.constant 0 : index
    %2 = vector.load %arg2[%c0_1, %c0_2] : memref<1x128xf32, #tpu.memory_space<vmem>>, vector<1x128xf32>
    %3 = vector.broadcast %2 : vector<1x128xf32> to vector<512x128xf32>
    %4 = arith.mulf %1, %3 : vector<512x128xf32>
    %c0_3 = arith.constant 0 : index
    %c0_4 = arith.constant 0 : index
    %5 = vector.load %arg3[%c0_3, %c0_4] : memref<1x128xf32, #tpu.memory_space<vmem>>, vector<1x128xf32>
    %6 = vector.broadcast %5 : vector<1x128xf32> to vector<512x128xf32>
    %7 = arith.addf %4, %6 : vector<512x128xf32>
    %c0_5 = arith.constant 0 : index
    %c0_6 = arith.constant 0 : index
    %8 = vector.load %arg4[%c0_5, %c0_6] : memref<512x128xbf16, #tpu.memory_space<vmem>>, vector<512x128xbf16>
    %9 = arith.extf %8 : vector<512x128xbf16> to vector<512x128xf32>
    %c0_7 = arith.constant 0 : index
    %c0_8 = arith.constant 0 : index
    %10 = vector.load %arg5[%c0_7, %c0_8] : memref<1x128xf32, #tpu.memory_space<vmem>>, vector<1x128xf32>
    %11 = vector.broadcast %10 : vector<1x128xf32> to vector<512x128xf32>
    %12 = arith.mulf %9, %11 : vector<512x128xf32>
    %c0_9 = arith.constant 0 : index
    %c0_10 = arith.constant 0 : index
    %13 = vector.load %arg6[%c0_9, %c0_10] : memref<1x128xf32, #tpu.memory_space<vmem>>, vector<1x128xf32>
    %14 = vector.broadcast %13 : vector<1x128xf32> to vector<512x128xf32>
    %15 = arith.addf %12, %14 : vector<512x128xf32>
    %16 = arith.addf %7, %15 : vector<512x128xf32>
    %cst = arith.constant 0.000000e+00 : f32
    %17 = vector.broadcast %cst : f32 to vector<512x128xf32>
    %18 = arith.maximumf %16, %17 : vector<512x128xf32>
    %19 = arith.truncf %18 : vector<512x128xf32> to vector<512x128xbf16>
    %c0_11 = arith.constant 0 : index
    %c0_12 = arith.constant 0 : index
    %20 = vector.load %arg7[%c0_11, %c0_12] : memref<512x128xbf16, #tpu.memory_space<vmem>>, vector<512x128xbf16>
    tpu.vector_store %arg7[%c0_11, %c0_12], %19 {strides = array<i32>} : memref<512x128xbf16, #tpu.memory_space<vmem>>, vector<512x128xbf16>,
    return
  }
  func.func @transform_0(%arg0: i32) -> (i32, i32) {
    %c0_i32 = arith.constant 0 : i32
    %c0_i32_0 = arith.constant 0 : i32
    return %arg0, %c0_i32 : i32, i32
  }
  func.func @transform_1(%arg0: i32) -> (i32, i32) {
    %c0_i32 = arith.constant 0 : i32
    %c0_i32_0 = arith.constant 0 : i32
    %c0_i32_1 = arith.constant 0 : i32
    return %c0_i32, %c0_i32_0 : i32, i32
  }
  func.func @transform_2(%arg0: i32) -> (i32, i32) {
    %c0_i32 = arith.constant 0 : i32
    %c0_i32_0 = arith.constant 0 : i32
    %c0_i32_1 = arith.constant 0 : i32
    return %c0_i32, %c0_i32_0 : i32, i32
  }
  func.func @transform_3(%arg0: i32) -> (i32, i32) {
    %c0_i32 = arith.constant 0 : i32
    %c0_i32_0 = arith.constant 0 : i32
    return %arg0, %c0_i32 : i32, i32
  }
  func.func @transform_4(%arg0: i32) -> (i32, i32) {
    %c0_i32 = arith.constant 0 : i32
    %c0_i32_0 = arith.constant 0 : i32
    %c0_i32_1 = arith.constant 0 : i32
    return %c0_i32, %c0_i32_0 : i32, i32
  }
  func.func @transform_5(%arg0: i32) -> (i32, i32) {
    %c0_i32 = arith.constant 0 : i32
    %c0_i32_0 = arith.constant 0 : i32
    %c0_i32_1 = arith.constant 0 : i32
    return %c0_i32, %c0_i32_0 : i32, i32
  }
  func.func @transform_6(%arg0: i32) -> (i32, i32) {
    %c0_i32 = arith.constant 0 : i32
    %c0_i32_0 = arith.constant 0 : i32
    return %arg0, %c0_i32 : i32, i32
  }
}

</mosaic_0001>

<bundles_post_ra>
// kernel: resblock_forward.6
= control target key start
LH: loop header
LB: loop body
LE: loop exit
PB: predicated region body
PF: predicated region fallthrough
CT: control target
= control target key end

     0   :  { %8 = vsyncpa [#allocation3], 0  ;;  %s1523_s0 = inlined_call_operand.hbm [shape: bf16[512,128], index: 0, kind: input, shape index: {}]   ;;  %s1524_s1 = inlined_call_operand.hbm [shape: f32[1,128], index: 1, kind: input, shape index: {}]   ;;  %s1525_s2 = inlined_call_operand.hbm [shape: f32[1,128], index: 2, kind: input, shape index: {}]   ;;  %s1526_s3 = inlined_call_operand.hbm [shape: bf16[512,128], index: 3, kind: output, shape index: {}]  }
   0x1   :  { %9 = vsyncpa [#allocation6], 0 }
   0x2   :  { %10 = vsyncpa [#allocation4], 0  ;;  %s1304_s12 = smov [#allocation5]   ;;  %s1305_s14 = smov [#allocation2]  }
   0x3   :  { %s29_s13 = sshll.u32 %s1304_s12, 4  ;;  %s16_s15 = sshll.u32 %s1305_s14, 4  ;;  %s30_s13 = int_to_ptr.vmem [resolvable:$true] %s29_s13  ;;  %s1330_s15 = int_to_ptr.vmem [resolvable:$true] %s16_s15 }
   0x4   :  { %s1210_s18 = scalar_lea.hbm %s1524_s1, 16 }
   0x5   :  { %p1211_p0 = scmp.ne.s32.totalorder %s1524_s1, %s1210_s18  ;;  %p1214_p1 = scmp.lt.u32.totalorder %s1210_s18, %s1524_s1 }
   0x7   :  { %p1216_p2 = pnand %p1214_p1, %p1211_p0 }
   0x9   :  { %1219 = shalt.err (!%p1216_p2)
}
   0xa   :  { %s1220_s23 = scalar_lea.vmem %s30_s13, 16  ;;  %s1224_s24 = scalar_lea.vmem %s30_s13, 32 }
   0xb   :  { %p1221_p3 = scmp.ne.s32.totalorder %s30_s13, %s1220_s23  ;;  %p1225_p4 = scmp.lt.s32.totalorder %s30_s13, %s30_s13 }
   0xc   :  { %p1226_p5 = scmp.lt.s32.totalorder %s1224_s24, %s1220_s23 }
   0xe   :  { %p1227_p6 = por %p1226_p5, %p1225_p4 }
  0x10   :  { %p1228_p7 = pnand %p1227_p6, %p1221_p3 }
  0x12   :  { %1231 = shalt.err (!%p1228_p7)
}
  0x13   :  { %32 = dma.hbm_to_vmem [thread:$0]  %s1524_s1, 16, %s30_s13, [#allocation6]  }
  0x14   :  { %s1232_s29 = scalar_lea.hbm %s1523_s0, 4096 }
  0x15   :  { %p1233_p8 = scmp.ne.s32.totalorder %s1523_s0, %s1232_s29  ;;  %p1236_p9 = scmp.lt.u32.totalorder %s1232_s29, %s1523_s0 }
  0x17   :  { %p1238_p10 = pnand %p1236_p9, %p1233_p8 }
  0x19   :  { %1241 = shalt.err (!%p1238_p10)
}
  0x1a   :  { %s1242_s7 = scalar_lea.vmem %s1330_s15, 4096  ;;  %p1247_p12 = scmp.lt.s32.totalorder %s1330_s15, %s1330_s15 }
  0x1b   :  { %p1243_p11 = scmp.ne.s32.totalorder %s1330_s15, %s1242_s7  ;;  %p1248_p13 = scmp.lt.s32.totalorder %s1242_s7, %s1242_s7 }
  0x1d   :  { %p1249_p0 = por %p1248_p13, %p1247_p12 }
  0x1f   :  { %p1250_p1 = pnand %p1249_p0, %p1243_p11 }
  0x21   :  { %1253 = shalt.err (!%p1250_p1)
}
  0x22   :  { %s1306_s1 = smov 64   ;;  %s1307_s8 = smov 4  }
  0x23   :  { %22 = dma.hbm_to_vmem [thread:$0]  %s1523_s0, 4096, %s1330_s15, [#allocation3], %s1306_s1, %s1306_s1, %s1307_s8  }
  0x24   :  { %s1308_s11 = smov [#allocation7]   ;;  %s1254_s16 = scalar_lea.hbm %s1525_s2, 16 }
  0x25   :  { %s39_s12 = sshll.u32 %s1308_s11, 4  ;;  %p1255_p2 = scmp.ne.s32.totalorder %s1525_s2, %s1254_s16  ;;  %s40_s12 = int_to_ptr.vmem [resolvable:$true] %s39_s12 }
  0x26   :  { %p1258_p3 = scmp.lt.u32.totalorder %s1254_s16, %s1525_s2 }
  0x28   :  { %p1260_p4 = pnand %p1258_p3, %p1255_p2 }
  0x2a   :  { %1263 = shalt.err (!%p1260_p4)
}
  0x2b   :  { %s1264_s21 = scalar_lea.vmem %s40_s12, 16  ;;  %s1268_s0 = scalar_lea.vmem %s40_s12, 32 }
  0x2c   :  { %p1265_p5 = scmp.ne.s32.totalorder %s40_s12, %s1264_s21  ;;  %p1269_p6 = scmp.lt.s32.totalorder %s40_s12, %s40_s12 }
  0x2d   :  { %p1270_p7 = scmp.lt.s32.totalorder %s1268_s0, %s1264_s21 }
  0x2f   :  { %p1271_p8 = por %p1270_p7, %p1269_p6 }
  0x31   :  { %p1272_p9 = pnand %p1271_p8, %p1265_p5 }
  0x33   :  { %1275 = shalt.err (!%p1272_p9)
}
  0x34   :  { %42 = dma.hbm_to_vmem [thread:$0]  %s1525_s2, 16, %s40_s12, [#allocation6]  }
  0x35   :  { %1298 = dma.done.wait [#allocation3], 4096  }
  0x36   :  { %1299 = vsyncadd [#allocation3], 4294963200 }
  0x37   :  { %1300 = dma.done.wait [#allocation6], 32  }
  0x38   :  { %1301 = vsyncadd [#allocation6], 4294967264  ;;  %v855_v0 = vld [vmem:[#allocation2] sm:$0xff]   ;;  %v1142_v4 = vld [vmem:[#allocation2 + $0x8] sm:$0xff]   ;;  %s1309_s2 = smov [#allocation8]  }
  0x39   :  { %v1376_v1 = vld [vmem:[#allocation5] ss:$0 sm:$0xff]  ;;  %v856_v2 = vunpack.c.l.bf16 %v855_v0  ;;  %v857_v3 = vunpack.c.h.bf16 %v855_v0  ;;  %v1143_v5 = vld [vmem:[#allocation2 + $0x10] sm:$0xff]   ;;  %v1144_v6 = vld [vmem:[#allocation2 + $0x18] sm:$0xff]   ;;  %v860_v8 = vunpack.c.l.bf16 %v1142_v4  ;;  %v861_v9 = vunpack.c.h.bf16 %v1142_v4  ;;  %s711_s23 = sshll.u32 %s1309_s2, 4  ;;  %s712_s23 = int_to_ptr.vmem [resolvable:$true] %s711_s23 }
  0x3a   :  { %v1378_v7 = vld [vmem:[#allocation7] ss:$0 sm:$0xff]  ;;  %v864_v10 = vunpack.c.l.bf16 %v1143_v5  ;;  %v865_v11 = vunpack.c.h.bf16 %v1143_v5  ;;  %v868_v14 = vunpack.c.l.bf16 %v1144_v6  ;;  %v869_v15 = vunpack.c.h.bf16 %v1144_v6  ;;  %v1146_v33 = vld [vmem:[#allocation2 + $0x28] sm:$0xff]   ;;  %v1147_v38 = vld [vmem:[#allocation2 + $0x30] sm:$0xff]   ;;  %s1276_s24 = scalar_lea.vmem %s712_s23, 4096  ;;  %p1281_p11 = scmp.lt.s32.totalorder %s712_s23, %s712_s23 }
  0x3b   :  { %v187_v12 = vmul.f32 %v856_v2, %v1376_v1  ;;  %v188_v13 = vmul.f32 %v857_v3, %v1376_v1  ;;  %v189_v16 = vmul.f32 %v860_v8, %v1376_v1  ;;  %v190_v17 = vmul.f32 %v861_v9, %v1376_v1  ;;  %v1145_v28 = vld [vmem:[#allocation2 + $0x20] sm:$0xff]   ;;  %v1148_v43 = vld [vmem:[#allocation2 + $0x38] sm:$0xff]   ;;  %p1277_p10 = scmp.ne.s32.totalorder %s712_s23, %s1276_s24  ;;  %p1282_p12 = scmp.lt.s32.totalorder %s1276_s24, %s1276_s24 }
  0x3c   :  { %v191_v18 = vmul.f32 %v864_v10, %v1376_v1  ;;  %v192_v19 = vmul.f32 %v865_v11, %v1376_v1  ;;  %v193_v22 = vmul.f32 %v868_v14, %v1376_v1  ;;  %v194_v23 = vmul.f32 %v869_v15, %v1376_v1  ;;  %v1149_v0 = vld [vmem:[#allocation2 + $0x40] sm:$0xff]   ;;  %v1150_v11 = vld [vmem:[#allocation2 + $0x48] sm:$0xff]  }
  0x3d   :  { %v258_v20 = vadd.f32 %v1378_v7, %v187_v12  ;;  %v259_v21 = vadd.f32 %v1378_v7, %v188_v13  ;;  %v260_v24 = vadd.f32 %v1378_v7, %v189_v16  ;;  %v261_v25 = vadd.f32 %v1378_v7, %v190_v17  ;;  %v1151_v16 = vld [vmem:[#allocation2 + $0x50] sm:$0xff]   ;;  %p1283_p13 = por %p1282_p12, %p1281_p11 }
  0x3e   :  { %v262_v26 = vadd.f32 %v1378_v7, %v191_v18  ;;  %v263_v27 = vadd.f32 %v1378_v7, %v192_v19  ;;  %v264_v31 = vadd.f32 %v1378_v7, %v193_v22  ;;  %v265_v32 = vadd.f32 %v1378_v7, %v194_v23 }
  0x3f   :  { %v322_v29 = vmax.f32 %v258_v20, 0.0  ;;  %v323_v30 = vmax.f32 %v259_v21, 0.0  ;;  %v324_v34 = vmax.f32 %v260_v24, 0.0  ;;  %v325_v35 = vmax.f32 %v261_v25, 0.0  ;;  %v1152_v25 = vld [vmem:[#allocation2 + $0x58] sm:$0xff]   ;;  %p1284_p0 = pnand %p1283_p13, %p1277_p10 }
  0x40   :  { %v326_v36 = vmax.f32 %v262_v26, 0.0  ;;  %v327_v37 = vmax.f32 %v263_v27, 0.0  ;;  %v328_v40 = vmax.f32 %v264_v31, 0.0  ;;  %v329_v41 = vmax.f32 %v265_v32, 0.0 }
  0x41   :  { %v985_v39 = vpack.c.bf16 %v323_v30, %v322_v29  ;;  %v872_v42 = vunpack.c.l.bf16 %v1145_v28  ;;  %v990_v44 = vpack.c.bf16 %v325_v35, %v324_v34  ;;  %v873_v46 = vunpack.c.h.bf16 %v1145_v28 }
  0x42   :  { %v995_v45 = vpack.c.bf16 %v327_v37, %v326_v36  ;;  %v876_v47 = vunpack.c.l.bf16 %v1146_v33  ;;  %v1000_v48 = vpack.c.bf16 %v329_v41, %v328_v40  ;;  %v877_v50 = vunpack.c.h.bf16 %v1146_v33 }
  0x43   :  { %986 = vst [vmem:[#allocation8] sm:$0xff] %v985_v39   ;;  %v195_v49 = vmul.f32 %v872_v42, %v1376_v1  ;;  %v880_v51 = vunpack.c.l.bf16 %v1147_v38  ;;  %1173 = vst [vmem:[#allocation8 + $0x8] sm:$0xff] %v990_v44   ;;  %v196_v52 = vmul.f32 %v873_v46, %v1376_v1  ;;  %v881_v54 = vunpack.c.h.bf16 %v1147_v38  ;;  %v1153_v38 = vld [vmem:[#allocation2 + $0x60] sm:$0xff]  }
  0x44   :  { %1174 = vst [vmem:[#allocation8 + $0x10] sm:$0xff] %v995_v45   ;;  %v197_v53 = vmul.f32 %v876_v47, %v1376_v1  ;;  %v884_v55 = vunpack.c.l.bf16 %v1148_v43  ;;  %1175 = vst [vmem:[#allocation8 + $0x18] sm:$0xff] %v1000_v48   ;;  %v198_v57 = vmul.f32 %v877_v50, %v1376_v1  ;;  %v885_v59 = vunpack.c.h.bf16 %v1148_v43 }
  0x45   :  { %v266_v56 = vadd.f32 %v1378_v7, %v195_v49  ;;  %v199_v58 = vmul.f32 %v880_v51, %v1376_v1  ;;  %v267_v60 = vadd.f32 %v1378_v7, %v196_v52  ;;  %v200_v62 = vmul.f32 %v881_v54, %v1376_v1  ;;  %v1154_v51 = vld [vmem:[#allocation2 + $0x68] sm:$0xff]  }
  0x46   :  { %v268_v61 = vadd.f32 %v1378_v7, %v197_v53  ;;  %v201_v63 = vmul.f32 %v884_v55, %v1376_v1  ;;  %v269_v3 = vadd.f32 %v1378_v7, %v198_v57  ;;  %v202_v5 = vmul.f32 %v885_v59, %v1376_v1 }
  0x47   :  { %v330_v2 = vmax.f32 %v266_v56, 0.0  ;;  %v270_v4 = vadd.f32 %v1378_v7, %v199_v58  ;;  %v331_v6 = vmax.f32 %v267_v60, 0.0  ;;  %v271_v9 = vadd.f32 %v1378_v7, %v200_v62  ;;  %v1155_v60 = vld [vmem:[#allocation2 + $0x70] sm:$0xff]  }
  0x48   :  { %v332_v8 = vmax.f32 %v268_v61, 0.0  ;;  %v272_v10 = vadd.f32 %v1378_v7, %v201_v63  ;;  %v333_v12 = vmax.f32 %v269_v3, 0.0  ;;  %v273_v14 = vadd.f32 %v1378_v7, %v202_v5 }
  0x49   :  { %v334_v13 = vmax.f32 %v270_v4, 0.0  ;;  %v888_v15 = vunpack.c.l.bf16 %v1149_v0  ;;  %v1005_v17 = vpack.c.bf16 %v331_v6, %v330_v2  ;;  %v335_v18 = vmax.f32 %v271_v9, 0.0  ;;  %v1156_v2 = vld [vmem:[#allocation2 + $0x78] sm:$0xff]  }
  0x4a   :  { %v336_v19 = vmax.f32 %v272_v10, 0.0  ;;  %v889_v20 = vunpack.c.h.bf16 %v1149_v0  ;;  %v1010_v21 = vpack.c.bf16 %v333_v12, %v332_v8  ;;  %v337_v22 = vmax.f32 %v273_v14, 0.0  ;;  %v1157_v12 = vld [vmem:[#allocation2 + $0x80] sm:$0xff]  }
  0x4b   :  { %v203_v23 = vmul.f32 %v888_v15, %v1376_v1  ;;  %v892_v24 = vunpack.c.l.bf16 %v1150_v11  ;;  %1176 = vst [vmem:[#allocation8 + $0x20] sm:$0xff] %v1005_v17   ;;  %v1015_v26 = vpack.c.bf16 %v335_v18, %v334_v13  ;;  %v893_v28 = vunpack.c.h.bf16 %v1150_v11 }
  0x4c   :  { %v204_v27 = vmul.f32 %v889_v20, %v1376_v1  ;;  %v896_v29 = vunpack.c.l.bf16 %v1151_v16  ;;  %1177 = vst [vmem:[#allocation8 + $0x28] sm:$0xff] %v1010_v21   ;;  %v1020_v30 = vpack.c.bf16 %v337_v22, %v336_v19  ;;  %v897_v33 = vunpack.c.h.bf16 %v1151_v16 }
  0x4d   :  { %v274_v31 = vadd.f32 %v1378_v7, %v203_v23  ;;  %v205_v32 = vmul.f32 %v892_v24, %v1376_v1  ;;  %1178 = vst [vmem:[#allocation8 + $0x30] sm:$0xff] %v1015_v26   ;;  %v206_v35 = vmul.f32 %v893_v28, %v1376_v1  ;;  %v900_v37 = vunpack.c.l.bf16 %v1152_v25 }
  0x4e   :  { %v275_v34 = vadd.f32 %v1378_v7, %v204_v27  ;;  %v207_v36 = vmul.f32 %v896_v29, %v1376_v1  ;;  %1179 = vst [vmem:[#allocation8 + $0x38] sm:$0xff] %v1020_v30   ;;  %v208_v41 = vmul.f32 %v897_v33, %v1376_v1  ;;  %v901_v42 = vunpack.c.h.bf16 %v1152_v25  ;;  %v1158_v29 = vld [vmem:[#allocation2 + $0x88] sm:$0xff]  }
  0x4f   :  { %v338_v39 = vmax.f32 %v274_v31, 0.0  ;;  %v276_v40 = vadd.f32 %v1378_v7, %v205_v32  ;;  %v277_v44 = vadd.f32 %v1378_v7, %v206_v35  ;;  %v209_v46 = vmul.f32 %v900_v37, %v1376_v1 }
  0x50   :  { %v339_v43 = vmax.f32 %v275_v34, 0.0  ;;  %v278_v45 = vadd.f32 %v1378_v7, %v207_v36  ;;  %v279_v48 = vadd.f32 %v1378_v7, %v208_v41  ;;  %v210_v49 = vmul.f32 %v901_v42, %v1376_v1  ;;  %v1159_v34 = vld [vmem:[#allocation2 + $0x90] sm:$0xff]  }
  0x51   :  { %v340_v47 = vmax.f32 %v276_v40, 0.0  ;;  %v904_v50 = vunpack.c.l.bf16 %v1153_v38  ;;  %v341_v53 = vmax.f32 %v277_v44, 0.0  ;;  %v280_v55 = vadd.f32 %v1378_v7, %v209_v46 }
  0x52   :  { %v1025_v52 = vpack.c.bf16 %v339_v43, %v338_v39  ;;  %v342_v54 = vmax.f32 %v278_v45, 0.0  ;;  %v343_v56 = vmax.f32 %v279_v48, 0.0  ;;  %v281_v57 = vadd.f32 %v1378_v7, %v210_v49  ;;  %v1160_v43 = vld [vmem:[#allocation2 + $0x98] sm:$0xff]  }
  0x53   :  { %v905_v58 = vunpack.c.h.bf16 %v1153_v38  ;;  %v211_v59 = vmul.f32 %v904_v50, %v1376_v1  ;;  %v1030_v61 = vpack.c.bf16 %v341_v53, %v340_v47  ;;  %v344_v62 = vmax.f32 %v280_v55, 0.0 }
  0x54   :  { %1180 = vst [vmem:[#allocation8 + $0x40] sm:$0xff] %v1025_v52   ;;  %v908_v63 = vunpack.c.l.bf16 %v1154_v51  ;;  %v909_v0 = vunpack.c.h.bf16 %v1154_v51  ;;  %v1035_v3 = vpack.c.bf16 %v343_v56, %v342_v54  ;;  %v345_v4 = vmax.f32 %v281_v57, 0.0  ;;  %v1161_v56 = vld [vmem:[#allocation2 + $0xa0] sm:$0xff]  }
  0x55   :  { %v212_v5 = vmul.f32 %v905_v58, %v1376_v1  ;;  %v282_v6 = vadd.f32 %v1378_v7, %v211_v59  ;;  %1181 = vst [vmem:[#allocation8 + $0x48] sm:$0xff] %v1030_v61   ;;  %v912_v10 = vunpack.c.l.bf16 %v1155_v60  ;;  %v913_v11 = vunpack.c.h.bf16 %v1155_v60 }
  0x56   :  { %v213_v8 = vmul.f32 %v908_v63, %v1376_v1  ;;  %v214_v9 = vmul.f32 %v909_v0, %v1376_v1  ;;  %1182 = vst [vmem:[#allocation8 + $0x50] sm:$0xff] %v1035_v3   ;;  %v1040_v13 = vpack.c.bf16 %v345_v4, %v344_v62  ;;  %v916_v16 = vunpack.c.l.bf16 %v1156_v2 }
  0x57   :  { %v283_v14 = vadd.f32 %v1378_v7, %v212_v5  ;;  %v346_v15 = vmax.f32 %v282_v6, 0.0  ;;  %v215_v19 = vmul.f32 %v912_v10, %v1376_v1  ;;  %v216_v20 = vmul.f32 %v913_v11, %v1376_v1 }
  0x58   :  { %v284_v17 = vadd.f32 %v1378_v7, %v213_v8  ;;  %v285_v18 = vadd.f32 %v1378_v7, %v214_v9  ;;  %1183 = vst [vmem:[#allocation8 + $0x58] sm:$0xff] %v1040_v13   ;;  %v917_v22 = vunpack.c.h.bf16 %v1156_v2  ;;  %v217_v23 = vmul.f32 %v916_v16, %v1376_v1  ;;  %v1162_v2 = vld [vmem:[#allocation2 + $0xa8] sm:$0xff]   ;;  %v1163_v16 = vld [vmem:[#allocation2 + $0xb0] sm:$0xff]  }
  0x59   :  { %v347_v21 = vmax.f32 %v283_v14, 0.0  ;;  %v920_v24 = vunpack.c.l.bf16 %v1157_v12  ;;  %v286_v27 = vadd.f32 %v1378_v7, %v215_v19  ;;  %v287_v28 = vadd.f32 %v1378_v7, %v216_v20 }
  0x5a   :  { %v348_v25 = vmax.f32 %v284_v17, 0.0  ;;  %v349_v26 = vmax.f32 %v285_v18, 0.0  ;;  %v218_v31 = vmul.f32 %v917_v22, %v1376_v1  ;;  %v288_v32 = vadd.f32 %v1378_v7, %v217_v23 }
  0x5b   :  { %v1045_v30 = vpack.c.bf16 %v347_v21, %v346_v15  ;;  %v921_v33 = vunpack.c.h.bf16 %v1157_v12  ;;  %v350_v36 = vmax.f32 %v286_v27, 0.0  ;;  %v351_v37 = vmax.f32 %v287_v28, 0.0  ;;  %v1164_v21 = vld [vmem:[#allocation2 + $0xb8] sm:$0xff]  }
  0x5c   :  { %v1050_v35 = vpack.c.bf16 %v349_v26, %v348_v25  ;;  %v219_v38 = vmul.f32 %v920_v24, %v1376_v1  ;;  %v289_v39 = vadd.f32 %v1378_v7, %v218_v31  ;;  %v352_v40 = vmax.f32 %v288_v32, 0.0 }
  0x5d   :  { %1184 = vst [vmem:[#allocation8 + $0x60] sm:$0xff] %v1045_v30   ;;  %v220_v41 = vmul.f32 %v921_v33, %v1376_v1  ;;  %v924_v42 = vunpack.c.l.bf16 %v1158_v29  ;;  %v1055_v44 = vpack.c.bf16 %v351_v37, %v350_v36  ;;  %v925_v46 = vunpack.c.h.bf16 %v1158_v29 }
  0x5e   :  { %1185 = vst [vmem:[#allocation8 + $0x68] sm:$0xff] %v1050_v35   ;;  %v290_v45 = vadd.f32 %v1378_v7, %v219_v38  ;;  %v928_v47 = vunpack.c.l.bf16 %v1159_v34  ;;  %v353_v48 = vmax.f32 %v289_v39, 0.0  ;;  %v929_v51 = vunpack.c.h.bf16 %v1159_v34  ;;  %v1165_v34 = vld [vmem:[#allocation2 + $0xc0] sm:$0xff]  }
  0x5f   :  { %v291_v49 = vadd.f32 %v1378_v7, %v220_v41  ;;  %v221_v50 = vmul.f32 %v924_v42, %v1376_v1  ;;  %1186 = vst [vmem:[#allocation8 + $0x70] sm:$0xff] %v1055_v44   ;;  %v222_v53 = vmul.f32 %v925_v46, %v1376_v1  ;;  %v932_v55 = vunpack.c.l.bf16 %v1160_v43 }
  0x60   :  { %v354_v52 = vmax.f32 %v290_v45, 0.0  ;;  %v223_v54 = vmul.f32 %v928_v47, %v1376_v1  ;;  %v1060_v57 = vpack.c.bf16 %v353_v48, %v352_v40  ;;  %v224_v60 = vmul.f32 %v929_v51, %v1376_v1  ;;  %v1166_v47 = vld [vmem:[#allocation2 + $0xc8] sm:$0xff]  }
  0x61   :  { %v355_v58 = vmax.f32 %v291_v49, 0.0  ;;  %v292_v59 = vadd.f32 %v1378_v7, %v221_v50  ;;  %v293_v61 = vadd.f32 %v1378_v7, %v222_v53  ;;  %v933_v63 = vunpack.c.h.bf16 %v1160_v43 }
  0x62   :  { %v294_v62 = vadd.f32 %v1378_v7, %v223_v54  ;;  %v225_v0 = vmul.f32 %v932_v55, %v1376_v1  ;;  %1187 = vst [vmem:[#allocation8 + $0x78] sm:$0xff] %v1060_v57   ;;  %v295_v5 = vadd.f32 %v1378_v7, %v224_v60  ;;  %v936_v6 = vunpack.c.l.bf16 %v1161_v56 }
  0x63   :  { %v1065_v3 = vpack.c.bf16 %v355_v58, %v354_v52  ;;  %v356_v4 = vmax.f32 %v292_v59, 0.0  ;;  %v357_v8 = vmax.f32 %v293_v61, 0.0  ;;  %v226_v10 = vmul.f32 %v933_v63, %v1376_v1  ;;  %v1167_v52 = vld [vmem:[#allocation2 + $0xd0] sm:$0xff]   ;;  %v1168_v61 = vld [vmem:[#allocation2 + $0xd8] sm:$0xff]  }
  0x64   :  { %v358_v9 = vmax.f32 %v294_v62, 0.0  ;;  %v296_v11 = vadd.f32 %v1378_v7, %v225_v0  ;;  %v359_v12 = vmax.f32 %v295_v5, 0.0  ;;  %v937_v13 = vunpack.c.h.bf16 %v1161_v56 }
  0x65   :  { %1188 = vst [vmem:[#allocation8 + $0x80] sm:$0xff] %v1065_v3   ;;  %v227_v14 = vmul.f32 %v936_v6, %v1376_v1  ;;  %v940_v15 = vunpack.c.l.bf16 %v1162_v2  ;;  %v1070_v17 = vpack.c.bf16 %v357_v8, %v356_v4  ;;  %v297_v18 = vadd.f32 %v1378_v7, %v226_v10 }
  0x66   :  { %v360_v19 = vmax.f32 %v296_v11, 0.0  ;;  %v941_v20 = vunpack.c.h.bf16 %v1162_v2  ;;  %v1075_v22 = vpack.c.bf16 %v359_v12, %v358_v9  ;;  %v228_v23 = vmul.f32 %v937_v13, %v1376_v1  ;;  %v1169_v12 = vld [vmem:[#allocation2 + $0xe0] sm:$0xff]  }
  0x67   :  { %v298_v24 = vadd.f32 %v1378_v7, %v227_v14  ;;  %v229_v25 = vmul.f32 %v940_v15, %v1376_v1  ;;  %1189 = vst [vmem:[#allocation8 + $0x88] sm:$0xff] %v1070_v17   ;;  %v361_v26 = vmax.f32 %v297_v18, 0.0  ;;  %v944_v28 = vunpack.c.l.bf16 %v1163_v16 }
  0x68   :  { %v230_v27 = vmul.f32 %v941_v20, %v1376_v1  ;;  %v945_v29 = vunpack.c.h.bf16 %v1163_v16  ;;  %1190 = vst [vmem:[#allocation8 + $0x90] sm:$0xff] %v1075_v22   ;;  %v299_v30 = vadd.f32 %v1378_v7, %v228_v23  ;;  %v948_v33 = vunpack.c.l.bf16 %v1164_v21 }
  0x69   :  { %v362_v31 = vmax.f32 %v298_v24, 0.0  ;;  %v300_v32 = vadd.f32 %v1378_v7, %v229_v25  ;;  %v1080_v35 = vpack.c.bf16 %v361_v26, %v360_v19  ;;  %v231_v37 = vmul.f32 %v944_v28, %v1376_v1 }
  0x6a   :  { %v301_v36 = vadd.f32 %v1378_v7, %v230_v27  ;;  %v232_v38 = vmul.f32 %v945_v29, %v1376_v1  ;;  %v363_v39 = vmax.f32 %v299_v30, 0.0  ;;  %v949_v41 = vunpack.c.h.bf16 %v1164_v21  ;;  %v1170_v21 = vld [vmem:[#allocation2 + $0xe8] sm:$0xff]  }
  0x6b   :  { %v364_v40 = vmax.f32 %v300_v32, 0.0  ;;  %v233_v42 = vmul.f32 %v948_v33, %v1376_v1  ;;  %1191 = vst [vmem:[#allocation8 + $0x98] sm:$0xff] %v1080_v35   ;;  %v302_v44 = vadd.f32 %v1378_v7, %v231_v37  ;;  %v952_v46 = vunpack.c.l.bf16 %v1165_v34 }
  0x6c   :  { %v365_v43 = vmax.f32 %v301_v36, 0.0  ;;  %v303_v45 = vadd.f32 %v1378_v7, %v232_v38  ;;  %v1085_v48 = vpack.c.bf16 %v363_v39, %v362_v31  ;;  %v234_v49 = vmul.f32 %v949_v41, %v1376_v1  ;;  %v1172_v39 = vld [vmem:[#allocation2 + $0xf8] sm:$0xff]  }
  0x6d   :  { %v304_v50 = vadd.f32 %v1378_v7, %v233_v42  ;;  %v953_v51 = vunpack.c.h.bf16 %v1165_v34  ;;  %v366_v54 = vmax.f32 %v302_v44, 0.0  ;;  %v235_v56 = vmul.f32 %v952_v46, %v1376_v1  ;;  %v1171_v34 = vld [vmem:[#allocation2 + $0xf0] sm:$0xff]  }
  0x6e   :  { %v1090_v53 = vpack.c.bf16 %v365_v43, %v364_v40  ;;  %v367_v55 = vmax.f32 %v303_v45, 0.0  ;;  %1192 = vst [vmem:[#allocation8 + $0xa0] sm:$0xff] %v1085_v48   ;;  %v305_v57 = vadd.f32 %v1378_v7, %v234_v49  ;;  %v956_v60 = vunpack.c.l.bf16 %v1166_v47 }
  0x6f   :  { %v368_v58 = vmax.f32 %v304_v50, 0.0  ;;  %v236_v59 = vmul.f32 %v953_v51, %v1376_v1  ;;  %v306_v63 = vadd.f32 %v1378_v7, %v235_v56  ;;  %v957_v0 = vunpack.c.h.bf16 %v1166_v47 }
  0x70   :  { %1193 = vst [vmem:[#allocation8 + $0xa8] sm:$0xff] %v1090_v53   ;;  %v1095_v62 = vpack.c.bf16 %v367_v55, %v366_v54  ;;  %v960_v2 = vunpack.c.l.bf16 %v1167_v52  ;;  %v369_v3 = vmax.f32 %v305_v57, 0.0  ;;  %v237_v5 = vmul.f32 %v956_v60, %v1376_v1 }
  0x71   :  { %v307_v4 = vadd.f32 %v1378_v7, %v236_v59  ;;  %v961_v6 = vunpack.c.h.bf16 %v1167_v52  ;;  %v370_v8 = vmax.f32 %v306_v63, 0.0  ;;  %v238_v9 = vmul.f32 %v957_v0, %v1376_v1 }
  0x72   :  { %1194 = vst [vmem:[#allocation8 + $0xb0] sm:$0xff] %v1095_v62   ;;  %v239_v10 = vmul.f32 %v960_v2, %v1376_v1  ;;  %v964_v11 = vunpack.c.l.bf16 %v1168_v61  ;;  %v1100_v13 = vpack.c.bf16 %v369_v3, %v368_v58  ;;  %v308_v15 = vadd.f32 %v1378_v7, %v237_v5 }
  0x73   :  { %v371_v14 = vmax.f32 %v307_v4, 0.0  ;;  %v240_v16 = vmul.f32 %v961_v6, %v1376_v1  ;;  %v309_v17 = vadd.f32 %v1378_v7, %v238_v9  ;;  %v965_v19 = vunpack.c.h.bf16 %v1168_v61 }
  0x74   :  { %v310_v18 = vadd.f32 %v1378_v7, %v239_v10  ;;  %v241_v20 = vmul.f32 %v964_v11, %v1376_v1  ;;  %1195 = vst [vmem:[#allocation8 + $0xb8] sm:$0xff] %v1100_v13   ;;  %v372_v23 = vmax.f32 %v308_v15, 0.0  ;;  %v968_v25 = vunpack.c.l.bf16 %v1169_v12 }
  0x75   :  { %v1105_v22 = vpack.c.bf16 %v371_v14, %v370_v8  ;;  %v311_v24 = vadd.f32 %v1378_v7, %v240_v16  ;;  %v373_v26 = vmax.f32 %v309_v17, 0.0  ;;  %v242_v28 = vmul.f32 %v965_v19, %v1376_v1 }
  0x76   :  { %v374_v27 = vmax.f32 %v310_v18, 0.0  ;;  %v312_v29 = vadd.f32 %v1378_v7, %v241_v20  ;;  %v969_v31 = vunpack.c.h.bf16 %v1169_v12  ;;  %v243_v32 = vmul.f32 %v968_v25, %v1376_v1 }
  0x77   :  { %1196 = vst [vmem:[#allocation8 + $0xc0] sm:$0xff] %v1105_v22   ;;  %v375_v30 = vmax.f32 %v311_v24, 0.0  ;;  %v972_v33 = vunpack.c.l.bf16 %v1170_v21  ;;  %v1110_v35 = vpack.c.bf16 %v373_v26, %v372_v23  ;;  %v313_v36 = vadd.f32 %v1378_v7, %v242_v28 }
  0x78   :  { %v376_v37 = vmax.f32 %v312_v29, 0.0  ;;  %v973_v38 = vunpack.c.h.bf16 %v1170_v21  ;;  %v244_v41 = vmul.f32 %v969_v31, %v1376_v1  ;;  %v314_v42 = vadd.f32 %v1378_v7, %v243_v32 }
  0x79   :  { %v1115_v40 = vpack.c.bf16 %v375_v30, %v374_v27  ;;  %v245_v43 = vmul.f32 %v972_v33, %v1376_v1  ;;  %1197 = vst [vmem:[#allocation8 + $0xc8] sm:$0xff] %v1110_v35   ;;  %v377_v44 = vmax.f32 %v313_v36, 0.0  ;;  %v976_v46 = vunpack.c.l.bf16 %v1171_v34 }
  0x7a   :  { %v246_v45 = vmul.f32 %v973_v38, %v1376_v1  ;;  %v977_v47 = vunpack.c.h.bf16 %v1171_v34  ;;  %v315_v48 = vadd.f32 %v1378_v7, %v244_v41  ;;  %v378_v49 = vmax.f32 %v314_v42, 0.0 }
  0x7b   :  { %1198 = vst [vmem:[#allocation8 + $0xd0] sm:$0xff] %v1115_v40   ;;  %v316_v50 = vadd.f32 %v1378_v7, %v245_v43  ;;  %v980_v51 = vunpack.c.l.bf16 %v1172_v39  ;;  %v1120_v52 = vpack.c.bf16 %v377_v44, %v376_v37  ;;  %v247_v54 = vmul.f32 %v976_v46, %v1376_v1 }
  0x7c   :  { %v317_v53 = vadd.f32 %v1378_v7, %v246_v45  ;;  %v248_v55 = vmul.f32 %v977_v47, %v1376_v1  ;;  %v379_v56 = vmax.f32 %v315_v48, 0.0  ;;  %v981_v58 = vunpack.c.h.bf16 %v1172_v39 }
  0x7d   :  { %v380_v57 = vmax.f32 %v316_v50, 0.0  ;;  %v249_v59 = vmul.f32 %v980_v51, %v1376_v1  ;;  %1199 = vst [vmem:[#allocation8 + $0xd8] sm:$0xff] %v1120_v52   ;;  %v318_v61 = vadd.f32 %v1378_v7, %v247_v54 }
  0x7e   :  { %v381_v60 = vmax.f32 %v317_v53, 0.0  ;;  %v319_v62 = vadd.f32 %v1378_v7, %v248_v55  ;;  %v1125_v63 = vpack.c.bf16 %v379_v56, %v378_v49  ;;  %v250_v0 = vmul.f32 %v981_v58, %v1376_v1 }
  0x7f   :  { %v320_v2 = vadd.f32 %v1378_v7, %v249_v59  ;;  %v382_v4 = vmax.f32 %v318_v61, 0.0 }
  0x80   :  { %v1130_v3 = vpack.c.bf16 %v381_v60, %v380_v57  ;;  %v383_v5 = vmax.f32 %v319_v62, 0.0  ;;  %1200 = vst [vmem:[#allocation8 + $0xe0] sm:$0xff] %v1125_v63   ;;  %v321_v6 = vadd.f32 %v1378_v7, %v250_v0 }
  0x81   :  { %v384_v8 = vmax.f32 %v320_v2, 0.0 }
  0x82   :  { %1201 = vst [vmem:[#allocation8 + $0xe8] sm:$0xff] %v1130_v3   ;;  %v1135_v9 = vpack.c.bf16 %v383_v5, %v382_v4  ;;  %v385_v10 = vmax.f32 %v321_v6, 0.0 }
  0x84   :  { %1202 = vst [vmem:[#allocation8 + $0xf0] sm:$0xff] %v1135_v9   ;;  %v1140_v11 = vpack.c.bf16 %v385_v10, %v384_v8 }
  0x86   :  { %1203 = vst [vmem:[#allocation8 + $0xf8] sm:$0xff] %v1140_v11  }
  0x87   :  { %1287 = shalt.err (!%p1284_p0)
}
  0x88   :  { %s1288_s27 = scalar_lea.hbm %s1526_s3, 4096 }
  0x89   :  { %p1289_p1 = scmp.ne.s32.totalorder %s1526_s3, %s1288_s27  ;;  %p1292_p2 = scmp.lt.u32.totalorder %s1288_s27, %s1526_s3 }
  0x8b   :  { %p1294_p3 = pnand %p1292_p2, %p1289_p1 }
  0x8d   :  { %1297 = shalt.err (!%p1294_p3)
}
  0x8e   :  { %717 = dma.vmem_to_hbm [thread:$0]  %s712_s23, 4096, %s1526_s3, [#allocation4], %s1306_s1, %s1306_s1, %s1307_s8  }
  0x8f   :  { %1302 = dma.done.wait [#allocation4], 4096  }
  0x90   :  { %1303 = vsyncadd [#allocation4], 4294963200 }
  0x91   :  { %721 = vsyncpa [#allocation3], 1 }
  0x92   :  { %722 = vsyncpa [#allocation6], 1 }
  0x93   :  { %723 = vsyncpa [#allocation4], 1 }

// kernel: resblock_forward.8
= control target key start
LH: loop header
LB: loop body
LE: loop exit
PB: predicated region body
PF: predicated region fallthrough
CT: control target
= control target key end

     0   :  { %9 = vsyncpa [#allocation3], 0  ;;  %s1933_s0 = inlined_call_operand.hbm [shape: bf16[512,128], index: 0, kind: input, shape index: {}]   ;;  %s1934_s1 = inlined_call_operand.hbm [shape: bf16[128,128], index: 1, kind: input, shape index: {}]   ;;  %s1935_s2 = inlined_call_operand.hbm [shape: bf16[512,128], index: 2, kind: output, shape index: {0}]   ;;  %s1936_s3 = inlined_call_operand.hbm [shape: f32[16,128], index: 3, kind: output, shape index: {1}]  }
   0x1   :  { %11 = vsyncpa [#allocation3 + $0x1], 0 }
   0x2   :  { %12 = vsyncpa [#allocation6], 0 }
   0x3   :  { %13 = vsyncpa [#allocation4], 0 }
   0x4   :  { %15 = vsyncpa [#allocation4 + $0x1], 0 }
   0x5   :  { %16 = vsyncpa [#allocation9], 0 }
   0x6   :  { %18 = vsyncpa [#allocation9 + $0x1], 0  ;;  %s1558_s12 = smov 0   ;;  %s1560_s13 = smov 0  }
   0x7   :  { %s1562_s14 = smov 0   ;;  %s1564_s15 = smov 0  }
   0x8 LB: > { %s1579_s16 = sadd.s32 4294967295, %s1528_s15   ;;  %s986_s17 = sadd.s32 4294967294, %s1528_s15   ;;  %s1528_s15 = sphi %s1564_s15, %s1956_s15   ;;  %s1524_s14 = sphi %s1562_s14, %s1955_s14   ;;  %s1520_s13 = sphi %s1560_s13, %s1954_s13   ;;  %s1516_s12 = sphi %s1558_s12, %s1953_s12  }
   0x9   : > { %p44_p0 = scmp.ne.s32.totalorder %s1520_s13, %s1516_s12  ;;  %p1937_p1 = scmp.eq.s32.totalorder %s1579_s16, 0 }
   0xa   : > { %p95_p3 = scmp.eq.s32.totalorder %s986_s17, 1  ;;  %p987_p5 = scmp.ge.s32.totalorder %s1528_s15, 1 }
   0xb   : > { %p1588_p4 = por %p1937_p1, %p44_p0  ;;  %p128_p7 = scmp.lt.s32.totalorder %s1528_s15, 3 }
   0xc   : > { %p1593_p6 = por %p95_p3, %p44_p0  ;;  %s1530_s21 = smov [#allocation5]  }
   0xd   : > { %s1940_s18 = scalar_select %p1588_p4, 1, 0 }
   0xe   : > { %s1941_s19 = scalar_select %p1593_p6, 1, 0 }
   0xf   : > { %p1598_p8 = pnand %p987_p5, %p128_p7  ;;  %s140_s22 = sshll.u32 %s1530_s21, 4  ;;  %s1602_s22 = int_to_ptr.vmem [resolvable:$true] %s140_s22 }
  0x10   : > { %s1614_s24 = sadd.s32 1, %s1528_s15   ;;  %s31_s25 = sadd.s32 1, %s1524_s14 }
  0x11   : > { %s1942_s20 = scalar_select %p1598_p8, 1, 0 }
  0x12   : > { %p1288_p9 = pneg %p1598_p8  ;;  %s28_s26 = ssub.s32 %s1528_s15, %s1614_s24 }
  0x13   : > { %s1368_s29 = scalar_lea.hbm %s1934_s1, 1024 }
  0x14   : > { %p1609_p11 = pnand %p1288_p9, %p1937_p1  ;;  %p1369_p12 = scmp.ne.s32.totalorder %s1934_s1, %s1368_s29 }
  0x15   : > { %p1375_p5 = scmp.lt.u32.totalorder %s1368_s29, %s1934_s1 }
  0x16   : > { %p1370_p13 = pneg %p1609_p11 }
  0x18   : > { %p1371_p0 = pnand %p1370_p13, %p1369_p12 }
  0x1a   : > { %p1372_p3 = pneg %p1371_p0 }
  0x1c   : > { %p1377_p7 = pnand %p1375_p5, %p1372_p3 }
  0x1e   : > { %1380 = shalt.err (!%p1377_p7)
}
  0x1f   : > { %s1381_s7 = scalar_lea.vmem %s1602_s22, 1024  ;;  %p1389_p2 = scmp.lt.s32.totalorder %s1602_s22, %s1602_s22 }
  0x20   : > { %p1382_p9 = scmp.ne.s32.totalorder %s1602_s22, %s1381_s7  ;;  %p1390_p6 = scmp.lt.s32.totalorder %s1381_s7, %s1381_s7 }
  0x22   : > { %p1384_p10 = pnand %p1382_p9, %p1370_p13  ;;  %p1391_p4 = por %p1390_p6, %p1389_p2 }
  0x24   : > { %p1385_p1 = pneg %p1384_p10 }
  0x26   : > { %p1392_p8 = pnand %p1391_p4, %p1385_p1 }
  0x28   : > { %1395 = shalt.err (!%p1392_p8)
}
  0x29   : > { %s1531_s8 = smov 64   ;;  %s1532_s9 = smov 4  }
  0x2a   : > { %1291 = dma.hbm_to_vmem [thread:$0]  (!%p1609_p11), %s1934_s1, 1024, %s1602_s22, [#allocation6], %s1531_s8, %s1531_s8, %s1532_s9  }
  0x2b   : > { %p29_p1 = scmp.eq.s32.totalorder %s28_s26, 0  ;;  %p38_p2 = scmp.ne.s32.totalorder %s1524_s14, %s1520_s13 }
  0x2c   : > { %p39_p4 = scmp.eq.s32.totalorder %s1528_s15, 0  ;;  %p1304_p6 = scmp.lt.s32.totalorder %s1528_s15, 2 }
  0x2d   : > { %s1648_s17 = scalar_select %p29_p1, %s1524_s14, %s31_s25  }
  0x2e   : > { %p40_p8 = por %p39_p4, %p38_p2  ;;  %p1944_p10 = scmp.eq.s32.totalorder %s1579_s16, 1 }
  0x2f   : > { %s154_s23 = sand.u32 1, %s1524_s14   ;;  %s1061_s27 = sshll.u32 %s1528_s15, 11 }
  0x30   : > { %p1652_p12 = por %p1944_p10, %p38_p2  ;;  %s990_s28 = sshll.u32 %s154_s23, 7 }
  0x31   : > { %s1661_s4 = scalar_lea.hbm %s1933_s0, %s1061_s27  ;;  %s158_s22 = scalar_lea.vmem [#allocation2], %s990_s28 }
  0x32   : > { %s165_s25 = sshll.u32 %s158_s22, 4  ;;  %p1663_p11 = pnand %p1304_p6, %p40_p8  ;;  %s1667_s25 = int_to_ptr.vmem [resolvable:$true] %s165_s25 }
  0x33   : > { %s1669_s5 = scalar_lea.sflag [#allocation3], %s154_s23  ;;  %s1396_s6 = scalar_lea.hbm %s1661_s4, 2048 }
  0x34   : > { %p1397_p13 = scmp.ne.s32.totalorder %s1661_s4, %s1396_s6  ;;  %p1398_p0 = pneg %p1663_p11 }
  0x35   : > { %s1401_s11 = scalar_lea.hbm %s1933_s0, 4096  ;;  %p1402_p7 = scmp.lt.u32.totalorder %s1661_s4, %s1933_s0 }
  0x36   : > { %p1399_p3 = pnand %p1398_p0, %p1397_p13  ;;  %p1403_p9 = scmp.lt.u32.totalorder %s1401_s11, %s1396_s6 }
  0x37   : > { %p1405_p2 = scmp.lt.u32.totalorder %s1396_s6, %s1661_s4 }
  0x38   : > { %p1400_p5 = pneg %p1399_p3  ;;  %p1404_p1 = por %p1403_p9, %p1402_p7 }
  0x3a   : > { %p1406_p4 = por %p1405_p2, %p1404_p1 }
  0x3c   : > { %p1407_p6 = pnand %p1406_p4, %p1400_p5 }
  0x3e   : > { %1410 = shalt.err (!%p1407_p6)
}
  0x3f   : > { %s1411_s23 = scalar_lea.vmem %s1667_s25, 2048  ;;  %s1533_s29 = smov [#allocation2]  }
  0x40   : > { %p1412_p8 = scmp.ne.s32.totalorder %s1667_s25, %s1411_s23  ;;  %s1416_s30 = sshll.u32 %s1533_s29, 4  ;;  %s1417_s30 = int_to_ptr.vmem [resolvable:$false] %s1416_s30 }
  0x41   : > { %s1418_s22 = scalar_lea.vmem %s1417_s30, 4096  ;;  %p1419_p3 = scmp.lt.s32.totalorder %s1667_s25, %s1417_s30 }
  0x42   : > { %p1414_p10 = pnand %p1412_p8, %p1398_p0  ;;  %p1420_p7 = scmp.lt.s32.totalorder %s1418_s22, %s1411_s23 }
  0x44   : > { %p1415_p13 = pneg %p1414_p10  ;;  %p1421_p9 = por %p1420_p7, %p1419_p3 }
  0x46   : > { %p1422_p1 = pnand %p1421_p9, %p1415_p13 }
  0x48   : > { %1425 = shalt.err (!%p1422_p1)
}
  0x49   : > { %1295 = dma.hbm_to_vmem [thread:$0]  (!%p1663_p11), %s1661_s4, 2048, %s1667_s25, %s1669_s5, %s1531_s8, %s1531_s8, %s1532_s9  }
  0x4a   : > { %p1947_p0 = scmp.ne.s32.totalorder %s1942_s20, 0 }
  0x4b   : > { %s1703_s6 = sand.u32 (!%p1947_p0), 1, %s1520_s13   ;;  %p1948_p5 = scmp.ne.s32.totalorder (!%p1947_p0), %s1940_s18, 0 }
  0x4c   : > { %177 = sbr.rel (%p1947_p0) target bundleno = 436 (0x1b4), region = 28  ;;  %s994_s7 = sshll.u32 (!%p1947_p0), %s1703_s6, 7 }
  0x4d   : > { %s180_s10 = scalar_lea.sflag (!%p1947_p0), [#allocation3], %s1703_s6  ;;  %s1709_s26 = scalar_lea.vmem (!%p1947_p0), [#allocation2], %s994_s7 }
  0x53   : > { %1499 = dma.done.wait (%p1948_p5), %s180_s10, 2048  }
  0x54   : > { %1501 = vsyncadd (%p1948_p5), %s180_s10, 4294965248  ;;  %p1949_p11 = scmp.eq.s32.totalorder %s1579_s16, 0 }
  0x56   : > { %1503 = dma.done.wait (%p1949_p11), [#allocation6], 1024   ;;  %p1950_p2 = pmov %p1949_p11 }
  0x57   : > { %v1344_v0 = vld [vmem:[#allocation5] sm:$0xff]   ;;  %v1345_v1 = vld [vmem:[#allocation5 + $0x8] sm:$0xff]   ;;  %v1346_v2 = vld [vmem:[#allocation5 + $0x10] sm:$0xff]   ;;  %s1749_s18 = scalar_lea.vmem [#allocation7], %s994_s7  ;;  %s1094_s20 = sshll.u32 %s1579_s16, 11 }
  0x58   : > { %1505 = vsyncadd (%p1950_p2), [#allocation6], 4294966272  ;;  %1214 = vmatprep.subr.bf16.mxu0 %v1344_v0  ;;  %1262 = vmatprep.subr.bf16.mxu1 %v1344_v0  ;;  %v1347_v3 = vld [vmem:[#allocation5 + $0x18] sm:$0xff]   ;;  %v1352_v4 = vld [vmem:[%s1709_s26] sm:$0xff]   ;;  %s858_s8 = sshll.u32 %s1749_s18, 4  ;;  %s1802_s25 = scalar_lea.hbm %s1935_s2, %s1094_s20  ;;  %s1804_s8 = int_to_ptr.vmem [resolvable:$true] %s858_s8 }
  0x59   : > { %1215 = vmatpush3.bf16.msra.mxu0 %v1344_v0  ;;  %1270 = vmatpush3.bf16.msra.mxu1 %v1344_v0  ;;  %v1348_v5 = vld [vmem:[#allocation5 + $0x20] sm:$0xff]   ;;  %v1349_v6 = vld [vmem:[#allocation5 + $0x28] sm:$0xff]   ;;  %v1350_v8 = vld [vmem:[#allocation5 + $0x30] sm:$0xff]   ;;  %s840_s5 = scalar_lea.sflag [#allocation4], %s1703_s6  ;;  %s1426_s11 = scalar_lea.vmem %s1804_s8, 2048 }
  0x5a   : > { %1216 = vmatprep.subr.bf16.mxu0 %v1345_v1  ;;  %1263 = vmatprep.subr.bf16.mxu1 %v1345_v1  ;;  %v1360_v7 = vld [vmem:[%s1709_s26 + $0x40] sm:$0xff]   ;;  %v1351_v9 = vld [vmem:[#allocation5 + $0x38] sm:$0xff]   ;;  %v1353_v10 = vld [vmem:[%s1709_s26 + $0x8] sm:$0xff]   ;;  %p1427_p4 = scmp.ne.s32.totalorder %s1804_s8, %s1426_s11  ;;  %s1534_s27 = smov [#allocation7]  }
  0x5b   : > { %1230 = vmatprep.mubr.bf16.mxu0 %v1352_v4  ;;  %1246 = vmatprep.mubr.bf16.mxu1 %v1360_v7  ;;  %v1361_v11 = vld [vmem:[%s1709_s26 + $0x48] sm:$0xff]   ;;  %v1354_v12 = vld [vmem:[%s1709_s26 + $0x10] sm:$0xff]   ;;  %v1355_v14 = vld [vmem:[%s1709_s26 + $0x18] sm:$0xff]   ;;  %s1430_s28 = sshll.u32 %s1534_s27, 4  ;;  %s1431_s28 = int_to_ptr.vmem [resolvable:$false] %s1430_s28 }
  0x5c   : > { %v1362_v13 = vld [vmem:[%s1709_s26 + $0x50] sm:$0xff]   ;;  %v1363_v15 = vld [vmem:[%s1709_s26 + $0x58] sm:$0xff]   ;;  %v1356_v16 = vld [vmem:[%s1709_s26 + $0x20] sm:$0xff]   ;;  %p1428_p6 = pnand %p1427_p4, %p1652_p12  ;;  %s1432_s23 = scalar_lea.vmem %s1431_s28, 4096 }
  0x5d   : > { %1217 = vmatpush3.bf16.msra.mxu0 %v1345_v1  ;;  %1271 = vmatpush3.bf16.msra.mxu1 %v1345_v1  ;;  %v1364_v17 = vld [vmem:[%s1709_s26 + $0x60] sm:$0xff]   ;;  %v1357_v18 = vld [vmem:[%s1709_s26 + $0x28] sm:$0xff]   ;;  %v1358_v20 = vld [vmem:[%s1709_s26 + $0x30] sm:$0xff]   ;;  %p1433_p10 = scmp.lt.s32.totalorder %s1804_s8, %s1431_s28  ;;  %p1434_p13 = scmp.lt.s32.totalorder %s1432_s23, %s1426_s11 }
  0x5e   : > { %1218 = vmatprep.subr.bf16.mxu0 %v1346_v2  ;;  %1264 = vmatprep.subr.bf16.mxu1 %v1346_v2  ;;  %v1365_v19 = vld [vmem:[%s1709_s26 + $0x68] sm:$0xff]   ;;  %v1366_v21 = vld [vmem:[%s1709_s26 + $0x70] sm:$0xff]   ;;  %v1359_v22 = vld [vmem:[%s1709_s26 + $0x38] sm:$0xff]   ;;  %p1429_p8 = pneg %p1428_p6 }
  0x5f   : > { %v1367_v23 = vld [vmem:[%s1709_s26 + $0x78] sm:$0xff]   ;;  %p1435_p3 = por %p1434_p13, %p1433_p10 }
  0x61   : > { %1219 = vmatpush3.bf16.msra.mxu0 %v1346_v2  ;;  %1272 = vmatpush3.bf16.msra.mxu1 %v1346_v2  ;;  %p1436_p7 = pnand %p1435_p3, %p1429_p8 }
  0x62   : > { %1220 = vmatprep.subr.bf16.mxu0 %v1347_v3  ;;  %1265 = vmatprep.subr.bf16.mxu1 %v1347_v3 }
  0x65   : > { %1221 = vmatpush3.bf16.msra.mxu0 %v1347_v3  ;;  %1273 = vmatpush3.bf16.msra.mxu1 %v1347_v3 }
  0x66   : > { %1222 = vmatprep.subr.bf16.mxu0 %v1348_v5  ;;  %1266 = vmatprep.subr.bf16.mxu1 %v1348_v5 }
  0x69   : > { %1223 = vmatpush3.bf16.msra.mxu0 %v1348_v5  ;;  %1274 = vmatpush3.bf16.msra.mxu1 %v1348_v5 }
  0x6a   : > { %1224 = vmatprep.subr.bf16.mxu0 %v1349_v6  ;;  %1267 = vmatprep.subr.bf16.mxu1 %v1349_v6 }
  0x6d   : > { %1225 = vmatpush3.bf16.msra.mxu0 %v1349_v6  ;;  %1275 = vmatpush3.bf16.msra.mxu1 %v1349_v6 }
  0x6e   : > { %1226 = vmatprep.subr.bf16.mxu0 %v1350_v8  ;;  %1268 = vmatprep.subr.bf16.mxu1 %v1350_v8 }
  0x71   : > { %1227 = vmatpush3.bf16.msra.mxu0 %v1350_v8  ;;  %1276 = vmatpush3.bf16.msra.mxu1 %v1350_v8 }
  0x72   : > { %1228 = vmatprep.subr.bf16.mxu0 %v1351_v9  ;;  %1269 = vmatprep.subr.bf16.mxu1 %v1351_v9 }
  0x75   : > { %1229 = vmatpush3.bf16.msra.mxu0 %v1351_v9  ;;  %1277 = vmatpush3.bf16.msra.mxu1 %v1351_v9 }
  0x78   : > { %1231 = vmatmul.mubr.bf16.vlgmr.msra.gmra.mrb[0].mxu0 %v1353_v10  ;;  %1247 = vmatmul.mubr.bf16.vlgmr.msra.gmra.mrb[0].mxu1 %v1361_v11 }
  0x79   : > { %1234 = vmatprep.mubr.bf16.mxu0 %v1354_v12  ;;  %1250 = vmatprep.mubr.bf16.mxu1 %v1362_v13 }
  0x80   : > { %1235 = vmatmul.mubr.bf16.gmra.mrb[4].mxu0 %v1355_v14  ;;  %1251 = vmatmul.mubr.bf16.gmra.mrb[4].mxu1 %v1363_v15 }
  0x81   : > { %1238 = vmatprep.mubr.bf16.mxu0 %v1356_v16  ;;  %1254 = vmatprep.mubr.bf16.mxu1 %v1364_v17 }
  0x88   : > { %1239 = vmatmul.mubr.bf16.gmra.mrb[8].mxu0 %v1357_v18  ;;  %1255 = vmatmul.mubr.bf16.gmra.mrb[8].mxu1 %v1365_v19 }
  0x89   : > { %1242 = vmatprep.mubr.bf16.mxu0 %v1358_v20  ;;  %1258 = vmatprep.mubr.bf16.mxu1 %v1366_v21 }
  0x90   : > { %1243 = vmatmul.mubr.bf16.gmra.mrb[12].mxu0 %v1359_v22  ;;  %1259 = vmatmul.mubr.bf16.gmra.mrb[12].mxu1 %v1367_v23 }
 0x14b   : > { %v1232_v24 = vpop.f32.mrb[0].mxu0  ;;  %v1735_v25 = vpop.f32.mrb[0].mxu1 }
 0x14c   : > { %v444_v26 = vpop.f32.mrb[1].mxu0  ;;  %v1737_v27 = vpop.f32.mrb[1].mxu1  ;;  %v771_v39 = vmul.f32 %v1232_v24, %v1232_v24 }
 0x14d   : > { %v1233_v28 = vpop.f32.mrb[2].mxu0  ;;  %v1739_v29 = vpop.f32.mrb[2].mxu1  ;;  %v769_v30 = vmul.f32 %v444_v26, %v444_v26 }
 0x14e   : > { %v1103_v31 = vpack.c.bf16 %v1233_v28, %v1232_v24  ;;  %v447_v32 = vpop.f32.mrb[3].mxu0  ;;  %v1143_v33 = vpack.c.bf16 %v1739_v29, %v1735_v25  ;;  %v1743_v34 = vpop.f32.mrb[3].mxu1  ;;  %v772_v42 = vmul.f32 %v1233_v28, %v1233_v28 }
 0x14f   : > { %v1098_v35 = vpack.c.bf16 %v447_v32, %v444_v26  ;;  %v731_v36 = vadd.f32 %v447_v32, %v444_v26  ;;  %v770_v37 = vmul.f32 %v447_v32, %v447_v32  ;;  %v1138_v38 = vpack.c.bf16 %v1743_v34, %v1737_v27 }
 0x150   : > { %1175 = vst [vmem:[%s1749_s18 + $0x8] sm:$0xff] %v1103_v31   ;;  %1183 = vst [vmem:[%s1749_s18 + $0x48] sm:$0xff] %v1143_v33  }
 0x151   : > { %1099 = vst [vmem:[%s1749_s18] sm:$0xff] %v1098_v35   ;;  %v732_v40 = vadd.f32 %v1232_v24, %v731_v36  ;;  %v801_v41 = vadd.f32 %v770_v37, %v769_v30  ;;  %1182 = vst [vmem:[%s1749_s18 + $0x40] sm:$0xff] %v1138_v38  }
 0x153   : > { %v802_v43 = vadd.f32 %v801_v41, %v771_v39  ;;  %v1236_v44 = vpop.f32.mrb[4].mxu0  ;;  %v733_v45 = vadd.f32 %v1233_v28, %v732_v40  ;;  %v1755_v46 = vpop.f32.mrb[4].mxu1 }
 0x154   : > { %v460_v47 = vpop.f32.mrb[5].mxu0  ;;  %v1757_v48 = vpop.f32.mrb[5].mxu1  ;;  %v775_v63 = vmul.f32 %v1236_v44, %v1236_v44 }
 0x155   : > { %v734_v49 = vadd.f32 %v733_v45, %v460_v47  ;;  %v773_v50 = vmul.f32 %v460_v47, %v460_v47  ;;  %v803_v51 = vadd.f32 %v802_v43, %v772_v42  ;;  %v1237_v52 = vpop.f32.mrb[6].mxu0  ;;  %v1759_v53 = vpop.f32.mrb[6].mxu1 }
 0x156   : > { %v1113_v54 = vpack.c.bf16 %v1237_v52, %v1236_v44  ;;  %v463_v55 = vpop.f32.mrb[7].mxu0  ;;  %v1153_v56 = vpack.c.bf16 %v1759_v53, %v1755_v46  ;;  %v1763_v57 = vpop.f32.mrb[7].mxu1  ;;  %v776_v2 = vmul.f32 %v1237_v52, %v1237_v52 }
 0x157   : > { %v804_v58 = vadd.f32 %v803_v51, %v773_v50  ;;  %v1108_v59 = vpack.c.bf16 %v463_v55, %v460_v47  ;;  %v735_v60 = vadd.f32 %v734_v49, %v463_v55  ;;  %v774_v61 = vmul.f32 %v463_v55, %v463_v55 }
 0x158   : > { %1177 = vst [vmem:[%s1749_s18 + $0x18] sm:$0xff] %v1113_v54   ;;  %1185 = vst [vmem:[%s1749_s18 + $0x58] sm:$0xff] %v1153_v56   ;;  %v1148_v62 = vpack.c.bf16 %v1763_v57, %v1757_v48 }
 0x159   : > { %1176 = vst [vmem:[%s1749_s18 + $0x10] sm:$0xff] %v1108_v59   ;;  %v736_v0 = vadd.f32 %v1236_v44, %v735_v60  ;;  %v805_v1 = vadd.f32 %v804_v58, %v774_v61  ;;  %v785_v61 = vmul.f32 %v1737_v27, %v1737_v27 }
 0x15a   : > { %1184 = vst [vmem:[%s1749_s18 + $0x50] sm:$0xff] %v1148_v62  }
 0x15b   : > { %v806_v3 = vadd.f32 %v805_v1, %v775_v63  ;;  %v1240_v4 = vpop.f32.mrb[8].mxu0  ;;  %v737_v5 = vadd.f32 %v1237_v52, %v736_v0  ;;  %v1771_v6 = vpop.f32.mrb[8].mxu1 }
 0x15c   : > { %v476_v7 = vpop.f32.mrb[9].mxu0  ;;  %v1773_v8 = vpop.f32.mrb[9].mxu1  ;;  %v779_v23 = vmul.f32 %v1240_v4, %v1240_v4 }
 0x15d   : > { %v738_v9 = vadd.f32 %v737_v5, %v476_v7  ;;  %v777_v10 = vmul.f32 %v476_v7, %v476_v7  ;;  %v807_v11 = vadd.f32 %v806_v3, %v776_v2  ;;  %v1241_v12 = vpop.f32.mrb[10].mxu0  ;;  %v1775_v13 = vpop.f32.mrb[10].mxu1 }
 0x15e   : > { %v1123_v14 = vpack.c.bf16 %v1241_v12, %v1240_v4  ;;  %v479_v15 = vpop.f32.mrb[11].mxu0  ;;  %v1163_v16 = vpack.c.bf16 %v1775_v13, %v1771_v6  ;;  %v1779_v17 = vpop.f32.mrb[11].mxu1  ;;  %v780_v28 = vmul.f32 %v1241_v12, %v1241_v12 }
 0x15f   : > { %v808_v18 = vadd.f32 %v807_v11, %v777_v10  ;;  %v1118_v19 = vpack.c.bf16 %v479_v15, %v476_v7  ;;  %v739_v20 = vadd.f32 %v738_v9, %v479_v15  ;;  %v778_v21 = vmul.f32 %v479_v15, %v479_v15 }
 0x160   : > { %1179 = vst [vmem:[%s1749_s18 + $0x28] sm:$0xff] %v1123_v14   ;;  %1187 = vst [vmem:[%s1749_s18 + $0x68] sm:$0xff] %v1163_v16   ;;  %v1158_v22 = vpack.c.bf16 %v1779_v17, %v1773_v8 }
 0x161   : > { %1178 = vst [vmem:[%s1749_s18 + $0x20] sm:$0xff] %v1118_v19   ;;  %v740_v24 = vadd.f32 %v1240_v4, %v739_v20  ;;  %v809_v26 = vadd.f32 %v808_v18, %v778_v21 }
 0x162   : > { %1186 = vst [vmem:[%s1749_s18 + $0x60] sm:$0xff] %v1158_v22  }
 0x163   : > { %v810_v30 = vadd.f32 %v809_v26, %v779_v23  ;;  %v1244_v31 = vpop.f32.mrb[12].mxu0  ;;  %v741_v32 = vadd.f32 %v1241_v12, %v740_v24  ;;  %v1787_v33 = vpop.f32.mrb[12].mxu1 }
 0x164   : > { %v492_v35 = vpop.f32.mrb[13].mxu0  ;;  %v1789_v36 = vpop.f32.mrb[13].mxu1  ;;  %v783_v54 = vmul.f32 %v1244_v31, %v1244_v31 }
 0x165   : > { %v742_v37 = vadd.f32 %v741_v32, %v492_v35  ;;  %v781_v38 = vmul.f32 %v492_v35, %v492_v35  ;;  %v811_v39 = vadd.f32 %v810_v30, %v780_v28  ;;  %v1245_v40 = vpop.f32.mrb[14].mxu0  ;;  %v1793_v41 = vpop.f32.mrb[14].mxu1 }
 0x166   : > { %v1133_v42 = vpack.c.bf16 %v1245_v40, %v1244_v31  ;;  %v495_v43 = vpop.f32.mrb[15].mxu0  ;;  %v1173_v44 = vpack.c.bf16 %v1793_v41, %v1787_v33  ;;  %v1797_v45 = vpop.f32.mrb[15].mxu1  ;;  %v784_v58 = vmul.f32 %v1245_v40, %v1245_v40 }
 0x167   : > { %v812_v47 = vadd.f32 %v811_v39, %v781_v38  ;;  %v1128_v49 = vpack.c.bf16 %v495_v43, %v492_v35  ;;  %v743_v50 = vadd.f32 %v742_v37, %v495_v43  ;;  %v782_v51 = vmul.f32 %v495_v43, %v495_v43 }
 0x168   : > { %1181 = vst [vmem:[%s1749_s18 + $0x38] sm:$0xff] %v1133_v42   ;;  %1189 = vst [vmem:[%s1749_s18 + $0x78] sm:$0xff] %v1173_v44   ;;  %v1168_v52 = vpack.c.bf16 %v1797_v45, %v1789_v36 }
 0x169   : > { %1180 = vst [vmem:[%s1749_s18 + $0x30] sm:$0xff] %v1128_v49   ;;  %v744_v55 = vadd.f32 %v1244_v31, %v743_v50  ;;  %v813_v56 = vadd.f32 %v812_v47, %v782_v51 }
 0x16a   : > { %1188 = vst [vmem:[%s1749_s18 + $0x70] sm:$0xff] %v1168_v52  }
 0x16b   : > { %v814_v59 = vadd.f32 %v813_v56, %v783_v54  ;;  %v745_v60 = vadd.f32 %v1245_v40, %v744_v55 }
 0x16c   : > { %1439 = shalt.err (!%p1436_p7)
}
 0x16d   : > { %s1440_s29 = scalar_lea.hbm %s1802_s25, 2048  ;;  %s1444_s7 = scalar_lea.hbm %s1935_s2, 4096 }
 0x16e   : > { %p1441_p9 = scmp.ne.s32.totalorder %s1802_s25, %s1440_s29  ;;  %p1445_p5 = scmp.lt.u32.totalorder %s1802_s25, %s1935_s2 }
 0x16f   : > { %p1446_p11 = scmp.lt.u32.totalorder %s1444_s7, %s1440_s29  ;;  %p1448_p4 = scmp.lt.u32.totalorder %s1440_s29, %s1802_s25 }
 0x170   : > { %p1442_p1 = pnand %p1441_p9, %p1652_p12 }
 0x171   : > { %p1447_p2 = por %p1446_p11, %p1445_p5 }
 0x172   : > { %p1443_p0 = pneg %p1442_p1 }
 0x173   : > { %p1449_p6 = por %p1448_p4, %p1447_p2 }
 0x175   : > { %p1450_p8 = pnand %p1449_p6, %p1443_p0 }
 0x177   : > { %1453 = shalt.err (!%p1450_p8)
}
 0x178   : > { %s1535_s18 = smov 64   ;;  %s1536_s20 = smov 4   ;;  %v746_v62 = vadd.f32 %v745_v60, %v1737_v27  ;;  %v815_v63 = vadd.f32 %v814_v59, %v784_v58  ;;  %v786_v2 = vmul.f32 %v1743_v34, %v1743_v34  ;;  %v787_v3 = vmul.f32 %v1735_v25, %v1735_v25 }
 0x179   : > { %1284 = dma.vmem_to_hbm [thread:$0]  (%p1652_p12), %s1804_s8, 2048, %s1802_s25, %s840_s5, %s1535_s18, %s1535_s18, %s1536_s20   ;;  %v788_v7 = vmul.f32 %v1739_v29, %v1739_v29  ;;  %v789_v27 = vmul.f32 %v1757_v48, %v1757_v48  ;;  %v790_v15 = vmul.f32 %v1763_v57, %v1763_v57  ;;  %v794_v24 = vmul.f32 %v1779_v17, %v1779_v17 }
 0x17a   : > { %v816_v0 = vadd.f32 %v815_v63, %v785_v61  ;;  %v747_v1 = vadd.f32 %v746_v62, %v1743_v34  ;;  %v799_v38 = vmul.f32 %v1787_v33, %v1787_v33  ;;  %v800_v40 = vmul.f32 %v1793_v41, %v1793_v41  ;;  %s997_s8 = sshll.u32 %s1703_s6, 3  ;;  %s1058_s9 = sshll.u32 %s1579_s16, 7 }
 0x17b   : > { %s214_s4 = scalar_lea.vmem [#allocation8], %s997_s8  ;;  %s1889_s27 = scalar_lea.hbm %s1936_s3, %s1058_s9 }
 0x17c   : > { %v748_v4 = vadd.f32 %v1735_v25, %v747_v1  ;;  %v817_v5 = vadd.f32 %v816_v0, %v786_v2  ;;  %v791_v25 = vmul.f32 %v1755_v46, %v1755_v46  ;;  %s874_s25 = sshll.u32 %s214_s4, 4  ;;  %s845_s28 = scalar_lea.sflag [#allocation9], %s1703_s6  ;;  %s1891_s25 = int_to_ptr.vmem [resolvable:$true] %s874_s25 }
 0x17d   : > { %s1454_s23 = scalar_lea.vmem %s1891_s25, 128  ;;  %s1537_s16 = smov [#allocation8]  }
 0x17e   : > { %v818_v9 = vadd.f32 %v817_v5, %v787_v3  ;;  %v749_v10 = vadd.f32 %v1739_v29, %v748_v4  ;;  %v792_v29 = vmul.f32 %v1759_v53, %v1759_v53  ;;  %p1455_p10 = scmp.ne.s32.totalorder %s1891_s25, %s1454_s23  ;;  %s1458_s29 = sshll.u32 %s1537_s16, 4  ;;  %s1459_s29 = int_to_ptr.vmem [resolvable:$false] %s1458_s29 }
 0x17f   : > { %s1460_s30 = scalar_lea.vmem %s1459_s29, 256  ;;  %p1461_p7 = scmp.lt.s32.totalorder %s1891_s25, %s1459_s29 }
 0x180   : > { %v750_v11 = vadd.f32 %v749_v10, %v1757_v48  ;;  %v819_v12 = vadd.f32 %v818_v9, %v788_v7  ;;  %v793_v48 = vmul.f32 %v1773_v8, %v1773_v8  ;;  %p1456_p13 = pnand %p1455_p10, %p1652_p12  ;;  %p1462_p9 = scmp.lt.s32.totalorder %s1460_s30, %s1454_s23 }
 0x182   : > { %v820_v14 = vadd.f32 %v819_v12, %v789_v27  ;;  %v751_v34 = vadd.f32 %v750_v11, %v1763_v57  ;;  %p1457_p3 = pneg %p1456_p13  ;;  %p1463_p1 = por %p1462_p9, %p1461_p7 }
 0x184   : > { %v752_v16 = vadd.f32 %v1755_v46, %v751_v34  ;;  %v821_v18 = vadd.f32 %v820_v14, %v790_v15  ;;  %v795_v46 = vmul.f32 %v1771_v6, %v1771_v6  ;;  %p1464_p0 = pnand %p1463_p1, %p1457_p3 }
 0x186   : > { %v822_v19 = vadd.f32 %v821_v18, %v791_v25  ;;  %v753_v20 = vadd.f32 %v1759_v53, %v752_v16  ;;  %v796_v53 = vmul.f32 %v1775_v13, %v1775_v13 }
 0x188   : > { %v754_v21 = vadd.f32 %v753_v20, %v1773_v8  ;;  %v823_v22 = vadd.f32 %v822_v19, %v792_v29  ;;  %v797_v8 = vmul.f32 %v1789_v36, %v1789_v36 }
 0x18a   : > { %v824_v23 = vadd.f32 %v823_v22, %v793_v48  ;;  %v755_v57 = vadd.f32 %v754_v21, %v1779_v17 }
 0x18c   : > { %v756_v26 = vadd.f32 %v1771_v6, %v755_v57  ;;  %v825_v28 = vadd.f32 %v824_v23, %v794_v24  ;;  %v798_v6 = vmul.f32 %v1797_v45, %v1797_v45 }
 0x18e   : > { %v826_v30 = vadd.f32 %v825_v28, %v795_v46  ;;  %v757_v31 = vadd.f32 %v1775_v13, %v756_v26 }
 0x190   : > { %v758_v32 = vadd.f32 %v757_v31, %v1789_v36  ;;  %v827_v35 = vadd.f32 %v826_v30, %v796_v53 }
 0x192   : > { %v828_v17 = vadd.f32 %v827_v35, %v797_v8  ;;  %v759_v37 = vadd.f32 %v758_v32, %v1797_v45 }
 0x194   : > { %v760_v39 = vadd.f32 %v1787_v33, %v759_v37  ;;  %v829_v13 = vadd.f32 %v828_v17, %v798_v6 }
 0x196   : > { %v761_v42 = vadd.f32 %v1793_v41, %v760_v39  ;;  %v830_v36 = vadd.f32 %v829_v13, %v799_v38 }
 0x198   : > { %v762_v43 = vrot.slane %v761_v42, 4  ;;  %v831_v44 = vadd.f32 %v830_v36, %v800_v40 }
 0x19a   : > { %v763_v47 = vadd.f32 %v762_v43, %v761_v42  ;;  %v832_v49 = vrot.slane %v831_v44, 4 }
 0x19c   : > { %v764_v50 = vrot.slane %v763_v47, 2  ;;  %v833_v45 = vadd.f32 %v832_v49, %v831_v44 }
 0x19e   : > { %v765_v51 = vadd.f32 %v764_v50, %v763_v47  ;;  %v834_v52 = vrot.slane %v833_v45, 2 }
 0x1a0   : > { %v766_v33 = vrot.slane %v765_v51, 1  ;;  %v835_v54 = vadd.f32 %v834_v52, %v833_v45 }
 0x1a2   : > { %v767_v55 = vadd.f32 %v766_v33, %v765_v51  ;;  %v836_v56 = vrot.slane %v835_v54, 1 }
 0x1a4   : > { %768 = vst [vmem:[%s214_s4] sm:$0x1] %v767_v55  ;;  %v837_v41 = vadd.f32 %v836_v56, %v835_v54 }
 0x1a6   : > { %838 = vst [vmem:[%s214_s4 + $0x1] sm:$0x1] %v837_v41 }
 0x1a7   : > { %1467 = shalt.err (!%p1464_p0)
}
 0x1a8   : > { %s1468_s6 = scalar_lea.hbm %s1889_s27, 128  ;;  %s1472_s10 = scalar_lea.hbm %s1936_s3, 256 }
 0x1a9   : > { %p1469_p5 = scmp.ne.s32.totalorder %s1889_s27, %s1468_s6  ;;  %p1473_p4 = scmp.lt.u32.totalorder %s1889_s27, %s1936_s3 }
 0x1aa   : > { %p1474_p6 = scmp.lt.u32.totalorder %s1472_s10, %s1468_s6  ;;  %p1476_p10 = scmp.lt.u32.totalorder %s1468_s6, %s1889_s27 }
 0x1ab   : > { %p1470_p11 = pnand %p1469_p5, %p1652_p12 }
 0x1ac   : > { %p1475_p8 = por %p1474_p6, %p1473_p4 }
 0x1ad   : > { %p1471_p2 = pneg %p1470_p11 }
 0x1ae   : > { %p1477_p13 = por %p1476_p10, %p1475_p8 }
 0x1b0   : > { %p1478_p3 = pnand %p1477_p13, %p1471_p2 }
 0x1b2   : > { %1481 = shalt.err (!%p1478_p3)
}
 0x1b3   : > { %1285 = dma.vmem_to_hbm [thread:$0]  (%p1652_p12), %s1891_s25, 128, %s1889_s27, %s845_s28  }
 0x1b4 PF: > { %s886_s20 = sand.u32 1, %s1516_s12   ;;  %p1951_p7 = scmp.ne.s32.totalorder %s1941_s19, 0 }
 0x1b5   : > { %p1952_p9 = scmp.ge.s32.totalorder %s1528_s15, 2  ;;  %s887_s8 = scalar_lea.sflag [#allocation4], %s886_s20 }
 0x1b7   : > { %p1297_p1 = pnand %p1952_p9, %p1951_p7 }
 0x1b9   : > { %1507 = dma.done.wait (!%p1297_p1), %s887_s8, 2048  }
 0x1ba   : > { %1509 = vsyncadd (!%p1297_p1), %s887_s8, 4294965248  ;;  %s896_s9 = scalar_lea.sflag [#allocation9], %s886_s20 }
 0x1bb   : > { %1511 = dma.done.wait (!%p1297_p1), %s896_s9, 128  }
 0x1bc   : > { %1513 = vsyncadd (!%p1297_p1), %s896_s9, 4294967168  ;;  %p21_p12 = scmp.ge.s32.totalorder %s1614_s24, 4   ;;  %s1953_s12 = smov %s1520_s13 }
 0x1bd   : > { %s1954_s13 = smov %s1524_s14  ;;  %s1955_s14 = smov %s1648_s17 }
 0x1be   : > { %s1956_s15 = smov %s1614_s24  ;;  %23 = sbr.rel (!%p21_p12) target bundleno = 8 (0x8), region = 94 }
 0x1c5   :  { %901 = vsyncpa [#allocation3], 1 }
 0x1c6   :  { %903 = vsyncpa [#allocation3 + $0x1], 1 }
 0x1c7   :  { %904 = vsyncpa [#allocation6], 1 }
 0x1c8   :  { %905 = vsyncpa [#allocation4], 1 }
 0x1c9   :  { %907 = vsyncpa [#allocation4 + $0x1], 1 }
 0x1ca   :  { %908 = vsyncpa [#allocation9], 1 }
 0x1cb   :  { %910 = vsyncpa [#allocation9 + $0x1], 1 }

// kernel: resblock_forward.9
= control target key start
LH: loop header
LB: loop body
LE: loop exit
PB: predicated region body
PF: predicated region fallthrough
CT: control target
= control target key end

     0   :  { %11 = vsyncpa [#allocation3], 0  ;;  %s2333_s0 = inlined_call_operand.hbm [shape: bf16[512,128], index: 0, kind: input, shape index: {}]   ;;  %s2334_s1 = inlined_call_operand.hbm [shape: f32[1,128], index: 1, kind: input, shape index: {}]   ;;  %s2335_s2 = inlined_call_operand.hbm [shape: f32[1,128], index: 2, kind: input, shape index: {}]   ;;  %s2336_s3 = inlined_call_operand.hbm [shape: bf16[512,128], index: 3, kind: input, shape index: {}]   ;;  %s2337_s4 = inlined_call_operand.hbm [shape: f32[1,128], index: 4, kind: input, shape index: {}]   ;;  %s2338_s5 = inlined_call_operand.hbm [shape: f32[1,128], index: 5, kind: input, shape index: {}]   ;;  %s2339_s6 = inlined_call_operand.hbm [shape: bf16[512,128], index: 6, kind: output, shape index: {}]  }
   0x1   :  { %12 = vsyncpa [#allocation6], 0 }
   0x2   :  { %13 = vsyncpa [#allocation9], 0 }
   0x3   :  { %14 = vsyncpa [#allocation12], 0 }
   0x4   :  { %15 = vsyncpa [#allocation4], 0  ;;  %s1924_s21 = smov [#allocation5]   ;;  %s1760_s25 = scalar_lea.hbm %s2334_s1, 16 }
   0x5   :  { %s34_s22 = sshll.u32 %s1924_s21, 4  ;;  %p1761_p0 = scmp.ne.s32.totalorder %s2334_s1, %s1760_s25  ;;  %s35_s22 = int_to_ptr.vmem [resolvable:$true] %s34_s22 }
   0x6   :  { %p1764_p1 = scmp.lt.u32.totalorder %s1760_s25, %s2334_s1 }
   0x8   :  { %p1766_p2 = pnand %p1764_p1, %p1761_p0 }
   0xa   :  { %1769 = shalt.err (!%p1766_p2)
}
   0xb   :  { %s1770_s30 = scalar_lea.vmem %s35_s22, 16  ;;  %s1774_s7 = scalar_lea.vmem %s35_s22, 32 }
   0xc   :  { %p1771_p3 = scmp.ne.s32.totalorder %s35_s22, %s1770_s30  ;;  %p1775_p4 = scmp.lt.s32.totalorder %s35_s22, %s35_s22 }
   0xd   :  { %p1776_p5 = scmp.lt.s32.totalorder %s1774_s7, %s1770_s30 }
   0xf   :  { %p1777_p6 = por %p1776_p5, %p1775_p4 }
  0x11   :  { %p1778_p7 = pnand %p1777_p6, %p1771_p3 }
  0x13   :  { %1781 = shalt.err (!%p1778_p7)
}
  0x14   :  { %37 = dma.hbm_to_vmem [thread:$0]  %s2334_s1, 16, %s35_s22, [#allocation6]  }
  0x15   :  { %s1925_s10 = smov [#allocation8]   ;;  %s1926_s12 = smov [#allocation2]  }
  0x16   :  { %s53_s11 = sshll.u32 %s1925_s10, 4  ;;  %s21_s13 = sshll.u32 %s1926_s12, 4  ;;  %s54_s11 = int_to_ptr.vmem [resolvable:$true] %s53_s11  ;;  %s22_s13 = int_to_ptr.vmem [resolvable:$true] %s21_s13 }
  0x17   :  { %s1782_s16 = scalar_lea.hbm %s2336_s3, 4096 }
  0x18   :  { %p1783_p8 = scmp.ne.s32.totalorder %s2336_s3, %s1782_s16  ;;  %p1786_p9 = scmp.lt.u32.totalorder %s1782_s16, %s2336_s3 }
  0x1a   :  { %p1788_p10 = pnand %p1786_p9, %p1783_p8 }
  0x1c   :  { %1791 = shalt.err (!%p1788_p10)
}
  0x1d   :  { %s1792_s1 = scalar_lea.vmem %s54_s11, 4096  ;;  %p1797_p12 = scmp.lt.s32.totalorder %s54_s11, %s54_s11 }
  0x1e   :  { %p1793_p11 = scmp.ne.s32.totalorder %s54_s11, %s1792_s1  ;;  %p1798_p13 = scmp.lt.s32.totalorder %s1792_s1, %s1792_s1 }
  0x20   :  { %p1799_p0 = por %p1798_p13, %p1797_p12 }
  0x22   :  { %p1800_p1 = pnand %p1799_p0, %p1793_p11 }
  0x24   :  { %1803 = shalt.err (!%p1800_p1)
}
  0x25   :  { %s1927_s21 = smov 64   ;;  %s1928_s22 = smov 4  }
  0x26   :  { %59 = dma.hbm_to_vmem [thread:$0]  %s2336_s3, 4096, %s54_s11, [#allocation9], %s1927_s21, %s1927_s21, %s1928_s22  }
  0x27   :  { %s1804_s27 = scalar_lea.hbm %s2333_s0, 4096 }
  0x28   :  { %p1805_p2 = scmp.ne.s32.totalorder %s2333_s0, %s1804_s27  ;;  %p1808_p3 = scmp.lt.u32.totalorder %s1804_s27, %s2333_s0 }
  0x2a   :  { %p1810_p4 = pnand %p1808_p3, %p1805_p2 }
  0x2c   :  { %1813 = shalt.err (!%p1810_p4)
}
  0x2d   :  { %s1814_s8 = scalar_lea.vmem %s22_s13, 4096  ;;  %p1819_p6 = scmp.lt.s32.totalorder %s22_s13, %s22_s13 }
  0x2e   :  { %p1815_p5 = scmp.ne.s32.totalorder %s22_s13, %s1814_s8  ;;  %p1820_p7 = scmp.lt.s32.totalorder %s1814_s8, %s1814_s8 }
  0x30   :  { %p1821_p8 = por %p1820_p7, %p1819_p6 }
  0x32   :  { %p1822_p9 = pnand %p1821_p8, %p1815_p5 }
  0x34   :  { %1825 = shalt.err (!%p1822_p9)
}
  0x35   :  { %27 = dma.hbm_to_vmem [thread:$0]  %s2333_s0, 4096, %s22_s13, [#allocation3], %s1927_s21, %s1927_s21, %s1928_s22  }
  0x36   :  { %s1929_s10 = smov [#allocation7]   ;;  %s1930_s12 = smov [#allocation10]  }
  0x37   :  { %s44_s11 = sshll.u32 %s1929_s10, 4  ;;  %s66_s14 = sshll.u32 %s1930_s12, 4  ;;  %s45_s11 = int_to_ptr.vmem [resolvable:$true] %s44_s11  ;;  %s67_s14 = int_to_ptr.vmem [resolvable:$true] %s66_s14 }
  0x38   :  { %s1826_s17 = scalar_lea.hbm %s2335_s2, 16 }
  0x39   :  { %p1827_p10 = scmp.ne.s32.totalorder %s2335_s2, %s1826_s17  ;;  %p1830_p11 = scmp.lt.u32.totalorder %s1826_s17, %s2335_s2 }
  0x3b   :  { %p1832_p12 = pnand %p1830_p11, %p1827_p10 }
  0x3d   :  { %1835 = shalt.err (!%p1832_p12)
}
  0x3e   :  { %s1836_s0 = scalar_lea.vmem %s45_s11, 16  ;;  %s1840_s13 = scalar_lea.vmem %s45_s11, 32 }
  0x3f   :  { %p1837_p13 = scmp.ne.s32.totalorder %s45_s11, %s1836_s0  ;;  %p1841_p0 = scmp.lt.s32.totalorder %s45_s11, %s45_s11 }
  0x40   :  { %p1842_p1 = scmp.lt.s32.totalorder %s1840_s13, %s1836_s0 }
  0x42   :  { %p1843_p2 = por %p1842_p1, %p1841_p0 }
  0x44   :  { %p1844_p3 = pnand %p1843_p2, %p1837_p13 }
  0x46   :  { %1847 = shalt.err (!%p1844_p3)
}
  0x47   :  { %47 = dma.hbm_to_vmem [thread:$0]  %s2335_s2, 16, %s45_s11, [#allocation6]  }
  0x48   :  { %s1848_s27 = scalar_lea.hbm %s2337_s4, 16 }
  0x49   :  { %p1849_p4 = scmp.ne.s32.totalorder %s2337_s4, %s1848_s27  ;;  %p1852_p5 = scmp.lt.u32.totalorder %s1848_s27, %s2337_s4 }
  0x4b   :  { %p1854_p6 = pnand %p1852_p5, %p1849_p4 }
  0x4d   :  { %1857 = shalt.err (!%p1854_p6)
}
  0x4e   :  { %s1858_s8 = scalar_lea.vmem %s67_s14, 16  ;;  %s1862_s3 = scalar_lea.vmem %s67_s14, 32 }
  0x4f   :  { %p1859_p7 = scmp.ne.s32.totalorder %s67_s14, %s1858_s8  ;;  %p1863_p8 = scmp.lt.s32.totalorder %s67_s14, %s67_s14 }
  0x50   :  { %p1864_p9 = scmp.lt.s32.totalorder %s1862_s3, %s1858_s8 }
  0x52   :  { %p1865_p10 = por %p1864_p9, %p1863_p8 }
  0x54   :  { %p1866_p11 = pnand %p1865_p10, %p1859_p7 }
  0x56   :  { %1869 = shalt.err (!%p1866_p11)
}
  0x57   :  { %69 = dma.hbm_to_vmem [thread:$0]  %s2337_s4, 16, %s67_s14, [#allocation9]  }
  0x58   :  { %s1931_s10 = smov [#allocation11]   ;;  %s1870_s16 = scalar_lea.hbm %s2338_s5, 16 }
  0x59   :  { %s76_s11 = sshll.u32 %s1931_s10, 4  ;;  %p1871_p12 = scmp.ne.s32.totalorder %s2338_s5, %s1870_s16  ;;  %s77_s11 = int_to_ptr.vmem [resolvable:$true] %s76_s11 }
  0x5a   :  { %p1874_p13 = scmp.lt.u32.totalorder %s1870_s16, %s2338_s5 }
  0x5c   :  { %p1876_p0 = pnand %p1874_p13, %p1871_p12 }
  0x5e   :  { %1879 = shalt.err (!%p1876_p0)
}
  0x5f   :  { %s1880_s1 = scalar_lea.vmem %s77_s11, 16  ;;  %s1884_s4 = scalar_lea.vmem %s77_s11, 32 }
  0x60   :  { %p1881_p1 = scmp.ne.s32.totalorder %s77_s11, %s1880_s1  ;;  %p1885_p2 = scmp.lt.s32.totalorder %s77_s11, %s77_s11 }
  0x61   :  { %p1886_p3 = scmp.lt.s32.totalorder %s1884_s4, %s1880_s1 }
  0x63   :  { %p1887_p4 = por %p1886_p3, %p1885_p2 }
  0x65   :  { %p1888_p5 = pnand %p1887_p4, %p1881_p1 }
  0x67   :  { %1891 = shalt.err (!%p1888_p5)
}
  0x68   :  { %79 = dma.hbm_to_vmem [thread:$0]  %s2338_s5, 16, %s77_s11, [#allocation12]  }
  0x69   :  { %1914 = dma.done.wait [#allocation3], 4096  }
  0x6a   :  { %1915 = vsyncadd [#allocation3], 4294963200 }
  0x6b   :  { %1916 = dma.done.wait [#allocation6], 32  }
  0x6c   :  { %1917 = vsyncadd [#allocation6], 4294967264 }
  0x6d   :  { %1918 = dma.done.wait [#allocation9], 4112  }
  0x6e   :  { %1919 = vsyncadd [#allocation9], 4294963184 }
  0x6f   :  { %1920 = dma.done.wait [#allocation12], 16  }
  0x70   :  { %1921 = vsyncadd [#allocation12], 4294967280  ;;  %v1239_v0 = vld [vmem:[#allocation2] sm:$0xff]   ;;  %v1654_v9 = vld [vmem:[#allocation2 + $0x8] sm:$0xff]   ;;  %s1932_s5 = smov [#allocation13]  }
  0x71   :  { %v2046_v1 = vld [vmem:[#allocation5] ss:$0 sm:$0xff]  ;;  %v1240_v2 = vunpack.c.l.bf16 %v1239_v0  ;;  %v1241_v3 = vunpack.c.h.bf16 %v1239_v0  ;;  %v1367_v4 = vld [vmem:[#allocation8] sm:$0xff]   ;;  %v2050_v6 = vld [vmem:[#allocation7] ss:$0 sm:$0xff]  ;;  %v1244_v14 = vunpack.c.l.bf16 %v1654_v9  ;;  %v1245_v15 = vunpack.c.h.bf16 %v1654_v9  ;;  %s1091_s13 = sshll.u32 %s1932_s5, 4  ;;  %s1092_s13 = int_to_ptr.vmem [resolvable:$true] %s1091_s13 }
  0x72   :  { %v2048_v5 = vld [vmem:[#allocation10] ss:$0 sm:$0xff]  ;;  %v1368_v7 = vunpack.c.l.bf16 %v1367_v4  ;;  %v1369_v8 = vunpack.c.h.bf16 %v1367_v4  ;;  %v1685_v10 = vld [vmem:[#allocation8 + $0x8] sm:$0xff]   ;;  %v2054_v13 = vld [vmem:[#allocation11] ss:$0 sm:$0xff]  ;;  %s1892_s23 = scalar_lea.vmem %s1092_s13, 4096  ;;  %p1897_p7 = scmp.lt.s32.totalorder %s1092_s13, %s1092_s13 }
  0x73   :  { %v233_v11 = vmul.f32 %v1240_v2, %v2046_v1  ;;  %v234_v12 = vmul.f32 %v1241_v3, %v2046_v1  ;;  %v1372_v18 = vunpack.c.l.bf16 %v1685_v10  ;;  %v1373_v19 = vunpack.c.h.bf16 %v1685_v10  ;;  %v1655_v20 = vld [vmem:[#allocation2 + $0x10] sm:$0xff]   ;;  %v1656_v42 = vld [vmem:[#allocation2 + $0x18] sm:$0xff]   ;;  %v1657_v52 = vld [vmem:[#allocation2 + $0x20] sm:$0xff]   ;;  %p1893_p6 = scmp.ne.s32.totalorder %s1092_s13, %s1892_s23  ;;  %p1898_p8 = scmp.lt.s32.totalorder %s1892_s23, %s1892_s23 }
  0x74   :  { %v503_v16 = vmul.f32 %v1368_v7, %v2048_v5  ;;  %v504_v17 = vmul.f32 %v1369_v8, %v2048_v5  ;;  %v235_v23 = vmul.f32 %v1244_v14, %v2046_v1  ;;  %v236_v24 = vmul.f32 %v1245_v15, %v2046_v1  ;;  %v1686_v29 = vld [vmem:[#allocation8 + $0x10] sm:$0xff]   ;;  %v1687_v47 = vld [vmem:[#allocation8 + $0x18] sm:$0xff]   ;;  %v1688_v8 = vld [vmem:[#allocation8 + $0x20] sm:$0xff]  }
  0x75   :  { %v304_v21 = vadd.f32 %v2050_v6, %v233_v11  ;;  %v305_v22 = vadd.f32 %v2050_v6, %v234_v12  ;;  %v505_v27 = vmul.f32 %v1372_v18, %v2048_v5  ;;  %v506_v28 = vmul.f32 %v1373_v19, %v2048_v5  ;;  %v1658_v14 = vld [vmem:[#allocation2 + $0x28] sm:$0xff]   ;;  %p1899_p9 = por %p1898_p8, %p1897_p7 }
  0x76   :  { %v574_v25 = vadd.f32 %v2054_v13, %v503_v16  ;;  %v575_v26 = vadd.f32 %v2054_v13, %v504_v17  ;;  %v306_v30 = vadd.f32 %v2050_v6, %v235_v23  ;;  %v307_v31 = vadd.f32 %v2050_v6, %v236_v24  ;;  %v1689_v23 = vld [vmem:[#allocation8 + $0x28] sm:$0xff]  }
  0x77   :  { %v1248_v32 = vunpack.c.l.bf16 %v1655_v20  ;;  %v1249_v33 = vunpack.c.h.bf16 %v1655_v20  ;;  %v576_v36 = vadd.f32 %v2054_v13, %v505_v27  ;;  %v577_v37 = vadd.f32 %v2054_v13, %v506_v28  ;;  %p1900_p10 = pnand %p1899_p9, %p1893_p6 }
  0x78   :  { %v638_v34 = vadd.f32 %v574_v25, %v304_v21  ;;  %v639_v35 = vadd.f32 %v575_v26, %v305_v22  ;;  %v1376_v40 = vunpack.c.l.bf16 %v1686_v29  ;;  %v1377_v41 = vunpack.c.h.bf16 %v1686_v29 }
  0x79   :  { %v237_v38 = vmul.f32 %v1248_v32, %v2046_v1  ;;  %v238_v39 = vmul.f32 %v1249_v33, %v2046_v1  ;;  %v640_v45 = vadd.f32 %v576_v36, %v306_v30  ;;  %v641_v46 = vadd.f32 %v577_v37, %v307_v31  ;;  %v1659_v32 = vld [vmem:[#allocation2 + $0x30] sm:$0xff]  }
  0x7a   :  { %v702_v43 = vmax.f32 %v638_v34, 0.0  ;;  %v703_v44 = vmax.f32 %v639_v35, 0.0  ;;  %v507_v50 = vmul.f32 %v1376_v40, %v2048_v5  ;;  %v508_v51 = vmul.f32 %v1377_v41, %v2048_v5 }
  0x7b   :  { %v308_v48 = vadd.f32 %v2050_v6, %v237_v38  ;;  %v309_v49 = vadd.f32 %v2050_v6, %v238_v39  ;;  %v704_v54 = vmax.f32 %v640_v45, 0.0  ;;  %v705_v55 = vmax.f32 %v641_v46, 0.0  ;;  %v1690_v45 = vld [vmem:[#allocation8 + $0x30] sm:$0xff]  }
  0x7c   :  { %v1497_v53 = vpack.c.bf16 %v703_v44, %v702_v43  ;;  %v1252_v56 = vunpack.c.l.bf16 %v1656_v42  ;;  %v578_v57 = vadd.f32 %v2054_v13, %v507_v50  ;;  %v579_v58 = vadd.f32 %v2054_v13, %v508_v51 }
  0x7d   :  { %v1253_v59 = vunpack.c.h.bf16 %v1656_v42  ;;  %v1380_v60 = vunpack.c.l.bf16 %v1687_v47  ;;  %v1502_v61 = vpack.c.bf16 %v705_v55, %v704_v54  ;;  %v1381_v63 = vunpack.c.h.bf16 %v1687_v47  ;;  %v1660_v54 = vld [vmem:[#allocation2 + $0x38] sm:$0xff]  }
  0x7e   :  { %1498 = vst [vmem:[#allocation13] sm:$0xff] %v1497_v53   ;;  %v239_v62 = vmul.f32 %v1252_v56, %v2046_v1  ;;  %v1256_v0 = vunpack.c.l.bf16 %v1657_v52  ;;  %v642_v2 = vadd.f32 %v578_v57, %v308_v48  ;;  %v643_v3 = vadd.f32 %v579_v58, %v309_v49 }
  0x7f   :  { %v240_v4 = vmul.f32 %v1253_v59, %v2046_v1  ;;  %v509_v7 = vmul.f32 %v1380_v60, %v2048_v5  ;;  %1716 = vst [vmem:[#allocation13 + $0x8] sm:$0xff] %v1502_v61   ;;  %v510_v10 = vmul.f32 %v1381_v63, %v2048_v5  ;;  %v1257_v11 = vunpack.c.h.bf16 %v1657_v52 }
  0x80   :  { %v310_v9 = vadd.f32 %v2050_v6, %v239_v62  ;;  %v241_v12 = vmul.f32 %v1256_v0, %v2046_v1  ;;  %v706_v15 = vmax.f32 %v642_v2, 0.0  ;;  %v707_v16 = vmax.f32 %v643_v3, 0.0 }
  0x81   :  { %v311_v17 = vadd.f32 %v2050_v6, %v240_v4  ;;  %v580_v18 = vadd.f32 %v2054_v13, %v509_v7  ;;  %v581_v19 = vadd.f32 %v2054_v13, %v510_v10  ;;  %v242_v20 = vmul.f32 %v1257_v11, %v2046_v1  ;;  %v1691_v4 = vld [vmem:[#allocation8 + $0x38] sm:$0xff]  }
  0x82   :  { %v312_v21 = vadd.f32 %v2050_v6, %v241_v12  ;;  %v1384_v22 = vunpack.c.l.bf16 %v1688_v8  ;;  %v1507_v24 = vpack.c.bf16 %v707_v16, %v706_v15  ;;  %v1385_v26 = vunpack.c.h.bf16 %v1688_v8  ;;  %v1661_v7 = vld [vmem:[#allocation2 + $0x40] sm:$0xff]  }
  0x83   :  { %v644_v25 = vadd.f32 %v580_v18, %v310_v9  ;;  %v1260_v27 = vunpack.c.l.bf16 %v1658_v14  ;;  %v645_v28 = vadd.f32 %v581_v19, %v311_v17  ;;  %v313_v29 = vadd.f32 %v2050_v6, %v242_v20 }
  0x84   :  { %v511_v30 = vmul.f32 %v1384_v22, %v2048_v5  ;;  %v1261_v31 = vunpack.c.h.bf16 %v1658_v14  ;;  %1717 = vst [vmem:[#allocation13 + $0x10] sm:$0xff] %v1507_v24   ;;  %v512_v34 = vmul.f32 %v1385_v26, %v2048_v5  ;;  %v1388_v36 = vunpack.c.l.bf16 %v1689_v23 }
  0x85   :  { %v708_v33 = vmax.f32 %v644_v25, 0.0  ;;  %v243_v35 = vmul.f32 %v1260_v27, %v2046_v1  ;;  %v709_v37 = vmax.f32 %v645_v28, 0.0  ;;  %v1389_v40 = vunpack.c.h.bf16 %v1689_v23 }
  0x86   :  { %v582_v38 = vadd.f32 %v2054_v13, %v511_v30  ;;  %v244_v39 = vmul.f32 %v1261_v31, %v2046_v1  ;;  %v583_v41 = vadd.f32 %v2054_v13, %v512_v34  ;;  %v513_v43 = vmul.f32 %v1388_v36, %v2048_v5  ;;  %v1662_v30 = vld [vmem:[#allocation2 + $0x48] sm:$0xff]  }
  0x87   :  { %v314_v42 = vadd.f32 %v2050_v6, %v243_v35  ;;  %v1264_v44 = vunpack.c.l.bf16 %v1659_v32  ;;  %v1512_v46 = vpack.c.bf16 %v709_v37, %v708_v33  ;;  %v514_v49 = vmul.f32 %v1389_v40, %v2048_v5 }
  0x88   :  { %v646_v47 = vadd.f32 %v582_v38, %v312_v21  ;;  %v315_v48 = vadd.f32 %v2050_v6, %v244_v39  ;;  %v647_v50 = vadd.f32 %v583_v41, %v313_v29  ;;  %v584_v51 = vadd.f32 %v2054_v13, %v513_v43  ;;  %v1692_v21 = vld [vmem:[#allocation8 + $0x40] sm:$0xff]   ;;  %v1693_v39 = vld [vmem:[#allocation8 + $0x48] sm:$0xff]  }
  0x89   :  { %v1265_v52 = vunpack.c.h.bf16 %v1659_v32  ;;  %v245_v53 = vmul.f32 %v1264_v44, %v2046_v1  ;;  %1718 = vst [vmem:[#allocation13 + $0x18] sm:$0xff] %v1512_v46   ;;  %v585_v56 = vadd.f32 %v2054_v13, %v514_v49  ;;  %v1392_v57 = vunpack.c.l.bf16 %v1690_v45 }
  0x8a   :  { %v710_v55 = vmax.f32 %v646_v47, 0.0  ;;  %v1393_v58 = vunpack.c.h.bf16 %v1690_v45  ;;  %v711_v59 = vmax.f32 %v647_v50, 0.0  ;;  %v648_v60 = vadd.f32 %v584_v51, %v314_v42 }
  0x8b   :  { %v246_v61 = vmul.f32 %v1265_v52, %v2046_v1  ;;  %v316_v62 = vadd.f32 %v2050_v6, %v245_v53  ;;  %v649_v63 = vadd.f32 %v585_v56, %v315_v48  ;;  %v515_v0 = vmul.f32 %v1392_v57, %v2048_v5  ;;  %v1663_v52 = vld [vmem:[#allocation2 + $0x50] sm:$0xff]  }
  0x8c   :  { %v516_v2 = vmul.f32 %v1393_v58, %v2048_v5  ;;  %v1268_v3 = vunpack.c.l.bf16 %v1660_v54  ;;  %v1517_v8 = vpack.c.bf16 %v711_v59, %v710_v55  ;;  %v712_v9 = vmax.f32 %v648_v60, 0.0 }
  0x8d   :  { %v317_v10 = vadd.f32 %v2050_v6, %v246_v61  ;;  %v1269_v11 = vunpack.c.h.bf16 %v1660_v54  ;;  %v713_v12 = vmax.f32 %v649_v63, 0.0  ;;  %v586_v14 = vadd.f32 %v2054_v13, %v515_v0  ;;  %v1694_v61 = vld [vmem:[#allocation8 + $0x50] sm:$0xff]  }
  0x8e   :  { %v587_v15 = vadd.f32 %v2054_v13, %v516_v2  ;;  %v247_v16 = vmul.f32 %v1268_v3, %v2046_v1  ;;  %1719 = vst [vmem:[#allocation13 + $0x20] sm:$0xff] %v1517_v8   ;;  %v1396_v18 = vunpack.c.l.bf16 %v1691_v4  ;;  %v1397_v19 = vunpack.c.h.bf16 %v1691_v4  ;;  %v1664_v3 = vld [vmem:[#allocation2 + $0x58] sm:$0xff]  }
  0x8f   :  { %v248_v17 = vmul.f32 %v1269_v11, %v2046_v1  ;;  %v1272_v20 = vunpack.c.l.bf16 %v1661_v7  ;;  %v1522_v22 = vpack.c.bf16 %v713_v12, %v712_v9  ;;  %v650_v23 = vadd.f32 %v586_v14, %v316_v62 }
  0x90   :  { %v651_v24 = vadd.f32 %v587_v15, %v317_v10  ;;  %v318_v25 = vadd.f32 %v2050_v6, %v247_v16  ;;  %v517_v27 = vmul.f32 %v1396_v18, %v2048_v5  ;;  %v518_v28 = vmul.f32 %v1397_v19, %v2048_v5  ;;  %v1695_v19 = vld [vmem:[#allocation8 + $0x58] sm:$0xff]  }
  0x91   :  { %v319_v26 = vadd.f32 %v2050_v6, %v248_v17  ;;  %v1273_v29 = vunpack.c.h.bf16 %v1661_v7  ;;  %1720 = vst [vmem:[#allocation13 + $0x28] sm:$0xff] %v1522_v22   ;;  %v714_v31 = vmax.f32 %v650_v23, 0.0  ;;  %v249_v33 = vmul.f32 %v1272_v20, %v2046_v1 }
  0x92   :  { %v715_v32 = vmax.f32 %v651_v24, 0.0  ;;  %v1400_v34 = vunpack.c.l.bf16 %v1692_v21  ;;  %v588_v35 = vadd.f32 %v2054_v13, %v517_v27  ;;  %v589_v36 = vadd.f32 %v2054_v13, %v518_v28  ;;  %v1665_v24 = vld [vmem:[#allocation2 + $0x60] sm:$0xff]  }
  0x93   :  { %v250_v37 = vmul.f32 %v1273_v29, %v2046_v1  ;;  %v1401_v38 = vunpack.c.h.bf16 %v1692_v21  ;;  %v320_v41 = vadd.f32 %v2050_v6, %v249_v33  ;;  %v1276_v43 = vunpack.c.l.bf16 %v1662_v30 }
  0x94   :  { %v1527_v40 = vpack.c.bf16 %v715_v32, %v714_v31  ;;  %v519_v42 = vmul.f32 %v1400_v34, %v2048_v5  ;;  %v652_v44 = vadd.f32 %v588_v35, %v318_v25  ;;  %v653_v45 = vadd.f32 %v589_v36, %v319_v26 }
  0x95   :  { %v321_v46 = vadd.f32 %v2050_v6, %v250_v37  ;;  %v520_v47 = vmul.f32 %v1401_v38, %v2048_v5  ;;  %v1277_v49 = vunpack.c.h.bf16 %v1662_v30  ;;  %v251_v50 = vmul.f32 %v1276_v43, %v2046_v1  ;;  %v1696_v37 = vld [vmem:[#allocation8 + $0x60] sm:$0xff]  }
  0x96   :  { %1721 = vst [vmem:[#allocation13 + $0x30] sm:$0xff] %v1527_v40   ;;  %v590_v48 = vadd.f32 %v2054_v13, %v519_v42  ;;  %v1404_v51 = vunpack.c.l.bf16 %v1693_v39  ;;  %v716_v53 = vmax.f32 %v652_v44, 0.0  ;;  %v717_v54 = vmax.f32 %v653_v45, 0.0 }
  0x97   :  { %v591_v55 = vadd.f32 %v2054_v13, %v520_v47  ;;  %v1405_v56 = vunpack.c.h.bf16 %v1693_v39  ;;  %v252_v58 = vmul.f32 %v1277_v49, %v2046_v1  ;;  %v322_v59 = vadd.f32 %v2050_v6, %v251_v50 }
  0x98   :  { %v654_v57 = vadd.f32 %v590_v48, %v320_v41  ;;  %v521_v60 = vmul.f32 %v1404_v51, %v2048_v5  ;;  %v1532_v62 = vpack.c.bf16 %v717_v54, %v716_v53  ;;  %v1280_v2 = vunpack.c.l.bf16 %v1663_v52 }
  0x99   :  { %v655_v63 = vadd.f32 %v591_v55, %v321_v46  ;;  %v522_v0 = vmul.f32 %v1405_v56, %v2048_v5  ;;  %v323_v7 = vadd.f32 %v2050_v6, %v252_v58  ;;  %v1281_v9 = vunpack.c.h.bf16 %v1663_v52  ;;  %v1666_v46 = vld [vmem:[#allocation2 + $0x68] sm:$0xff]  }
  0x9a   :  { %v718_v4 = vmax.f32 %v654_v57, 0.0  ;;  %v592_v8 = vadd.f32 %v2054_v13, %v521_v60  ;;  %1722 = vst [vmem:[#allocation13 + $0x38] sm:$0xff] %v1532_v62   ;;  %v253_v12 = vmul.f32 %v1280_v2, %v2046_v1  ;;  %v1408_v14 = vunpack.c.l.bf16 %v1694_v61 }
  0x9b   :  { %v719_v10 = vmax.f32 %v655_v63, 0.0  ;;  %v593_v11 = vadd.f32 %v2054_v13, %v522_v0  ;;  %v254_v16 = vmul.f32 %v1281_v9, %v2046_v1  ;;  %v1409_v17 = vunpack.c.h.bf16 %v1694_v61  ;;  %v1667_v0 = vld [vmem:[#allocation2 + $0x70] sm:$0xff]  }
  0x9c   :  { %v656_v15 = vadd.f32 %v592_v8, %v322_v59  ;;  %v1284_v18 = vunpack.c.l.bf16 %v1664_v3  ;;  %v324_v22 = vadd.f32 %v2050_v6, %v253_v12  ;;  %v523_v23 = vmul.f32 %v1408_v14, %v2048_v5  ;;  %v1697_v59 = vld [vmem:[#allocation8 + $0x68] sm:$0xff]  }
  0x9d   :  { %v1537_v20 = vpack.c.bf16 %v719_v10, %v718_v4  ;;  %v657_v21 = vadd.f32 %v593_v11, %v323_v7  ;;  %v325_v26 = vadd.f32 %v2050_v6, %v254_v16  ;;  %v524_v27 = vmul.f32 %v1409_v17, %v2048_v5  ;;  %v1698_v17 = vld [vmem:[#allocation8 + $0x70] sm:$0xff]  }
  0x9e   :  { %v720_v25 = vmax.f32 %v656_v15, 0.0  ;;  %v1285_v28 = vunpack.c.h.bf16 %v1664_v3  ;;  %v594_v30 = vadd.f32 %v2054_v13, %v523_v23  ;;  %v255_v31 = vmul.f32 %v1284_v18, %v2046_v1 }
  0x9f   :  { %1723 = vst [vmem:[#allocation13 + $0x40] sm:$0xff] %v1537_v20   ;;  %v721_v29 = vmax.f32 %v657_v21, 0.0  ;;  %v1412_v32 = vunpack.c.l.bf16 %v1695_v19  ;;  %v595_v33 = vadd.f32 %v2054_v13, %v524_v27  ;;  %v1413_v35 = vunpack.c.h.bf16 %v1695_v19 }
  0xa0   :  { %v256_v34 = vmul.f32 %v1285_v28, %v2046_v1  ;;  %v1288_v36 = vunpack.c.l.bf16 %v1665_v24  ;;  %v658_v39 = vadd.f32 %v594_v30, %v324_v22  ;;  %v326_v40 = vadd.f32 %v2050_v6, %v255_v31  ;;  %v1668_v22 = vld [vmem:[#allocation2 + $0x78] sm:$0xff]  }
  0xa1   :  { %v1542_v38 = vpack.c.bf16 %v721_v29, %v720_v25  ;;  %v525_v41 = vmul.f32 %v1412_v32, %v2048_v5  ;;  %v659_v42 = vadd.f32 %v595_v33, %v325_v26  ;;  %v526_v44 = vmul.f32 %v1413_v35, %v2048_v5  ;;  %v1699_v35 = vld [vmem:[#allocation8 + $0x78] sm:$0xff]  }
  0xa2   :  { %v327_v43 = vadd.f32 %v2050_v6, %v256_v34  ;;  %v1289_v45 = vunpack.c.h.bf16 %v1665_v24  ;;  %v722_v47 = vmax.f32 %v658_v39, 0.0  ;;  %v257_v49 = vmul.f32 %v1288_v36, %v2046_v1 }
  0xa3   :  { %1724 = vst [vmem:[#allocation13 + $0x48] sm:$0xff] %v1542_v38   ;;  %v596_v48 = vadd.f32 %v2054_v13, %v525_v41  ;;  %v1416_v50 = vunpack.c.l.bf16 %v1696_v37  ;;  %v723_v51 = vmax.f32 %v659_v42, 0.0  ;;  %v597_v52 = vadd.f32 %v2054_v13, %v526_v44  ;;  %v1669_v44 = vld [vmem:[#allocation2 + $0x80] sm:$0xff]  }
  0xa4   :  { %v258_v53 = vmul.f32 %v1289_v45, %v2046_v1  ;;  %v1417_v54 = vunpack.c.h.bf16 %v1696_v37  ;;  %v328_v56 = vadd.f32 %v2050_v6, %v257_v49  ;;  %v1292_v58 = vunpack.c.l.bf16 %v1666_v46 }
  0xa5   :  { %v660_v55 = vadd.f32 %v596_v48, %v326_v40  ;;  %v527_v57 = vmul.f32 %v1416_v50, %v2048_v5  ;;  %v1547_v60 = vpack.c.bf16 %v723_v51, %v722_v47  ;;  %v661_v61 = vadd.f32 %v597_v52, %v327_v43 }
  0xa6   :  { %v329_v62 = vadd.f32 %v2050_v6, %v258_v53  ;;  %v528_v63 = vmul.f32 %v1417_v54, %v2048_v5  ;;  %v1293_v4 = vunpack.c.h.bf16 %v1666_v46  ;;  %v259_v7 = vmul.f32 %v1292_v58, %v2046_v1  ;;  %v1700_v53 = vld [vmem:[#allocation8 + $0x80] sm:$0xff]  }
  0xa7   :  { %v724_v2 = vmax.f32 %v660_v55, 0.0  ;;  %v598_v3 = vadd.f32 %v2054_v13, %v527_v57  ;;  %1725 = vst [vmem:[#allocation13 + $0x50] sm:$0xff] %v1547_v60   ;;  %v725_v8 = vmax.f32 %v661_v61, 0.0  ;;  %v1420_v10 = vunpack.c.l.bf16 %v1697_v59 }
  0xa8   :  { %v599_v9 = vadd.f32 %v2054_v13, %v528_v63  ;;  %v1421_v11 = vunpack.c.h.bf16 %v1697_v59  ;;  %v260_v14 = vmul.f32 %v1293_v4, %v2046_v1  ;;  %v330_v15 = vadd.f32 %v2050_v6, %v259_v7 }
  0xa9   :  { %v662_v12 = vadd.f32 %v598_v3, %v328_v56  ;;  %v1296_v16 = vunpack.c.l.bf16 %v1667_v0  ;;  %v1552_v18 = vpack.c.bf16 %v725_v8, %v724_v2  ;;  %v529_v20 = vmul.f32 %v1420_v10, %v2048_v5 }
  0xaa   :  { %v663_v19 = vadd.f32 %v599_v9, %v329_v62  ;;  %v530_v21 = vmul.f32 %v1421_v11, %v2048_v5  ;;  %v331_v24 = vadd.f32 %v2050_v6, %v260_v14  ;;  %v1297_v25 = vunpack.c.h.bf16 %v1667_v0  ;;  %v1670_v62 = vld [vmem:[#allocation2 + $0x88] sm:$0xff]  }
  0xab   :  { %v726_v23 = vmax.f32 %v662_v12, 0.0  ;;  %v261_v26 = vmul.f32 %v1296_v16, %v2046_v1  ;;  %1726 = vst [vmem:[#allocation13 + $0x58] sm:$0xff] %v1552_v18   ;;  %v600_v28 = vadd.f32 %v2054_v13, %v529_v20  ;;  %v1424_v30 = vunpack.c.l.bf16 %v1698_v17  ;;  %v1671_v20 = vld [vmem:[#allocation2 + $0x90] sm:$0xff]  }
  0xac   :  { %v727_v27 = vmax.f32 %v663_v19, 0.0  ;;  %v601_v29 = vadd.f32 %v2054_v13, %v530_v21  ;;  %v262_v31 = vmul.f32 %v1297_v25, %v2046_v1  ;;  %v1425_v33 = vunpack.c.h.bf16 %v1698_v17 }
  0xad   :  { %v332_v32 = vadd.f32 %v2050_v6, %v261_v26  ;;  %v1300_v34 = vunpack.c.l.bf16 %v1668_v22  ;;  %v664_v37 = vadd.f32 %v600_v28, %v330_v15  ;;  %v531_v39 = vmul.f32 %v1424_v30, %v2048_v5  ;;  %v1701_v15 = vld [vmem:[#allocation8 + $0x88] sm:$0xff]  }
  0xae   :  { %v1557_v36 = vpack.c.bf16 %v727_v27, %v726_v23  ;;  %v665_v38 = vadd.f32 %v601_v29, %v331_v24  ;;  %v333_v40 = vadd.f32 %v2050_v6, %v262_v31  ;;  %v532_v41 = vmul.f32 %v1425_v33, %v2048_v5  ;;  %v1702_v33 = vld [vmem:[#allocation8 + $0x90] sm:$0xff]  }
  0xaf   :  { %v1301_v42 = vunpack.c.h.bf16 %v1668_v22  ;;  %v263_v43 = vmul.f32 %v1300_v34, %v2046_v1  ;;  %v728_v45 = vmax.f32 %v664_v37, 0.0  ;;  %v602_v47 = vadd.f32 %v2054_v13, %v531_v39 }
  0xb0   :  { %1727 = vst [vmem:[#allocation13 + $0x60] sm:$0xff] %v1557_v36   ;;  %v729_v46 = vmax.f32 %v665_v38, 0.0  ;;  %v1428_v48 = vunpack.c.l.bf16 %v1699_v35  ;;  %v603_v49 = vadd.f32 %v2054_v13, %v532_v41  ;;  %v1429_v52 = vunpack.c.h.bf16 %v1699_v35  ;;  %v1672_v38 = vld [vmem:[#allocation2 + $0x98] sm:$0xff]  }
  0xb1   :  { %v264_v50 = vmul.f32 %v1301_v42, %v2046_v1  ;;  %v334_v51 = vadd.f32 %v2050_v6, %v263_v43  ;;  %v666_v55 = vadd.f32 %v602_v47, %v332_v32  ;;  %v1304_v57 = vunpack.c.l.bf16 %v1669_v44 }
  0xb2   :  { %v1562_v54 = vpack.c.bf16 %v729_v46, %v728_v45  ;;  %v533_v56 = vmul.f32 %v1428_v48, %v2048_v5  ;;  %v667_v58 = vadd.f32 %v603_v49, %v333_v40  ;;  %v534_v60 = vmul.f32 %v1429_v52, %v2048_v5 }
  0xb3   :  { %v335_v59 = vadd.f32 %v2050_v6, %v264_v50  ;;  %v1305_v61 = vunpack.c.h.bf16 %v1669_v44  ;;  %v730_v63 = vmax.f32 %v666_v55, 0.0  ;;  %v265_v2 = vmul.f32 %v1304_v57, %v2046_v1 }
  0xb4   :  { %1728 = vst [vmem:[#allocation13 + $0x68] sm:$0xff] %v1562_v54   ;;  %v604_v0 = vadd.f32 %v2054_v13, %v533_v56  ;;  %v1432_v3 = vunpack.c.l.bf16 %v1700_v53  ;;  %v731_v4 = vmax.f32 %v667_v58, 0.0  ;;  %v605_v7 = vadd.f32 %v2054_v13, %v534_v60  ;;  %v1673_v60 = vld [vmem:[#allocation2 + $0xa0] sm:$0xff]  }
  0xb5   :  { %v266_v8 = vmul.f32 %v1305_v61, %v2046_v1  ;;  %v1433_v9 = vunpack.c.h.bf16 %v1700_v53  ;;  %v336_v11 = vadd.f32 %v2050_v6, %v265_v2  ;;  %v1308_v14 = vunpack.c.l.bf16 %v1670_v62 }
  0xb6   :  { %v668_v10 = vadd.f32 %v604_v0, %v334_v51  ;;  %v535_v12 = vmul.f32 %v1432_v3, %v2048_v5  ;;  %v1567_v16 = vpack.c.bf16 %v731_v4, %v730_v63  ;;  %v669_v17 = vadd.f32 %v605_v7, %v335_v59  ;;  %v1703_v51 = vld [vmem:[#allocation8 + $0x98] sm:$0xff]  }
  0xb7   :  { %v337_v18 = vadd.f32 %v2050_v6, %v266_v8  ;;  %v536_v19 = vmul.f32 %v1433_v9, %v2048_v5  ;;  %v1309_v23 = vunpack.c.h.bf16 %v1670_v62  ;;  %v267_v24 = vmul.f32 %v1308_v14, %v2046_v1  ;;  %v1704_v8 = vld [vmem:[#allocation8 + $0xa0] sm:$0xff]  }
  0xb8   :  { %v732_v21 = vmax.f32 %v668_v10, 0.0  ;;  %v606_v22 = vadd.f32 %v2054_v13, %v535_v12  ;;  %1729 = vst [vmem:[#allocation13 + $0x70] sm:$0xff] %v1567_v16   ;;  %v733_v25 = vmax.f32 %v669_v17, 0.0  ;;  %v1436_v27 = vunpack.c.l.bf16 %v1701_v15 }
  0xb9   :  { %v607_v26 = vadd.f32 %v2054_v13, %v536_v19  ;;  %v1437_v28 = vunpack.c.h.bf16 %v1701_v15  ;;  %v268_v30 = vmul.f32 %v1309_v23, %v2046_v1  ;;  %v338_v31 = vadd.f32 %v2050_v6, %v267_v24 }
  0xba   :  { %v670_v29 = vadd.f32 %v606_v22, %v336_v11  ;;  %v1312_v32 = vunpack.c.l.bf16 %v1671_v20  ;;  %v1572_v34 = vpack.c.bf16 %v733_v25, %v732_v21  ;;  %v537_v36 = vmul.f32 %v1436_v27, %v2048_v5 }
  0xbb   :  { %v671_v35 = vadd.f32 %v607_v26, %v337_v18  ;;  %v538_v37 = vmul.f32 %v1437_v28, %v2048_v5  ;;  %v339_v40 = vadd.f32 %v2050_v6, %v268_v30  ;;  %v1313_v41 = vunpack.c.h.bf16 %v1671_v20  ;;  %v1674_v18 = vld [vmem:[#allocation2 + $0xa8] sm:$0xff]  }
  0xbc   :  { %v734_v39 = vmax.f32 %v670_v29, 0.0  ;;  %v269_v42 = vmul.f32 %v1312_v32, %v2046_v1  ;;  %1730 = vst [vmem:[#allocation13 + $0x78] sm:$0xff] %v1572_v34   ;;  %v608_v44 = vadd.f32 %v2054_v13, %v537_v36  ;;  %v1440_v46 = vunpack.c.l.bf16 %v1702_v33  ;;  %v1675_v36 = vld [vmem:[#allocation2 + $0xb0] sm:$0xff]  }
  0xbd   :  { %v735_v43 = vmax.f32 %v671_v35, 0.0  ;;  %v609_v45 = vadd.f32 %v2054_v13, %v538_v37  ;;  %v270_v47 = vmul.f32 %v1313_v41, %v2046_v1  ;;  %v1441_v49 = vunpack.c.h.bf16 %v1702_v33 }
  0xbe   :  { %v340_v48 = vadd.f32 %v2050_v6, %v269_v42  ;;  %v1316_v50 = vunpack.c.l.bf16 %v1672_v38  ;;  %v672_v53 = vadd.f32 %v608_v44, %v338_v31  ;;  %v539_v55 = vmul.f32 %v1440_v46, %v2048_v5  ;;  %v1705_v31 = vld [vmem:[#allocation8 + $0xa8] sm:$0xff]  }
  0xbf   :  { %v1577_v52 = vpack.c.bf16 %v735_v43, %v734_v39  ;;  %v673_v54 = vadd.f32 %v609_v45, %v339_v40  ;;  %v341_v56 = vadd.f32 %v2050_v6, %v270_v47  ;;  %v540_v57 = vmul.f32 %v1441_v49, %v2048_v5  ;;  %v1706_v49 = vld [vmem:[#allocation8 + $0xb0] sm:$0xff]  }
  0xc0   :  { %v1317_v58 = vunpack.c.h.bf16 %v1672_v38  ;;  %v271_v59 = vmul.f32 %v1316_v50, %v2046_v1  ;;  %v736_v61 = vmax.f32 %v672_v53, 0.0  ;;  %v610_v63 = vadd.f32 %v2054_v13, %v539_v55 }
  0xc1   :  { %1731 = vst [vmem:[#allocation13 + $0x80] sm:$0xff] %v1577_v52   ;;  %v737_v62 = vmax.f32 %v673_v54, 0.0  ;;  %v1444_v0 = vunpack.c.l.bf16 %v1703_v51  ;;  %v611_v2 = vadd.f32 %v2054_v13, %v540_v57  ;;  %v1445_v7 = vunpack.c.h.bf16 %v1703_v51  ;;  %v1676_v54 = vld [vmem:[#allocation2 + $0xb8] sm:$0xff]  }
  0xc2   :  { %v272_v3 = vmul.f32 %v1317_v58, %v2046_v1  ;;  %v342_v4 = vadd.f32 %v2050_v6, %v271_v59  ;;  %v674_v10 = vadd.f32 %v610_v63, %v340_v48  ;;  %v1320_v12 = vunpack.c.l.bf16 %v1673_v60 }
  0xc3   :  { %v1582_v9 = vpack.c.bf16 %v737_v62, %v736_v61  ;;  %v541_v11 = vmul.f32 %v1444_v0, %v2048_v5  ;;  %v675_v14 = vadd.f32 %v611_v2, %v341_v56  ;;  %v542_v16 = vmul.f32 %v1445_v7, %v2048_v5 }
  0xc4   :  { %v343_v15 = vadd.f32 %v2050_v6, %v272_v3  ;;  %v1321_v17 = vunpack.c.h.bf16 %v1673_v60  ;;  %v738_v19 = vmax.f32 %v674_v10, 0.0  ;;  %v273_v21 = vmul.f32 %v1320_v12, %v2046_v1 }
  0xc5   :  { %1732 = vst [vmem:[#allocation13 + $0x88] sm:$0xff] %v1582_v9   ;;  %v612_v20 = vadd.f32 %v2054_v13, %v541_v11  ;;  %v1448_v22 = vunpack.c.l.bf16 %v1704_v8  ;;  %v739_v23 = vmax.f32 %v675_v14, 0.0  ;;  %v613_v24 = vadd.f32 %v2054_v13, %v542_v16  ;;  %v1677_v16 = vld [vmem:[#allocation2 + $0xc0] sm:$0xff]  }
  0xc6   :  { %v274_v25 = vmul.f32 %v1321_v17, %v2046_v1  ;;  %v1449_v26 = vunpack.c.h.bf16 %v1704_v8  ;;  %v344_v28 = vadd.f32 %v2050_v6, %v273_v21  ;;  %v1324_v30 = vunpack.c.l.bf16 %v1674_v18 }
  0xc7   :  { %v676_v27 = vadd.f32 %v612_v20, %v342_v4  ;;  %v543_v29 = vmul.f32 %v1448_v22, %v2048_v5  ;;  %v1587_v32 = vpack.c.bf16 %v739_v23, %v738_v19  ;;  %v677_v33 = vadd.f32 %v613_v24, %v343_v15  ;;  %v1707_v4 = vld [vmem:[#allocation8 + $0xb8] sm:$0xff]  }
  0xc8   :  { %v345_v34 = vadd.f32 %v2050_v6, %v274_v25  ;;  %v544_v35 = vmul.f32 %v1449_v26, %v2048_v5  ;;  %v1325_v39 = vunpack.c.h.bf16 %v1674_v18  ;;  %v275_v40 = vmul.f32 %v1324_v30, %v2046_v1  ;;  %v1708_v25 = vld [vmem:[#allocation8 + $0xc0] sm:$0xff]  }
  0xc9   :  { %v740_v37 = vmax.f32 %v676_v27, 0.0  ;;  %v614_v38 = vadd.f32 %v2054_v13, %v543_v29  ;;  %1733 = vst [vmem:[#allocation13 + $0x90] sm:$0xff] %v1587_v32   ;;  %v741_v41 = vmax.f32 %v677_v33, 0.0  ;;  %v1452_v43 = vunpack.c.l.bf16 %v1705_v31 }
  0xca   :  { %v615_v42 = vadd.f32 %v2054_v13, %v544_v35  ;;  %v1453_v44 = vunpack.c.h.bf16 %v1705_v31  ;;  %v276_v46 = vmul.f32 %v1325_v39, %v2046_v1  ;;  %v346_v47 = vadd.f32 %v2050_v6, %v275_v40 }
  0xcb   :  { %v678_v45 = vadd.f32 %v614_v38, %v344_v28  ;;  %v1328_v48 = vunpack.c.l.bf16 %v1675_v36  ;;  %v1592_v50 = vpack.c.bf16 %v741_v41, %v740_v37  ;;  %v545_v52 = vmul.f32 %v1452_v43, %v2048_v5 }
  0xcc   :  { %v679_v51 = vadd.f32 %v615_v42, %v345_v34  ;;  %v546_v53 = vmul.f32 %v1453_v44, %v2048_v5  ;;  %v347_v56 = vadd.f32 %v2050_v6, %v276_v46  ;;  %v1329_v57 = vunpack.c.h.bf16 %v1675_v36  ;;  %v1678_v34 = vld [vmem:[#allocation2 + $0xc8] sm:$0xff]  }
  0xcd   :  { %v742_v55 = vmax.f32 %v678_v45, 0.0  ;;  %v277_v58 = vmul.f32 %v1328_v48, %v2046_v1  ;;  %1734 = vst [vmem:[#allocation13 + $0x98] sm:$0xff] %v1592_v50   ;;  %v616_v60 = vadd.f32 %v2054_v13, %v545_v52  ;;  %v1456_v62 = vunpack.c.l.bf16 %v1706_v49  ;;  %v1679_v52 = vld [vmem:[#allocation2 + $0xd0] sm:$0xff]  }
  0xce   :  { %v743_v59 = vmax.f32 %v679_v51, 0.0  ;;  %v617_v61 = vadd.f32 %v2054_v13, %v546_v53  ;;  %v278_v63 = vmul.f32 %v1329_v57, %v2046_v1  ;;  %v1457_v2 = vunpack.c.h.bf16 %v1706_v49 }
  0xcf   :  { %v348_v0 = vadd.f32 %v2050_v6, %v277_v58  ;;  %v1332_v3 = vunpack.c.l.bf16 %v1676_v54  ;;  %v680_v8 = vadd.f32 %v616_v60, %v346_v47  ;;  %v547_v10 = vmul.f32 %v1456_v62, %v2048_v5  ;;  %v1709_v47 = vld [vmem:[#allocation8 + $0xc8] sm:$0xff]  }
  0xd0   :  { %v1597_v7 = vpack.c.bf16 %v743_v59, %v742_v55  ;;  %v681_v9 = vadd.f32 %v617_v61, %v347_v56  ;;  %v349_v11 = vadd.f32 %v2050_v6, %v278_v63  ;;  %v548_v12 = vmul.f32 %v1457_v2, %v2048_v5  ;;  %v1710_v2 = vld [vmem:[#allocation8 + $0xd0] sm:$0xff]  }
  0xd1   :  { %v1333_v14 = vunpack.c.h.bf16 %v1676_v54  ;;  %v279_v15 = vmul.f32 %v1332_v3, %v2046_v1  ;;  %v744_v17 = vmax.f32 %v680_v8, 0.0  ;;  %v618_v19 = vadd.f32 %v2054_v13, %v547_v10 }
  0xd2   :  { %1735 = vst [vmem:[#allocation13 + $0xa0] sm:$0xff] %v1597_v7   ;;  %v745_v18 = vmax.f32 %v681_v9, 0.0  ;;  %v1460_v20 = vunpack.c.l.bf16 %v1707_v4  ;;  %v619_v21 = vadd.f32 %v2054_v13, %v548_v12  ;;  %v1461_v24 = vunpack.c.h.bf16 %v1707_v4  ;;  %v1680_v9 = vld [vmem:[#allocation2 + $0xd8] sm:$0xff]  }
  0xd3   :  { %v280_v22 = vmul.f32 %v1333_v14, %v2046_v1  ;;  %v350_v23 = vadd.f32 %v2050_v6, %v279_v15  ;;  %v682_v27 = vadd.f32 %v618_v19, %v348_v0  ;;  %v1336_v29 = vunpack.c.l.bf16 %v1677_v16  ;;  %v2260_v14 = vld [vmem:[#allocation5] ss:$0 sm:$0xff] }
  0xd4   :  { %v1602_v26 = vpack.c.bf16 %v745_v18, %v744_v17  ;;  %v549_v28 = vmul.f32 %v1460_v20, %v2048_v5  ;;  %v683_v30 = vadd.f32 %v619_v21, %v349_v11  ;;  %v550_v32 = vmul.f32 %v1461_v24, %v2048_v5  ;;  %v2266_v20 = vld [vmem:[#allocation7] ss:$0 sm:$0xff] }
  0xd5   :  { %v351_v31 = vadd.f32 %v2050_v6, %v280_v22  ;;  %v1337_v33 = vunpack.c.h.bf16 %v1677_v16  ;;  %v746_v35 = vmax.f32 %v682_v27, 0.0  ;;  %v281_v37 = vmul.f32 %v1336_v29, %v2046_v1  ;;  %v1711_v22 = vld [vmem:[#allocation8 + $0xd8] sm:$0xff]  }
  0xd6   :  { %1736 = vst [vmem:[#allocation13 + $0xa8] sm:$0xff] %v1602_v26   ;;  %v620_v36 = vadd.f32 %v2054_v13, %v549_v28  ;;  %v1464_v38 = vunpack.c.l.bf16 %v1708_v25  ;;  %v747_v39 = vmax.f32 %v683_v30, 0.0  ;;  %v621_v40 = vadd.f32 %v2054_v13, %v550_v32  ;;  %v2269_v26 = vld [vmem:[#allocation10] ss:$0 sm:$0xff] }
  0xd7   :  { %v282_v41 = vmul.f32 %v1337_v33, %v2046_v1  ;;  %v1465_v42 = vunpack.c.h.bf16 %v1708_v25  ;;  %v352_v44 = vadd.f32 %v2050_v6, %v281_v37  ;;  %v1340_v46 = vunpack.c.l.bf16 %v1678_v34 }
  0xd8   :  { %v684_v43 = vadd.f32 %v620_v36, %v350_v23  ;;  %v551_v45 = vmul.f32 %v1464_v38, %v2048_v5  ;;  %v1607_v48 = vpack.c.bf16 %v747_v39, %v746_v35  ;;  %v685_v49 = vadd.f32 %v621_v40, %v351_v31  ;;  %v1681_v31 = vld [vmem:[#allocation2 + $0xe0] sm:$0xff]  }
  0xd9   :  { %v353_v50 = vadd.f32 %v2050_v6, %v282_v41  ;;  %v552_v51 = vmul.f32 %v1465_v42, %v2048_v5  ;;  %v1341_v55 = vunpack.c.h.bf16 %v1678_v34  ;;  %v283_v56 = vmul.f32 %v1340_v46, %v2046_v1  ;;  %v2275_v34 = vld [vmem:[#allocation11] ss:$0 sm:$0xff] }
  0xda   :  { %v748_v53 = vmax.f32 %v684_v43, 0.0  ;;  %v622_v54 = vadd.f32 %v2054_v13, %v551_v45  ;;  %1737 = vst [vmem:[#allocation13 + $0xb0] sm:$0xff] %v1607_v48   ;;  %v749_v57 = vmax.f32 %v685_v49, 0.0  ;;  %v1468_v59 = vunpack.c.l.bf16 %v1709_v47  ;;  %v1712_v41 = vld [vmem:[#allocation8 + $0xe0] sm:$0xff]  }
  0xdb   :  { %v623_v58 = vadd.f32 %v2054_v13, %v552_v51  ;;  %v1469_v60 = vunpack.c.h.bf16 %v1709_v47  ;;  %v284_v62 = vmul.f32 %v1341_v55, %v2046_v1  ;;  %v354_v63 = vadd.f32 %v2050_v6, %v283_v56 }
  0xdc   :  { %v686_v61 = vadd.f32 %v622_v54, %v352_v44  ;;  %v1344_v0 = vunpack.c.l.bf16 %v1679_v52  ;;  %v1612_v3 = vpack.c.bf16 %v749_v57, %v748_v53  ;;  %v553_v7 = vmul.f32 %v1468_v59, %v2048_v5 }
  0xdd   :  { %v687_v4 = vadd.f32 %v623_v58, %v353_v50  ;;  %v554_v8 = vmul.f32 %v1469_v60, %v2048_v5  ;;  %v355_v11 = vadd.f32 %v2050_v6, %v284_v62  ;;  %v1345_v12 = vunpack.c.h.bf16 %v1679_v52  ;;  %v1682_v50 = vld [vmem:[#allocation2 + $0xe8] sm:$0xff]  }
  0xde   :  { %v750_v10 = vmax.f32 %v686_v61, 0.0  ;;  %v285_v15 = vmul.f32 %v2260_v14, %v1344_v0  ;;  %1738 = vst [vmem:[#allocation13 + $0xb8] sm:$0xff] %v1612_v3   ;;  %v624_v16 = vadd.f32 %v2054_v13, %v553_v7  ;;  %v1472_v18 = vunpack.c.l.bf16 %v1710_v2  ;;  %v1683_v7 = vld [vmem:[#allocation2 + $0xf0] sm:$0xff]  }
  0xdf   :  { %v751_v1 = vmax.f32 %v687_v4, 0.0  ;;  %v625_v17 = vadd.f32 %v2054_v13, %v554_v8  ;;  %v286_v19 = vmul.f32 %v2260_v14, %v1345_v12  ;;  %v1473_v21 = vunpack.c.h.bf16 %v1710_v2 }
  0xe0   :  { %v356_v5 = vadd.f32 %v2266_v20, %v285_v15  ;;  %v1348_v6 = vunpack.c.l.bf16 %v1680_v9  ;;  %v688_v24 = vadd.f32 %v624_v16, %v354_v63  ;;  %v555_v27 = vmul.f32 %v2269_v26, %v1472_v18  ;;  %v1713_v63 = vld [vmem:[#allocation8 + $0xe8] sm:$0xff]  }
  0xe1   :  { %v1617_v23 = vpack.c.bf16 %v751_v1, %v750_v10  ;;  %v689_v25 = vadd.f32 %v625_v17, %v355_v11  ;;  %v357_v28 = vadd.f32 %v2266_v20, %v286_v19  ;;  %v556_v13 = vmul.f32 %v2269_v26, %v1473_v21  ;;  %v1714_v21 = vld [vmem:[#allocation8 + $0xf0] sm:$0xff]  }
  0xe2   :  { %v1349_v29 = vunpack.c.h.bf16 %v1680_v9  ;;  %v287_v30 = vmul.f32 %v2260_v14, %v1348_v6  ;;  %v752_v32 = vmax.f32 %v688_v24, 0.0  ;;  %v626_v35 = vadd.f32 %v2275_v34, %v555_v27 }
  0xe3   :  { %1739 = vst [vmem:[#allocation13 + $0xc0] sm:$0xff] %v1617_v23   ;;  %v753_v33 = vmax.f32 %v689_v25, 0.0  ;;  %v1476_v36 = vunpack.c.l.bf16 %v1711_v22  ;;  %v627_v37 = vadd.f32 %v2275_v34, %v556_v13  ;;  %v1477_v40 = vunpack.c.h.bf16 %v1711_v22  ;;  %v1684_v25 = vld [vmem:[#allocation2 + $0xf8] sm:$0xff]  }
  0xe4   :  { %v288_v38 = vmul.f32 %v2260_v14, %v1349_v29  ;;  %v358_v39 = vadd.f32 %v2266_v20, %v287_v30  ;;  %v690_v43 = vadd.f32 %v626_v35, %v356_v5  ;;  %v1352_v45 = vunpack.c.l.bf16 %v1681_v31 }
  0xe5   :  { %v1622_v42 = vpack.c.bf16 %v753_v33, %v752_v32  ;;  %v557_v44 = vmul.f32 %v2269_v26, %v1476_v36  ;;  %v691_v46 = vadd.f32 %v627_v37, %v357_v28  ;;  %v558_v48 = vmul.f32 %v2269_v26, %v1477_v40 }
  0xe6   :  { %v359_v47 = vadd.f32 %v2266_v20, %v288_v38  ;;  %v1353_v49 = vunpack.c.h.bf16 %v1681_v31  ;;  %v754_v51 = vmax.f32 %v690_v43, 0.0  ;;  %v289_v53 = vmul.f32 %v2260_v14, %v1352_v45 }
  0xe7   :  { %1740 = vst [vmem:[#allocation13 + $0xc8] sm:$0xff] %v1622_v42   ;;  %v628_v52 = vadd.f32 %v2275_v34, %v557_v44  ;;  %v1480_v54 = vunpack.c.l.bf16 %v1712_v41  ;;  %v755_v55 = vmax.f32 %v691_v46, 0.0  ;;  %v629_v56 = vadd.f32 %v2275_v34, %v558_v48 }
  0xe8   :  { %v290_v57 = vmul.f32 %v2260_v14, %v1353_v49  ;;  %v1481_v58 = vunpack.c.h.bf16 %v1712_v41  ;;  %v360_v60 = vadd.f32 %v2266_v20, %v289_v53  ;;  %v1356_v62 = vunpack.c.l.bf16 %v1682_v50 }
  0xe9   :  { %v692_v59 = vadd.f32 %v628_v52, %v358_v39  ;;  %v559_v61 = vmul.f32 %v2269_v26, %v1480_v54  ;;  %v1627_v0 = vpack.c.bf16 %v755_v55, %v754_v51  ;;  %v693_v2 = vadd.f32 %v629_v56, %v359_v47  ;;  %v1715_v39 = vld [vmem:[#allocation8 + $0xf8] sm:$0xff]  }
  0xea   :  { %v361_v3 = vadd.f32 %v2266_v20, %v290_v57  ;;  %v560_v4 = vmul.f32 %v2269_v26, %v1481_v58  ;;  %v1357_v10 = vunpack.c.h.bf16 %v1682_v50  ;;  %v291_v11 = vmul.f32 %v2260_v14, %v1356_v62 }
  0xeb   :  { %v756_v8 = vmax.f32 %v692_v59, 0.0  ;;  %v630_v9 = vadd.f32 %v2275_v34, %v559_v61  ;;  %1741 = vst [vmem:[#allocation13 + $0xd0] sm:$0xff] %v1627_v0   ;;  %v757_v12 = vmax.f32 %v693_v2, 0.0  ;;  %v1484_v1 = vunpack.c.l.bf16 %v1713_v63 }
  0xec   :  { %v631_v15 = vadd.f32 %v2275_v34, %v560_v4  ;;  %v1485_v16 = vunpack.c.h.bf16 %v1713_v63  ;;  %v292_v18 = vmul.f32 %v2260_v14, %v1357_v10  ;;  %v362_v19 = vadd.f32 %v2266_v20, %v291_v11 }
  0xed   :  { %v694_v17 = vadd.f32 %v630_v9, %v360_v60  ;;  %v1360_v5 = vunpack.c.l.bf16 %v1683_v7  ;;  %v1632_v6 = vpack.c.bf16 %v757_v12, %v756_v8  ;;  %v561_v23 = vmul.f32 %v2269_v26, %v1484_v1 }
  0xee   :  { %v695_v22 = vadd.f32 %v631_v15, %v361_v3  ;;  %v562_v24 = vmul.f32 %v2269_v26, %v1485_v16  ;;  %v363_v28 = vadd.f32 %v2266_v20, %v292_v18  ;;  %v1361_v13 = vunpack.c.h.bf16 %v1683_v7 }
  0xef   :  { %v758_v27 = vmax.f32 %v694_v17, 0.0  ;;  %v293_v29 = vmul.f32 %v2260_v14, %v1360_v5  ;;  %1742 = vst [vmem:[#allocation13 + $0xd8] sm:$0xff] %v1632_v6   ;;  %v632_v31 = vadd.f32 %v2275_v34, %v561_v23  ;;  %v1488_v33 = vunpack.c.l.bf16 %v1714_v21 }
  0xf0   :  { %v759_v30 = vmax.f32 %v695_v22, 0.0  ;;  %v633_v32 = vadd.f32 %v2275_v34, %v562_v24  ;;  %v294_v35 = vmul.f32 %v2260_v14, %v1361_v13  ;;  %v1489_v37 = vunpack.c.h.bf16 %v1714_v21 }
  0xf1   :  { %v364_v36 = vadd.f32 %v2266_v20, %v293_v29  ;;  %v1364_v38 = vunpack.c.l.bf16 %v1684_v25  ;;  %v696_v41 = vadd.f32 %v632_v31, %v362_v19  ;;  %v563_v43 = vmul.f32 %v2269_v26, %v1488_v33 }
  0xf2   :  { %v1637_v40 = vpack.c.bf16 %v759_v30, %v758_v27  ;;  %v697_v42 = vadd.f32 %v633_v32, %v363_v28  ;;  %v365_v44 = vadd.f32 %v2266_v20, %v294_v35  ;;  %v564_v45 = vmul.f32 %v2269_v26, %v1489_v37 }
  0xf3   :  { %v1365_v46 = vunpack.c.h.bf16 %v1684_v25  ;;  %v295_v47 = vmul.f32 %v2260_v14, %v1364_v38  ;;  %v760_v48 = vmax.f32 %v696_v41, 0.0  ;;  %v634_v50 = vadd.f32 %v2275_v34, %v563_v43 }
  0xf4   :  { %1743 = vst [vmem:[#allocation13 + $0xe0] sm:$0xff] %v1637_v40   ;;  %v761_v49 = vmax.f32 %v697_v42, 0.0  ;;  %v1492_v51 = vunpack.c.l.bf16 %v1715_v39  ;;  %v635_v52 = vadd.f32 %v2275_v34, %v564_v45  ;;  %v1493_v54 = vunpack.c.h.bf16 %v1715_v39 }
  0xf5   :  { %v296_v53 = vmul.f32 %v2260_v14, %v1365_v46  ;;  %v698_v56 = vadd.f32 %v634_v50, %v364_v36  ;;  %v366_v57 = vadd.f32 %v2266_v20, %v295_v47 }
  0xf6   :  { %v1642_v55 = vpack.c.bf16 %v761_v49, %v760_v48  ;;  %v565_v58 = vmul.f32 %v2269_v26, %v1492_v51  ;;  %v699_v59 = vadd.f32 %v635_v52, %v365_v44  ;;  %v566_v61 = vmul.f32 %v2269_v26, %v1493_v54 }
  0xf7   :  { %v367_v60 = vadd.f32 %v2266_v20, %v296_v53  ;;  %v762_v62 = vmax.f32 %v698_v56, 0.0 }
  0xf8   :  { %1744 = vst [vmem:[#allocation13 + $0xe8] sm:$0xff] %v1642_v55   ;;  %v636_v63 = vadd.f32 %v2275_v34, %v565_v58  ;;  %v763_v0 = vmax.f32 %v699_v59, 0.0  ;;  %v637_v2 = vadd.f32 %v2275_v34, %v566_v61 }
  0xfa   :  { %v700_v14 = vadd.f32 %v636_v63, %v366_v57  ;;  %v1647_v3 = vpack.c.bf16 %v763_v0, %v762_v62  ;;  %v701_v4 = vadd.f32 %v637_v2, %v367_v60 }
  0xfc   :  { %v764_v7 = vmax.f32 %v700_v14, 0.0  ;;  %1745 = vst [vmem:[#allocation13 + $0xf0] sm:$0xff] %v1647_v3   ;;  %v765_v8 = vmax.f32 %v701_v4, 0.0 }
  0xfe   :  { %v1652_v9 = vpack.c.bf16 %v765_v8, %v764_v7 }
 0x100   :  { %1746 = vst [vmem:[#allocation13 + $0xf8] sm:$0xff] %v1652_v9  }
 0x101   :  { %1903 = shalt.err (!%p1900_p10)
}
 0x102   :  { %s1904_s26 = scalar_lea.hbm %s2339_s6, 4096 }
 0x103   :  { %p1905_p11 = scmp.ne.s32.totalorder %s2339_s6, %s1904_s26  ;;  %p1908_p12 = scmp.lt.u32.totalorder %s1904_s26, %s2339_s6 }
 0x105   :  { %p1910_p13 = pnand %p1908_p12, %p1905_p11 }
 0x107   :  { %1913 = shalt.err (!%p1910_p13)
}
 0x108   :  { %1097 = dma.vmem_to_hbm [thread:$0]  %s1092_s13, 4096, %s2339_s6, [#allocation4], %s1927_s21, %s1927_s21, %s1928_s22  }
 0x109   :  { %1922 = dma.done.wait [#allocation4], 4096  }
 0x10a   :  { %1923 = vsyncadd [#allocation4], 4294963200 }
 0x10b   :  { %1101 = vsyncpa [#allocation3], 1 }
 0x10c   :  { %1102 = vsyncpa [#allocation6], 1 }
 0x10d   :  { %1103 = vsyncpa [#allocation9], 1 }
 0x10e   :  { %1104 = vsyncpa [#allocation12], 1 }
 0x10f   :  { %1105 = vsyncpa [#allocation4], 1 }

// kernel: resblock_forward.5
= control target key start
LH: loop header
LB: loop body
LE: loop exit
PB: predicated region body
PF: predicated region fallthrough
CT: control target
= control target key end

     0   :  { %9 = vsyncpa [#allocation3], 0  ;;  %s7934_s0 = inlined_call_operand.hbm [shape: bf16[2,326,128], index: 0, kind: input, shape index: {}]   ;;  %s7935_s1 = inlined_call_operand.hbm [shape: bf16[1152,128], index: 1, kind: input, shape index: {}]   ;;  %s7936_s2 = inlined_call_operand.hbm [shape: bf16[2,256,128], index: 2, kind: output, shape index: {0}]   ;;  %s7937_s3 = inlined_call_operand.hbm [shape: f32[2,8,128], index: 3, kind: output, shape index: {1}]  }
   0x1   :  { %11 = vsyncpa [#allocation3 + $0x1], 0 }
   0x2   :  { %12 = vsyncpa [#allocation6], 0 }
   0x3   :  { %13 = vsyncpa [#allocation4], 0 }
   0x4   :  { %15 = vsyncpa [#allocation4 + $0x1], 0 }
   0x5   :  { %16 = vsyncpa [#allocation9], 0 }
   0x6   :  { %18 = vsyncpa [#allocation9 + $0x1], 0  ;;  %s6574_s12 = smov 0   ;;  %s6576_s13 = smov 0  }
   0x7   :  { %s6578_s14 = smov 0   ;;  %s6580_s15 = smov 0  }
   0x8 LB: > { %s6595_s16 = sadd.s32 4294967295, %s6544_s15   ;;  %s4857_s17 = sadd.s32 4294967294, %s6544_s15   ;;  %s6544_s15 = sphi %s6580_s15, %s7963_s15   ;;  %s6540_s14 = sphi %s6578_s14, %s7962_s14   ;;  %s6536_s13 = sphi %s6576_s13, %s7961_s13   ;;  %s6532_s12 = sphi %s6574_s12, %s7960_s12  }
   0x9   : > { %p44_p0 = scmp.ne.s32.totalorder %s6536_s13, %s6532_s12  ;;  %p7938_p1 = scmp.eq.s32.totalorder %s6595_s16, 0 }
   0xa   : > { %p95_p3 = scmp.eq.s32.totalorder %s4857_s17, 1  ;;  %p4858_p5 = scmp.ge.s32.totalorder %s6544_s15, 1 }
   0xb   : > { %p6604_p4 = por %p7938_p1, %p44_p0  ;;  %p128_p7 = scmp.lt.s32.totalorder %s6544_s15, 3 }
   0xc   : > { %p6609_p6 = por %p95_p3, %p44_p0  ;;  %s6546_s21 = smov [#allocation5]  }
   0xd   : > { %s7941_s18 = scalar_select %p6604_p4, 1, 0 }
   0xe   : > { %s7942_s19 = scalar_select %p6609_p6, 1, 0 }
   0xf   : > { %p6614_p8 = pnand %p4858_p5, %p128_p7  ;;  %s140_s22 = sshll.u32 %s6546_s21, 4  ;;  %s6618_s22 = int_to_ptr.vmem [resolvable:$true] %s140_s22 }
  0x10   : > { %s6630_s24 = sadd.s32 1, %s6544_s15   ;;  %s31_s25 = sadd.s32 1, %s6540_s14 }
  0x11   : > { %s7943_s20 = scalar_select %p6614_p8, 1, 0 }
  0x12   : > { %p6150_p9 = pneg %p6614_p8  ;;  %s28_s26 = ssub.s32 %s6544_s15, %s6630_s24 }
  0x13   : > { %s6384_s29 = scalar_lea.hbm %s7935_s1, 9216 }
  0x14   : > { %p6625_p11 = pnand %p6150_p9, %p7938_p1  ;;  %p6385_p12 = scmp.ne.s32.totalorder %s7935_s1, %s6384_s29 }
  0x15   : > { %p6391_p5 = scmp.lt.u32.totalorder %s6384_s29, %s7935_s1 }
  0x16   : > { %p6386_p13 = pneg %p6625_p11 }
  0x18   : > { %p6387_p0 = pnand %p6386_p13, %p6385_p12 }
  0x1a   : > { %p6388_p3 = pneg %p6387_p0 }
  0x1c   : > { %p6393_p7 = pnand %p6391_p5, %p6388_p3 }
  0x1e   : > { %6396 = shalt.err (!%p6393_p7)
}
  0x1f   : > { %s6397_s7 = scalar_lea.vmem %s6618_s22, 9216  ;;  %p6405_p2 = scmp.lt.s32.totalorder %s6618_s22, %s6618_s22 }
  0x20   : > { %p6398_p9 = scmp.ne.s32.totalorder %s6618_s22, %s6397_s7  ;;  %p6406_p6 = scmp.lt.s32.totalorder %s6397_s7, %s6397_s7 }
  0x22   : > { %p6400_p10 = pnand %p6398_p9, %p6386_p13  ;;  %p6407_p4 = por %p6406_p6, %p6405_p2 }
  0x24   : > { %p6401_p1 = pneg %p6400_p10 }
  0x26   : > { %p6408_p8 = pnand %p6407_p4, %p6401_p1 }
  0x28   : > { %6411 = shalt.err (!%p6408_p8)
}
  0x29   : > { %s6547_s8 = smov 64   ;;  %s6548_s9 = smov 4  }
  0x2a   : > { %6153 = dma.hbm_to_vmem [thread:$0]  (!%p6625_p11), %s7935_s1, 9216, %s6618_s22, [#allocation6], %s6547_s8, %s6547_s8, %s6548_s9  }
  0x2b   : > { %p29_p1 = scmp.eq.s32.totalorder %s28_s26, 0  ;;  %p38_p2 = scmp.ne.s32.totalorder %s6540_s14, %s6536_s13 }
  0x2c   : > { %p39_p4 = scmp.eq.s32.totalorder %s6544_s15, 0  ;;  %p6166_p6 = scmp.lt.s32.totalorder %s6544_s15, 2 }
  0x2d   : > { %s6664_s17 = scalar_select %p29_p1, %s6540_s14, %s31_s25  }
  0x2e   : > { %p40_p8 = por %p39_p4, %p38_p2  ;;  %p7945_p10 = scmp.eq.s32.totalorder %s6595_s16, 1 }
  0x2f   : > { %s154_s23 = sand.u32 1, %s6540_s14   ;;  %s6138_s27 = smul.u32 2624, %s6544_s15 }
  0x30   : > { %p6668_p12 = por %p7945_p10, %p38_p2  ;;  %s6137_s28 = smul.u32 164, %s154_s23 }
  0x31   : > { %p6674_p13 = pnand %p6166_p6, %p40_p8  ;;  %s6681_s25 = scalar_lea.hbm %s7934_s0, %s6138_s27 }
  0x32   : > { %s158_s30 = scalar_lea.vmem [#allocation2], %s6137_s28  ;;  %s6685_s5 = scalar_lea.sflag [#allocation3], %s154_s23 }
  0x33   : > { %s165_s4 = sshll.u32 %s158_s30, 4  ;;  %s6412_s6 = scalar_lea.hbm %s6681_s25, 2624  ;;  %s6683_s4 = int_to_ptr.vmem [resolvable:$true] %s165_s4 }
  0x34   : > { %p6413_p11 = scmp.ne.s32.totalorder %s6681_s25, %s6412_s6  ;;  %p6414_p0 = pneg %p6674_p13 }
  0x35   : > { %s6417_s11 = scalar_lea.hbm %s7934_s0, 5248  ;;  %p6418_p7 = scmp.lt.u32.totalorder %s6681_s25, %s7934_s0 }
  0x36   : > { %p6415_p3 = pnand %p6414_p0, %p6413_p11  ;;  %p6419_p9 = scmp.lt.u32.totalorder %s6417_s11, %s6412_s6 }
  0x37   : > { %p6421_p2 = scmp.lt.u32.totalorder %s6412_s6, %s6681_s25 }
  0x38   : > { %p6416_p5 = pneg %p6415_p3  ;;  %p6420_p1 = por %p6419_p9, %p6418_p7 }
  0x3a   : > { %p6422_p4 = por %p6421_p2, %p6420_p1 }
  0x3c   : > { %p6423_p6 = pnand %p6422_p4, %p6416_p5 }
  0x3e   : > { %6426 = shalt.err (!%p6423_p6)
}
  0x3f   : > { %s6427_s23 = scalar_lea.vmem %s6683_s4, 2624  ;;  %s6549_s28 = smov [#allocation2]  }
  0x40   : > { %p6428_p8 = scmp.ne.s32.totalorder %s6683_s4, %s6427_s23  ;;  %s6432_s26 = sshll.u32 %s6549_s28, 4  ;;  %s6433_s26 = int_to_ptr.vmem [resolvable:$false] %s6432_s26 }
  0x41   : > { %s6434_s30 = scalar_lea.vmem %s6433_s26, 5248  ;;  %p6435_p3 = scmp.lt.s32.totalorder %s6683_s4, %s6433_s26 }
  0x42   : > { %p6430_p10 = pnand %p6428_p8, %p6414_p0  ;;  %p6436_p7 = scmp.lt.s32.totalorder %s6434_s30, %s6427_s23 }
  0x44   : > { %p6431_p11 = pneg %p6430_p10  ;;  %p6437_p9 = por %p6436_p7, %p6435_p3 }
  0x46   : > { %p6438_p1 = pnand %p6437_p9, %p6431_p11 }
  0x48   : > { %6441 = shalt.err (!%p6438_p1)
}
  0x49   : > { %6157 = dma.hbm_to_vmem [thread:$0]  (!%p6674_p13), %s6681_s25, 2624, %s6683_s4, %s6685_s5, %s6547_s8, %s6547_s8, %s6548_s9  }
  0x4a   : > { %p7948_p0 = scmp.ne.s32.totalorder %s7943_s20, 0 }
  0x4b   : > { %s6719_s6 = sand.u32 (!%p7948_p0), 1, %s6536_s13   ;;  %p7949_p5 = scmp.ne.s32.totalorder (!%p7948_p0), %s7941_s18, 0 }
  0x4c   : > { %177 = sbr.rel (%p7948_p0) target bundleno = 757 (0x2f5), region = 28  ;;  %s180_s10 = scalar_lea.sflag (!%p7948_p0), [#allocation3], %s6719_s6 }
  0x4d   : > { %s6139_s7 = smul.u32 (!%p7948_p0), 164, %s6719_s6 }
  0x4f   : > { %s6723_s11 = scalar_lea.vmem (!%p7948_p0), [#allocation2], %s6139_s7 }
  0x53   : > { %6515 = dma.done.wait (%p7949_p5), %s180_s10, 2624  }
  0x54   : > { %6517 = vsyncadd (%p7949_p5), %s180_s10, 4294964672  ;;  %p7950_p13 = scmp.eq.s32.totalorder %s6595_s16, 0 }
  0x56   : > { %6519 = dma.done.wait (%p7950_p13), [#allocation6], 9216   ;;  %p7951_p2 = pmov %p7950_p13 }
  0x57   : > { %v6206_v0 = vld [vmem:[#allocation5 + $0x40] sm:$0xff]   ;;  %v6208_v2 = vld [vmem:[#allocation5 + $0x48] sm:$0xff]   ;;  %v6210_v4 = vld [vmem:[#allocation5 + $0x50] sm:$0xff]   ;;  %vm378_vm0 = vsmask.f32 7424  ;;  %vm2302_vm2 = vcmask 1045504  }
  0x58   : > { %6521 = vsyncadd (%p7951_p2), [#allocation6], 4294958080  ;;  %v6207_v1 = vld [vmem:[#allocation5 + $0x100] sm:$0xff]   ;;  %5365 = vmatprep.subr.bf16.mxu1 %v6206_v0  ;;  %v6209_v3 = vld [vmem:[#allocation5 + $0x108] sm:$0xff]   ;;  %vm1832_vm1 = vsmask.f32 6400 }
  0x59   : > { %5573 = vmatprep.subr.bf16.mxu0 %v6207_v1  ;;  %5366 = vmatpush3.bf16.msra.mxu1 %v6206_v0  ;;  %v6211_v5 = vld [vmem:[#allocation5 + $0x110] sm:$0xff]   ;;  %v6212_v6 = vld [vmem:[#allocation5 + $0x58] sm:$0xff]   ;;  %v6214_v8 = vld [vmem:[#allocation5 + $0x60] sm:$0xff]   ;;  %vm1033_vm3 = vcmask 1046528   ;;  %vm3101_vm4 = vsmask.f32 5376 }
  0x5a   : > { %5574 = vmatpush3.bf16.msra.mxu0 %v6207_v1  ;;  %5367 = vmatprep.subr.bf16.mxu1 %v6208_v2  ;;  %v6213_v7 = vld [vmem:[#allocation5 + $0x118] sm:$0xff]   ;;  %v6215_v9 = vld [vmem:[#allocation5 + $0x120] sm:$0xff]   ;;  %v6216_v10 = vld [vmem:[#allocation5 + $0x68] sm:$0xff]   ;;  %vm3571_vm5 = vcmask 1044480   ;;  %s4864_s18 = sshll.u32 %s6719_s6, 7  ;;  %vm3926_vm6 = vcmask 1042432  }
  0x5b   : > { %5575 = vmatprep.subr.bf16.mxu0 %v6209_v3  ;;  %v6217_v11 = vld [vmem:[#allocation5 + $0x128] sm:$0xff]   ;;  %v216_v12 = vld [vmem:[%s6723_s11] sm:$0xf]  ;;  %v217_v13 = vld [vmem:[%s6723_s11 + $0x4] sm:$0xf]  ;;  %vm3927_vm7 = vcmask 1046532  }
  0x5c   : > { %v6735_v14 = vcombine.low %v216_v12, %v217_v13  ;;  %v6738_v15 = vld [vmem:[%s6723_s11 + $0x8] sm:$0xff]   ;;  %v6218_v17 = vld [vmem:[#allocation5 + $0x70] sm:$0xff]   ;;  %v6220_v34 = vld [vmem:[#allocation5 + $0x78] sm:$0xff]   ;;  %s7342_s20 = scalar_lea.vmem [#allocation7], %s4864_s18  ;;  %vm4051_vm9 = vcmask 1040384   ;;  %vm4052_vm10 = vcmask 1044484  }
  0x5d   : > { %5368 = vmatpush3.bf16.msra.mxu1 %v6208_v2  ;;  %v1350_v16 = vld [vmem:[%s6723_s11 + $0x8] sm:$0xe]  ;;  %v6742_v18 = vld [vmem:[%s6723_s11 + $0xc] sm:$0xf]  ;;  %v6219_v19 = vld [vmem:[#allocation5 + $0x130] sm:$0xff]   ;;  %v387_v22 = vshll.u32 %v6738_v15, 16 }
  0x5e   : > { %5576 = vmatpush3.bf16.msra.mxu0 %v6209_v3  ;;  %5369 = vmatprep.subr.bf16.mxu1 %v6210_v4  ;;  %v380_v20 = vshrl.u32 %v6735_v14, 16  ;;  %v382_v21 = vshll.u32 %v6735_v14, 16  ;;  %v6748_v23 = vcombine.low %v1350_v16, %v6742_v18  ;;  %v6751_v24 = vld [vmem:[%s6723_s11 + $0x10] sm:$0xff]   ;;  %v391_v32 = vshrl.u32 %v6738_v15, 16  ;;  %v6763_v38 = vld [vmem:[%s6723_s11 + $0x18] sm:$0xff]   ;;  %v6227_v49 = vld [vmem:[#allocation5] sm:$0xff]  }
  0x5f   : > { %5577 = vmatprep.subr.bf16.mxu0 %v6211_v5  ;;  %v6754_v25 = vld [vmem:[%s6723_s11 + $0x10] sm:$0xff]   ;;  %v389_v27 = vrot.slane %v387_v22, 1  ;;  %v1842_v30 = vshrl.u32 %v6751_v24, 16  ;;  %v1845_v31 = vshll.u32 %v6751_v24, 16  ;;  %v6221_v39 = vld [vmem:[#allocation5 + $0x138] sm:$0xff]   ;;  %v1851_v45 = vshrl.u32 %v6763_v38, 16  ;;  %vm7334_vm8 = vmor %vm3926_vm6, %vm3927_vm7 }
  0x60   : > { %v384_v26 = vrot.slane %v382_v21, 1  ;;  %v1834_v28 = vshrl.u32 %v6748_v23, 16  ;;  %v1837_v29 = vshll.u32 %v6748_v23, 16  ;;  %v395_v33 = vshll.u32 %v6754_v25, 16  ;;  %v6229_v52 = vld [vmem:[#allocation5 + $0x140] sm:$0xff]   ;;  %v6769_v53 = vld [vmem:[%s6723_s11 + $0x18] sm:$0xff]   ;;  %vm7389_vm14 = vmor %vm4051_vm9, %vm4052_vm10 }
  0x61   : > { %5370 = vmatpush3.bf16.msra.mxu1 %v6210_v4  ;;  %v1844_v40 = vrot.slane %v1842_v30, 1  ;;  %v1847_v41 = vrot.slane %v1845_v31, 2  ;;  %v1854_v46 = vshll.u32 %v6763_v38, 16  ;;  %v393_v48 = vor.u32 %v391_v32, %v389_v27  ;;  %v6774_v56 = vld [vmem:[%s6723_s11 + $0x20] sm:$0xff]   ;;  %v6781_v61 = vld [vmem:[%s6723_s11 + $0x28] sm:$0xff]   ;;  %v6802_v31 = vld [vmem:[%s6723_s11 + $0x30] sm:$0xff]  }
  0x62   : > { %5578 = vmatpush3.bf16.msra.mxu0 %v6211_v5  ;;  %5371 = vmatprep.subr.bf16.mxu1 %v6212_v6  ;;  %v385_v35 = vor.u32 %v384_v26, %v380_v20  ;;  %v1836_v36 = vrot.slane %v1834_v28, 1  ;;  %v1839_v37 = vrot.slane %v1837_v29, 2  ;;  %v397_v42 = vrot.slane %v395_v33, 1  ;;  %v6778_v60 = vld [vmem:[%s6723_s11 + $0x20] sm:$0xff]   ;;  %v6236_v12 = vld [vmem:[#allocation5 + $0x8] sm:$0xff]   ;;  %v6235_v20 = vld [vmem:[#allocation5 + $0x150] sm:$0xff]  }
  0x63   : > { %5579 = vmatprep.subr.bf16.mxu0 %v6213_v7  ;;  %v1848_v47 = vor.u32 %v1847_v41, %v1844_v40  ;;  %v1853_v50 = vrot.slane %v1851_v45, 1  ;;  %v1856_v51 = vrot.slane %v1854_v46, 2  ;;  %v399_v54 = vshrl.u32 %v6754_v25, 16  ;;  %v6793_v21 = vld [vmem:[%s6723_s11 + $0x28] sm:$0xff]   ;;  %v6798_v28 = vld [vmem:[%s6723_s11 + $0x30] sm:$0xff]   ;;  %v6237_v45 = vld [vmem:[#allocation5 + $0x158] sm:$0xff]  }
  0x64   : > { %v390_v43 = vsel %vm378_vm0, %v385_v35, %v389_v27  ;;  %v1840_v44 = vor.u32 %v1839_v37, %v1836_v36  ;;  %v403_v59 = vshll.u32 %v6769_v53, 16  ;;  %v398_v62 = vsel %vm378_vm0, %v393_v48, %v397_v42  ;;  %v6808_v35 = vld [vmem:[%s6723_s11 + $0x38] sm:$0xff]   ;;  %s5107_s8 = sshll.u32 %s6595_s16, 11  ;;  %s4729_s9 = sshll.u32 %s7342_s20, 4  ;;  %s7842_s9 = int_to_ptr.vmem [resolvable:$true] %s4729_s9 }
  0x65   : > { %5372 = vmatpush3.bf16.msra.mxu1 %v6212_v6  ;;  %5381 = vmatprep.mubr.bf16.mxu1 %v390_v43  ;;  %v1857_v57 = vor.u32 %v1856_v51, %v1853_v50  ;;  %v401_v58 = vor.u32 %v399_v54, %v397_v42  ;;  %v1860_v63 = vshrl.u32 %v6774_v56, 16  ;;  %v1863_v0 = vshll.u32 %v6774_v56, 16  ;;  %v6230_v6 = vld [vmem:[#allocation5 + $0x148] sm:$0xff]   ;;  %v6243_v51 = vld [vmem:[#allocation5 + $0x10] sm:$0xff]   ;;  %v6242_v54 = vld [vmem:[#allocation5 + $0x160] sm:$0xff]   ;;  %s7840_s4 = scalar_lea.hbm %s7936_s2, %s5107_s8  ;;  %s4711_s5 = scalar_lea.sflag [#allocation4], %s6719_s6 }
  0x66   : > { %5580 = vmatpush3.bf16.msra.mxu0 %v6213_v7  ;;  %5373 = vmatprep.subr.bf16.mxu1 %v6214_v8  ;;  %v1849_v55 = vsel %vm1832_vm1, %v1840_v44, %v1848_v47  ;;  %v405_v1 = vrot.slane %v403_v59, 1  ;;  %v407_v2 = vshrl.u32 %v6769_v53, 16  ;;  %v411_v3 = vshll.u32 %v6778_v60, 16  ;;  %s6442_s27 = scalar_lea.vmem %s7842_s9, 2048  ;;  %s6550_s22 = smov [#allocation7]  }
  0x67   : > { %5581 = vmatprep.subr.bf16.mxu0 %v6215_v9  ;;  %5589 = vmatprep.mubr.bf16.mxu0 %v1849_v55  ;;  %v1869_v4 = vshrl.u32 %v6781_v61, 16  ;;  %v1858_v5 = vsel %vm1832_vm1, %v1848_v47, %v1857_v57  ;;  %v1862_v7 = vrot.slane %v1860_v63, 1  ;;  %v415_v22 = vshrl.u32 %v6778_v60, 16  ;;  %p6443_p4 = scmp.ne.s32.totalorder %s7842_s9, %s6442_s27  ;;  %s6446_s23 = sshll.u32 %s6550_s22, 4  ;;  %s6447_s23 = int_to_ptr.vmem [resolvable:$false] %s6446_s23 }
  0x68   : > { %v413_v16 = vrot.slane %v411_v3, 1  ;;  %v419_v30 = vshll.u32 %v6793_v21, 16  ;;  %v1878_v32 = vshrl.u32 %v6798_v28, 16  ;;  %v1881_v33 = vshll.u32 %v6798_v28, 16  ;;  %v6830_v3 = vld [vmem:[%s6723_s11 + $0x48] sm:$0xff]   ;;  %s6448_s28 = scalar_lea.vmem %s6447_s23, 4096  ;;  %p6449_p10 = scmp.lt.s32.totalorder %s7842_s9, %s6447_s23 }
  0x69   : > { %5374 = vmatpush3.bf16.msra.mxu1 %v6214_v8  ;;  %v1865_v8 = vrot.slane %v1863_v0, 2  ;;  %v427_v40 = vshll.u32 %v6802_v31, 16  ;;  %v1887_v43 = vshrl.u32 %v6808_v35, 16  ;;  %v1890_v44 = vshll.u32 %v6808_v35, 16  ;;  %p6444_p6 = pnand %p6443_p4, %p6668_p12  ;;  %p6450_p11 = scmp.lt.s32.totalorder %s6448_s28, %s6442_s27 }
  0x6a   : > { %5582 = vmatpush3.bf16.msra.mxu0 %v6215_v9  ;;  %5375 = vmatprep.subr.bf16.mxu1 %v6216_v10  ;;  %v1872_v9 = vshll.u32 %v6781_v61, 16  ;;  %v417_v29 = vor.u32 %v415_v22, %v413_v16  ;;  %v1880_v41 = vrot.slane %v1878_v32, 1  ;;  %v1883_v42 = vrot.slane %v1881_v33, 2  ;;  %v6841_v32 = vld [vmem:[%s6723_s11 + $0x48] sm:$0xff]  }
  0x6b   : > { %5583 = vmatprep.subr.bf16.mxu0 %v6217_v11  ;;  %v1866_v13 = vor.u32 %v1865_v8, %v1862_v7  ;;  %v429_v48 = vrot.slane %v427_v40, 1  ;;  %v1892_v50 = vrot.slane %v1890_v44, 2  ;;  %v431_v59 = vshrl.u32 %v6802_v31, 16  ;;  %p6445_p8 = pneg %p6444_p6  ;;  %p6451_p3 = por %p6450_p11, %p6449_p10 }
  0x6c   : > { %v1884_v47 = vor.u32 %v1883_v42, %v1880_v41  ;;  %v2304_v40 = vrot.slane %v6751_v24, 2  ;;  %v6851_v41 = vld [vmem:[%s6723_s11 + $0x50] sm:$0xff]   ;;  %v455_v44 = vshrl.u32 %v6841_v32, 16  ;;  %vm3990_vm11 = vcmask 1041408  }
  0x6d   : > { %5376 = vmatpush3.bf16.msra.mxu1 %v6216_v10  ;;  %v406_v10 = vsel %vm378_vm0, %v401_v58, %v405_v1  ;;  %v1867_v26 = vsel %vm1832_vm1, %v1857_v57, %v1866_v13  ;;  %v6818_v58 = vld [vmem:[%s6723_s11 + $0x38] sm:$0xff]   ;;  %v433_v63 = vor.u32 %v431_v59, %v429_v48  ;;  %v6867_v59 = vld [vmem:[%s6723_s11 + $0x60] sm:$0xff]   ;;  %vm3991_vm12 = vcmask 1045508   ;;  %p6452_p7 = pnand %p6451_p3, %p6445_p8 }
  0x6e   : > { %5584 = vmatpush3.bf16.msra.mxu0 %v6217_v11  ;;  %5377 = vmatprep.subr.bf16.mxu1 %v6218_v17  ;;  %v1871_v11 = vrot.slane %v1869_v4, 1  ;;  %v435_v0 = vshll.u32 %v6818_v58, 16  ;;  %vm4006_vm13 = vcmask 1043456   ;;  %vm7402_vm15 = vmor %vm3990_vm11, %vm3991_vm12 }
  0x6f   : > { %5585 = vmatprep.subr.bf16.mxu0 %v6219_v19 }
  0x70   : > { %v437_v8 = vrot.slane %v435_v0, 1  ;;  %v2306_v0 = vrot.slane %v6763_v38, 2 }
  0x71   : > { %5378 = vmatpush3.bf16.msra.mxu1 %v6218_v17  ;;  %v1874_v17 = vrot.slane %v1872_v9, 2 }
  0x72   : > { %5586 = vmatpush3.bf16.msra.mxu0 %v6219_v19  ;;  %5379 = vmatprep.subr.bf16.mxu1 %v6220_v34  ;;  %v409_v19 = vor.u32 %v407_v2, %v405_v1  ;;  %v6826_v1 = vld [vmem:[%s6723_s11 + $0x40] sm:$0xff]   ;;  %v439_v2 = vshrl.u32 %v6818_v58, 16 }
  0x73   : > { %5587 = vmatprep.subr.bf16.mxu0 %v6221_v39  ;;  %v1875_v27 = vor.u32 %v1874_v17, %v1871_v11  ;;  %v443_v9 = vshll.u32 %v6826_v1, 16  ;;  %v1908_v11 = vshll.u32 %v6830_v3, 16  ;;  %v6250_v17 = vld [vmem:[#allocation5 + $0x18] sm:$0xff]   ;;  %v447_v33 = vshrl.u32 %v6826_v1, 16 }
  0x74   : > { %v414_v36 = vsel %vm378_vm0, %v409_v19, %v413_v16  ;;  %v438_v19 = vsel %vm378_vm0, %v433_v63, %v437_v8 }
  0x75   : > { %5380 = vmatpush3.bf16.msra.mxu1 %v6220_v34  ;;  %v423_v34 = vshrl.u32 %v6793_v21, 16  ;;  %v1876_v37 = vsel %vm1832_vm1, %v1866_v13, %v1875_v27  ;;  %v1885_v55 = vsel %vm1832_vm1, %v1875_v27, %v1884_v47  ;;  %v445_v27 = vrot.slane %v443_v9, 1 }
  0x76   : > { %5588 = vmatpush3.bf16.msra.mxu0 %v6221_v39  ;;  %5417 = vmatprep.subr.bf16.mxu1 %v6227_v49  ;;  %v421_v39 = vrot.slane %v419_v30, 1  ;;  %v6249_v30 = vld [vmem:[#allocation5 + $0x170] sm:$0xff]   ;;  %v475_v9 = vshll.u32 %v6867_v59, 16 }
  0x77   : > { %5625 = vmatprep.subr.bf16.mxu0 %v6229_v52  ;;  %v449_v42 = vor.u32 %v447_v33, %v445_v27  ;;  %v6887_v33 = vld [vmem:[%s6723_s11 + $0x78] sm:$0xff]  }
  0x78   : > { %5382 = vmatmul.mubr.bf16.vlgmr.msra.gmra.mrb[0].mxu1 %v398_v62  ;;  %v422_v46 = vsel %vm378_vm0, %v417_v29, %v421_v39  ;;  %v6822_v62 = vld [vmem:[%s6723_s11 + $0x40] sm:$0xff]   ;;  %v1910_v29 = vrot.slane %v1908_v11, 2  ;;  %v6263_v11 = vld [vmem:[#allocation5 + $0x30] sm:$0xff]  }
  0x79   : > { %5590 = vmatmul.mubr.bf16.vlgmr.msra.gmra.mrb[0].mxu0 %v1858_v5  ;;  %5418 = vmatpush3.bf16.msra.mxu1 %v6227_v49  ;;  %v1889_v49 = vrot.slane %v1887_v43, 1  ;;  %v1899_v7 = vshll.u32 %v6822_v62, 16  ;;  %v451_v43 = vshll.u32 %v6841_v32, 16 }
  0x7a   : > { %5626 = vmatpush3.bf16.msra.mxu0 %v6229_v52  ;;  %5385 = vmatprep.mubr.bf16.mxu1 %v406_v10  ;;  %v425_v52 = vor.u32 %v423_v34, %v421_v39  ;;  %v1905_v10 = vshrl.u32 %v6830_v3, 16  ;;  %v2282_v34 = vld [vmem:[%s6723_s11 + $0x8] sm:$0xc] }
  0x7b   : > { %5627 = vmatprep.subr.bf16.mxu0 %v6230_v6  ;;  %5593 = vmatprep.mubr.bf16.mxu0 %v1867_v26  ;;  %v1893_v57 = vor.u32 %v1892_v50, %v1889_v49  ;;  %v1901_v16 = vrot.slane %v1899_v7, 2  ;;  %v441_v26 = vor.u32 %v439_v2, %v437_v8  ;;  %v4946_v39 = vcombine.low %v2282_v34, %v6742_v18  ;;  %v6858_v49 = vld [vmem:[%s6723_s11 + $0x58] sm:$0xff]   ;;  %v6258_v2 = vld [vmem:[#allocation5 + $0x180] sm:$0xff]  }
  0x7c   : > { %5419 = vmatprep.subr.bf16.mxu1 %v6236_v12  ;;  %v430_v4 = vsel %vm378_vm0, %v425_v52, %v429_v48  ;;  %v6255_v48 = vld [vmem:[#allocation5 + $0x20] sm:$0xff]   ;;  %v453_v24 = vrot.slane %v451_v43, 1  ;;  %v463_v50 = vshrl.u32 %v6851_v41, 16  ;;  %v2308_v7 = vrot.slane %v6774_v56, 2  ;;  %v6266_v34 = vld [vmem:[#allocation5 + $0x190] sm:$0xff]  }
  0x7d   : > { %5420 = vmatpush3.bf16.msra.mxu1 %v6236_v12  ;;  %v1894_v5 = vsel %vm1832_vm1, %v1884_v47, %v1893_v57  ;;  %v6244_v12 = vld [vmem:[#allocation5 + $0x168] sm:$0xff]   ;;  %v459_v47 = vshll.u32 %v6851_v41, 16  ;;  %v471_v38 = vshrl.u32 %v6858_v49, 16 }
  0x7e   : > { %5628 = vmatpush3.bf16.msra.mxu0 %v6230_v6  ;;  %5421 = vmatprep.subr.bf16.mxu1 %v6243_v51  ;;  %v1896_v6 = vshrl.u32 %v6822_v62, 16  ;;  %v457_v63 = vor.u32 %v455_v44, %v453_v24  ;;  %v6872_v8 = vld [vmem:[%s6723_s11 + $0x68] sm:$0xff]  }
  0x7f   : > { %5629 = vmatprep.subr.bf16.mxu0 %v6235_v20  ;;  %v483_v56 = vshll.u32 %v6872_v8, 16  ;;  %v487_v43 = vshrl.u32 %v6872_v8, 16 }
  0x80   : > { %5386 = vmatmul.mubr.bf16.gmra.mrb[4].mxu1 %v414_v36  ;;  %v1898_v13 = vrot.slane %v1896_v6, 1  ;;  %v6259_v6 = vld [vmem:[#allocation5 + $0x28] sm:$0xff]  }
  0x81   : > { %5594 = vmatmul.mubr.bf16.gmra.mrb[4].mxu0 %v1876_v37  ;;  %5389 = vmatprep.mubr.bf16.mxu1 %v422_v46  ;;  %v2303_v46 = vrot.slane %v4946_v39, 2  ;;  %v6268_v39 = vld [vmem:[#allocation5 + $0x38] sm:$0xff]  }
  0x82   : > { %5630 = vmatpush3.bf16.msra.mxu0 %v6235_v20  ;;  %5597 = vmatprep.mubr.bf16.mxu0 %v1885_v55  ;;  %v1907_v20 = vrot.slane %v1905_v10, 1  ;;  %v1902_v22 = vor.u32 %v1901_v16, %v1898_v13  ;;  %v454_v55 = vsel %vm378_vm0, %v449_v42, %v453_v24  ;;  %v479_v16 = vshrl.u32 %v6867_v59, 16 }
  0x83   : > { %5631 = vmatprep.subr.bf16.mxu0 %v6237_v45  ;;  %5422 = vmatpush3.bf16.msra.mxu1 %v6243_v51  ;;  %v6251_v51 = vld [vmem:[#allocation5 + $0x178] sm:$0xff]   ;;  %v2305_v52 = vsel %vm2302_vm2, %v2303_v46, %v2304_v40 }
  0x84   : > { %5423 = vmatprep.subr.bf16.mxu1 %v6250_v17  ;;  %v1903_v36 = vsel %vm1832_vm1, %v1893_v57, %v1902_v22  ;;  %v6846_v37 = vor.u32 %v1910_v29, %v1907_v20  ;;  %v461_v57 = vrot.slane %v459_v47, 1  ;;  %v477_v20 = vrot.slane %v475_v9, 1  ;;  %v6899_v47 = vld [vmem:[%s6723_s11 + $0x80] sm:$0xff]   ;;  %v6269_v9 = vld [vmem:[%s6723_s11 + $0x50] sm:$0xff]  }
  0x86   : > { %5632 = vmatpush3.bf16.msra.mxu0 %v6237_v45  ;;  %v446_v45 = vsel %vm378_vm0, %v441_v26, %v445_v27  ;;  %v1912_v18 = vsel %vm1832_vm1, %v1902_v22, %v6846_v37  ;;  %v462_v10 = vsel %vm378_vm0, %v457_v63, %v461_v57  ;;  %v6883_v22 = vld [vmem:[%s6723_s11 + $0x70] sm:$0xff]   ;;  %v2310_v27 = vrot.slane %v6781_v61, 2 }
  0x87   : > { %5633 = vmatprep.subr.bf16.mxu0 %v6242_v54  ;;  %5424 = vmatpush3.bf16.msra.mxu1 %v6250_v17  ;;  %v2309_v17 = vsel %vm2302_vm2, %v2306_v0, %v2308_v7  ;;  %v481_v29 = vor.u32 %v479_v16, %v477_v20  ;;  %v507_v63 = vshll.u32 %v6899_v47, 16 }
  0x88   : > { %5390 = vmatmul.mubr.bf16.gmra.mrb[8].mxu1 %v430_v4  ;;  %5425 = vmatprep.subr.bf16.mxu1 %v6255_v48  ;;  %v465_v4 = vor.u32 %v463_v50, %v461_v57  ;;  %v2311_v61 = vsel %vm2302_vm2, %v2308_v7, %v2310_v27  ;;  %v2314_v50 = vrot.slane %v6808_v35, 2  ;;  %v2316_v57 = vrot.slane %v6822_v62, 2 }
  0x89   : > { %5598 = vmatmul.mubr.bf16.gmra.mrb[8].mxu0 %v1894_v5  ;;  %5393 = vmatprep.mubr.bf16.mxu1 %v438_v19  ;;  %v6262_v19 = vld [vmem:[#allocation5 + $0x188] sm:$0xff]  }
  0x8a   : > { %5634 = vmatpush3.bf16.msra.mxu0 %v6242_v54  ;;  %5601 = vmatprep.mubr.bf16.mxu0 %v1903_v36  ;;  %v467_v54 = vshll.u32 %v6858_v49, 16  ;;  %v2312_v36 = vrot.slane %v6798_v28, 2  ;;  %v499_v28 = vshll.u32 %v6887_v33, 16  ;;  %v2317_v62 = vsel %vm2302_vm2, %v2314_v50, %v2316_v57 }
  0x8b   : > { %5635 = vmatprep.subr.bf16.mxu0 %v6244_v12  ;;  %5426 = vmatpush3.bf16.msra.mxu1 %v6255_v48 }
  0x8c   : > { %v469_v5 = vrot.slane %v467_v54, 1  ;;  %5427 = vmatprep.subr.bf16.mxu1 %v6259_v6  ;;  %v2313_v46 = vsel %vm2302_vm2, %v2310_v27, %v2312_v36  ;;  %v501_v54 = vrot.slane %v499_v28, 1 }
  0x8e   : > { %5636 = vmatpush3.bf16.msra.mxu0 %v6244_v12  ;;  %v2307_v12 = vsel %vm2302_vm2, %v2304_v40, %v2306_v0  ;;  %v470_v13 = vsel %vm378_vm0, %v465_v4, %v469_v5  ;;  %v473_v26 = vor.u32 %v471_v38, %v469_v5  ;;  %v491_v40 = vshll.u32 %v6883_v22, 16  ;;  %v6276_v0 = vld [vmem:[#allocation5 + $0x1a0] sm:$0xff]  }
  0x8f   : > { %5637 = vmatprep.subr.bf16.mxu0 %v6249_v30  ;;  %5428 = vmatpush3.bf16.msra.mxu1 %v6259_v6  ;;  %v2315_v4 = vsel %vm2302_vm2, %v2312_v36, %v2314_v50  ;;  %v511_v6 = vshrl.u32 %v6899_v47, 16  ;;  %v509_v38 = vrot.slane %v507_v63, 1  ;;  %v6273_v36 = vld [vmem:[%s6723_s11 + $0x60] sm:$0xff]  }
  0x90   : > { %5394 = vmatmul.mubr.bf16.gmra.mrb[12].mxu1 %v446_v45  ;;  %5429 = vmatprep.subr.bf16.mxu1 %v6263_v11  ;;  %v478_v42 = vsel %vm378_vm0, %v473_v26, %v477_v20  ;;  %v495_v45 = vshrl.u32 %v6883_v22, 16  ;;  %v493_v48 = vrot.slane %v491_v40, 1 }
  0x91   : > { %5602 = vmatmul.mubr.bf16.gmra.mrb[12].mxu0 %v1912_v18  ;;  %5397 = vmatprep.mubr.bf16.mxu1 %v454_v55  ;;  %v6272_v18 = vld [vmem:[#allocation5 + $0x198] sm:$0xff]   ;;  %v6905_v55 = vld [vmem:[#allocation5 + $0x80] sm:$0xff]   ;;  %v513_v16 = vor.u32 %v511_v6, %v509_v38  ;;  %v6285_v6 = vld [vmem:[%s6723_s11 + $0x90] sm:$0xff]  }
  0x92   : > { %5638 = vmatpush3.bf16.msra.mxu0 %v6249_v30  ;;  %5641 = vmatprep.mubr.bf16.mxu0 %v2305_v52  ;;  %v485_v30 = vrot.slane %v483_v56, 1  ;;  %v497_v52 = vor.u32 %v495_v45, %v493_v48  ;;  %v6275_v45 = vld [vmem:[%s6723_s11 + $0x68] sm:$0xff]  }
  0x93   : > { %5639 = vmatprep.subr.bf16.mxu0 %v6251_v51  ;;  %5430 = vmatpush3.bf16.msra.mxu1 %v6263_v11  ;;  %v6280_v11 = vld [vmem:[#allocation5 + $0x1a8] sm:$0xff]  }
  0x94   : > { %5431 = vmatprep.subr.bf16.mxu1 %v6268_v39  ;;  %v486_v44 = vsel %vm378_vm0, %v481_v29, %v485_v30  ;;  %v489_v24 = vor.u32 %v487_v43, %v485_v30  ;;  %v502_v5 = vsel %vm378_vm0, %v497_v52, %v501_v54  ;;  %v6278_v52 = vld [vmem:[%s6723_s11 + $0x78] sm:$0xff]  }
  0x96   : > { %5640 = vmatpush3.bf16.msra.mxu0 %v6251_v51  ;;  %v6903_v51 = vld [vmem:[%s6723_s11 + $0x88] sm:$0xff]   ;;  %v494_v35 = vsel %vm378_vm0, %v489_v24, %v493_v48  ;;  %v2326_v24 = vrot.slane %v6275_v45, 2  ;;  %v6999_v45 = vld [vmem:[%s6723_s11 + $0x40] sm:$0xff]  }
  0x97   : > { %5677 = vmatprep.subr.bf16.mxu0 %v6258_v2  ;;  %5432 = vmatpush3.bf16.msra.mxu1 %v6268_v39  ;;  %v515_v7 = vshll.u32 %v6903_v51, 16  ;;  %v519_v26 = vshrl.u32 %v6903_v51, 16  ;;  %v6288_v39 = vld [vmem:[#allocation5 + $0x1b8] sm:$0xff]  }
  0x98   : > { %5398 = vmatmul.mubr.bf16.gmra.mrb[16].mxu1 %v462_v10  ;;  %5469 = vmatprep.subr.bf16.mxu1 %v6905_v55  ;;  %v6919_v10 = vld [vmem:[%s6723_s11 + $0x90] ss:$0 sps:$4 sm:$0x11]  }
  0x99   : > { %5642 = vmatmul.mubr.bf16.vlgmr.msra.gmra.mrb[0].mxu0 %v2307_v12  ;;  %5401 = vmatprep.mubr.bf16.mxu1 %v470_v13  ;;  %v2318_v13 = vrot.slane %v6830_v3, 2  ;;  %v517_v56 = vrot.slane %v515_v7, 1  ;;  %v523_v27 = vshll.u32 %v6919_v10, 16  ;;  %v2619_v7 = vld [vmem:[%s6723_s11 + $0x10] sm:$0xc] }
  0x9a   : > { %5645 = vmatprep.mubr.bf16.mxu0 %v2309_v17  ;;  %5678 = vmatpush3.bf16.msra.mxu0 %v6258_v2  ;;  %v503_v2 = vshrl.u32 %v6887_v33, 16  ;;  %v2320_v17 = vrot.slane %v6269_v9, 2  ;;  %v6292_v9 = vld [vmem:[#allocation5 + $0xa0] sm:$0xff]  }
  0x9b   : > { %5679 = vmatprep.subr.bf16.mxu0 %v6262_v19  ;;  %v2319_v29 = vsel %vm2302_vm2, %v2316_v57, %v2318_v13  ;;  %v518_v30 = vsel %vm378_vm0, %v513_v16, %v517_v56  ;;  %v521_v40 = vor.u32 %v519_v26, %v517_v56  ;;  %v6279_v57 = vld [vmem:[#allocation5 + $0x88] sm:$0xff]  }
  0x9c   : > { %v505_v12 = vor.u32 %v503_v2, %v501_v54  ;;  %v2321_v3 = vsel %vm2302_vm2, %v2318_v13, %v2320_v17  ;;  %v6959_v13 = vld [vmem:[%s6723_s11 + $0x18] sm:$0xff]   ;;  %v6296_v16 = vld [vmem:[#allocation5 + $0xa8] sm:$0xff]  }
  0x9e   : > { %5680 = vmatpush3.bf16.msra.mxu0 %v6262_v19  ;;  %v6284_v19 = vld [vmem:[#allocation5 + $0x1b0] sm:$0xff]   ;;  %v510_v20 = vsel %vm378_vm0, %v505_v12, %v509_v38 }
  0x9f   : > { %5681 = vmatprep.subr.bf16.mxu0 %v6266_v34  ;;  %v6286_v38 = vld [vmem:[%s6723_s11 + $0x98] ss:$0 sps:$4 sm:$0x33]  }
  0xa0   : > { %5402 = vmatmul.mubr.bf16.gmra.mrb[20].mxu1 %v478_v42  ;;  %v525_v42 = vrot.slane %v523_v27, 1  ;;  %v2338_v56 = vrot.slane %v6286_v38, 2  ;;  %v6971_v27 = vld [vmem:[%s6723_s11 + $0x20] sm:$0xff]  }
  0xa1   : > { %5646 = vmatmul.mubr.bf16.gmra.mrb[4].mxu0 %v2311_v61  ;;  %5405 = vmatprep.mubr.bf16.mxu1 %v486_v44  ;;  %v2324_v61 = vrot.slane %v6273_v36, 2  ;;  %v6981_v36 = vld [vmem:[#allocation5 + $0xc0] sm:$0xff]  }
  0xa2   : > { %5649 = vmatprep.mubr.bf16.mxu0 %v2313_v46  ;;  %5682 = vmatpush3.bf16.msra.mxu0 %v6266_v34  ;;  %v6271_v34 = vld [vmem:[%s6723_s11 + $0x58] sm:$0xff]   ;;  %v526_v44 = vsel %vm378_vm0, %v521_v40, %v525_v42  ;;  %v6277_v46 = vld [vmem:[%s6723_s11 + $0x70] sm:$0xff]  }
  0xa3   : > { %5683 = vmatprep.subr.bf16.mxu0 %v6272_v18  ;;  %v2322_v43 = vrot.slane %v6271_v34, 2  ;;  %v2328_v50 = vrot.slane %v6277_v46, 2  ;;  %v2327_v54 = vsel %vm2302_vm2, %v2324_v61, %v2326_v24  ;;  %v6988_v40 = vld [vmem:[%s6723_s11 + $0x38] sm:$0xff]   ;;  %v2776_v46 = vrot.slane %v6999_v45, 2 }
  0xa5   : > { %v2323_v28 = vsel %vm2302_vm2, %v2320_v17, %v2322_v43  ;;  %v2325_v48 = vsel %vm2302_vm2, %v2322_v43, %v2324_v61  ;;  %v2329_v63 = vsel %vm2302_vm2, %v2326_v24, %v2328_v50  ;;  %v2774_v43 = vrot.slane %v6988_v40, 2  ;;  %v6303_v61 = vld [vmem:[#allocation5 + $0x1d0] sm:$0xff]  }
  0xa6   : > { %5684 = vmatpush3.bf16.msra.mxu0 %v6272_v18  ;;  %v6935_v18 = vld [vmem:[#allocation5 + $0x1c0] sm:$0xff]  }
  0xa7   : > { %5685 = vmatprep.subr.bf16.mxu0 %v6276_v0  ;;  %v2777_v24 = vsel %vm2302_vm2, %v2774_v43, %v2776_v46 }
  0xa8   : > { %5406 = vmatmul.mubr.bf16.gmra.mrb[24].mxu1 %v494_v35  ;;  %v6283_v35 = vld [vmem:[#allocation5 + $0x90] sm:$0xff]  }
  0xa9   : > { %5650 = vmatmul.mubr.bf16.gmra.mrb[8].mxu0 %v2315_v4  ;;  %5409 = vmatprep.mubr.bf16.mxu1 %v502_v5  ;;  %v6282_v4 = vld [vmem:[%s6723_s11 + $0x88] sm:$0xff]  }
  0xaa   : > { %5653 = vmatprep.mubr.bf16.mxu0 %v2317_v62  ;;  %5686 = vmatpush3.bf16.msra.mxu0 %v6276_v0  ;;  %v6281_v0 = vld [vmem:[%s6723_s11 + $0x80] sm:$0xff]   ;;  %v2336_v62 = vrot.slane %v6285_v6, 2 }
  0xab   : > { %5687 = vmatprep.subr.bf16.mxu0 %v6280_v11  ;;  %v2332_v2 = vrot.slane %v6281_v0, 2  ;;  %v6320_v0 = vld [vmem:[#allocation5 + $0x1f0] sm:$0xff]  }
  0xac   : > { %v2339_v26 = vsel %vm2302_vm2, %v2336_v62, %v2338_v56 }
  0xae   : > { %5688 = vmatpush3.bf16.msra.mxu0 %v6280_v11  ;;  %v6955_v11 = vld [vmem:[%s6723_s11 + $0x14] sm:$0xf] }
  0xaf   : > { %5689 = vmatprep.subr.bf16.mxu0 %v6284_v19 }
  0xb0   : > { %5410 = vmatmul.mubr.bf16.gmra.mrb[28].mxu1 %v510_v20  ;;  %v6300_v20 = vld [vmem:[#allocation5 + $0xb0] sm:$0xff]  }
  0xb1   : > { %5654 = vmatmul.mubr.bf16.gmra.mrb[12].mxu0 %v2319_v29  ;;  %5413 = vmatprep.mubr.bf16.mxu1 %v518_v30  ;;  %v6974_v29 = vld [vmem:[%s6723_s11 + $0x28] sm:$0xff]   ;;  %v2768_v30 = vrot.slane %v6971_v27, 2 }
  0xb2   : > { %5657 = vmatprep.mubr.bf16.mxu0 %v2321_v3  ;;  %5690 = vmatpush3.bf16.msra.mxu0 %v6284_v19  ;;  %v2766_v19 = vrot.slane %v6959_v13, 2  ;;  %v2770_v34 = vrot.slane %v6974_v29, 2 }
  0xb3   : > { %5691 = vmatprep.subr.bf16.mxu0 %v6288_v39 }
  0xb4   : > { %v2769_v3 = vsel %vm2302_vm2, %v2766_v19, %v2768_v30 }
  0xb6   : > { %5692 = vmatpush3.bf16.msra.mxu0 %v6288_v39  ;;  %v6985_v39 = vld [vmem:[%s6723_s11 + $0x30] sm:$0xff]  }
  0xb7   : > { %5729 = vmatprep.subr.bf16.mxu0 %v6935_v18  ;;  %v2772_v42 = vrot.slane %v6985_v39, 2 }
  0xb8   : > { %5414 = vmatmul.mubr.bf16.gmra.mrb[32].mxu1 %v526_v44 }
  0xb9   : > { %5658 = vmatmul.mubr.bf16.gmra.mrb[16].mxu0 %v2323_v28  ;;  %5433 = vmatprep.mubr.bf16.mxu1 %v6735_v14  ;;  %v2330_v14 = vrot.slane %v6278_v52, 2  ;;  %v2773_v44 = vsel %vm2302_vm2, %v2770_v34, %v2772_v42  ;;  %v7003_v28 = vld [vmem:[%s6723_s11 + $0x48] sm:$0xff]   ;;  %v7015_v52 = vld [vmem:[%s6723_s11 + $0x58] sm:$0xff]  }
  0xba   : > { %5661 = vmatprep.mubr.bf16.mxu0 %v2325_v48  ;;  %v2778_v48 = vrot.slane %v7003_v28, 2 }
  0xbb   : > { %v2331_v5 = vsel %vm2302_vm2, %v2328_v50, %v2330_v14  ;;  %v7011_v50 = vld [vmem:[%s6723_s11 + $0x50] sm:$0xff]  }
  0xc0   : > { %5434 = vmatmul.mubr.bf16.vlgmr.msra.gmra.mrb[0].mxu1 %v6738_v15  ;;  %v6287_v15 = vld [vmem:[#allocation5 + $0x98] sm:$0xff]  }
  0xc1   : > { %5662 = vmatmul.mubr.bf16.gmra.mrb[20].mxu0 %v2327_v54  ;;  %5470 = vmatpush3.bf16.msra.mxu1 %v6905_v55  ;;  %v2333_v55 = vsel %vm2302_vm2, %v2330_v14, %v2332_v2  ;;  %v2780_v54 = vrot.slane %v7011_v50, 2 }
  0xc2   : > { %5437 = vmatprep.mubr.bf16.mxu1 %v6754_v25  ;;  %5665 = vmatprep.mubr.bf16.mxu0 %v2329_v63  ;;  %v2334_v25 = vrot.slane %v6282_v4, 2  ;;  %v1013_v63 = vld [vmem:[%s6723_s11] sm:$0xe] }
  0xc3   : > { %5471 = vmatprep.subr.bf16.mxu1 %v6279_v57  ;;  %v2781_v14 = vsel %vm2302_vm2, %v2778_v48, %v2780_v54 }
  0xc4   : > { %v2335_v12 = vsel %vm2302_vm2, %v2332_v2, %v2334_v25  ;;  %v6340_v2 = vld [vmem:[%s6723_s11 + $0x4] sm:$0xf] }
  0xc5   : > { %5472 = vmatpush3.bf16.msra.mxu1 %v6279_v57  ;;  %v2782_v57 = vrot.slane %v7015_v52, 2 }
  0xc6   : > { %5473 = vmatprep.subr.bf16.mxu1 %v6283_v35 }
  0xc7   : > { %v2783_v4 = vsel %vm2302_vm2, %v2780_v54, %v2782_v57 }
  0xc8   : > { %5438 = vmatmul.mubr.bf16.gmra.mrb[4].mxu1 %v6769_v53  ;;  %v2337_v53 = vsel %vm2302_vm2, %v2334_v25, %v2336_v62  ;;  %v7036_v62 = vld [vmem:[#allocation5 + $0x200] sm:$0xff]  }
  0xc9   : > { %5666 = vmatmul.mubr.bf16.gmra.mrb[24].mxu0 %v2331_v5  ;;  %5441 = vmatprep.mubr.bf16.mxu1 %v6778_v60  ;;  %v6963_v60 = vcombine.low %v2619_v7, %v6955_v11  ;;  %v6324_v5 = vld [vmem:[#allocation5 + $0x1f8] sm:$0xff]  }
  0xca   : > { %5669 = vmatprep.mubr.bf16.mxu0 %v2333_v55  ;;  %5474 = vmatpush3.bf16.msra.mxu1 %v6283_v35  ;;  %v7024_v35 = vld [vmem:[%s6723_s11 + $0x60] sm:$0xff]   ;;  %v6341_v55 = vld [vmem:[%s6723_s11 + $0x8] sm:$0xff]  }
  0xcb   : > { %5475 = vmatprep.subr.bf16.mxu1 %v6287_v15  ;;  %v2765_v17 = vrot.slane %v6963_v60, 2  ;;  %v2784_v6 = vrot.slane %v7024_v35, 2  ;;  %v1035_v25 = vrot.slane %v6341_v55, 1 }
  0xce   : > { %5476 = vmatpush3.bf16.msra.mxu1 %v6287_v15 }
  0xcf   : > { %5477 = vmatprep.subr.bf16.mxu1 %v6292_v9 }
  0xd0   : > { %5442 = vmatmul.mubr.bf16.gmra.mrb[8].mxu1 %v6793_v21  ;;  %v2767_v21 = vsel %vm2302_vm2, %v2765_v17, %v2766_v19  ;;  %v6343_v17 = vld [vmem:[%s6723_s11 + $0x18] sm:$0xff]  }
  0xd1   : > { %5670 = vmatmul.mubr.bf16.gmra.mrb[28].mxu0 %v2335_v12  ;;  %5445 = vmatprep.mubr.bf16.mxu1 %v6802_v31  ;;  %v6304_v31 = vld [vmem:[#allocation5 + $0xb8] sm:$0xff]   ;;  %v1039_v19 = vrot.slane %v6343_v17, 1 }
  0xd2   : > { %5673 = vmatprep.mubr.bf16.mxu0 %v2337_v53  ;;  %5478 = vmatpush3.bf16.msra.mxu1 %v6292_v9  ;;  %v7041_v9 = vld [vmem:[%s6723_s11 + $0x70] sm:$0xff]   ;;  %v7045_v12 = vld [vmem:[%s6723_s11 + $0x78] sm:$0xff]  }
  0xd3   : > { %5479 = vmatprep.subr.bf16.mxu1 %v6296_v16  ;;  %v6342_v53 = vld [vmem:[%s6723_s11 + $0x10] sm:$0xff]   ;;  %v2788_v56 = vrot.slane %v7041_v9, 2 }
  0xd6   : > { %5480 = vmatpush3.bf16.msra.mxu1 %v6296_v16  ;;  %v1037_v16 = vrot.slane %v6342_v53, 1 }
  0xd7   : > { %5481 = vmatprep.subr.bf16.mxu1 %v6300_v20 }
  0xd8   : > { %5446 = vmatmul.mubr.bf16.gmra.mrb[12].mxu1 %v6818_v58  ;;  %v2771_v58 = vsel %vm2302_vm2, %v2768_v30, %v2770_v34  ;;  %v6315_v34 = vld [vmem:[#allocation5 + $0xc8] sm:$0xff]  }
  0xd9   : > { %5674 = vmatmul.mubr.bf16.gmra.mrb[32].mxu0 %v2339_v26  ;;  %5449 = vmatprep.mubr.bf16.mxu1 %v6826_v1  ;;  %v6299_v1 = vld [vmem:[#allocation5 + $0x1c8] sm:$0xff]   ;;  %v1038_v26 = vsel %vm1033_vm3, %v1035_v25, %v1037_v16 }
  0xda   : > { %5693 = vmatprep.mubr.bf16.mxu0 %v2767_v21  ;;  %5482 = vmatpush3.bf16.msra.mxu1 %v6300_v20  ;;  %v2790_v20 = vrot.slane %v7045_v12, 2 }
  0xdb   : > { %5483 = vmatprep.subr.bf16.mxu1 %v6304_v31 }
  0xdc   : > { %v2791_v30 = vsel %vm2302_vm2, %v2788_v56, %v2790_v20 }
  0xde   : > { %5484 = vmatpush3.bf16.msra.mxu1 %v6304_v31  ;;  %v7056_v31 = vld [vmem:[%s6723_s11 + $0x80] sm:$0xff]  }
  0xdf   : > { %5521 = vmatprep.subr.bf16.mxu1 %v6981_v36 }
  0xe0   : > { %5450 = vmatmul.mubr.bf16.gmra.mrb[16].mxu1 %v6841_v32  ;;  %v2775_v32 = vsel %vm2302_vm2, %v2772_v42, %v2774_v43  ;;  %v2792_v42 = vrot.slane %v7056_v31, 2  ;;  %v6345_v43 = vld [vmem:[%s6723_s11 + $0x28] sm:$0xff]  }
  0xe1   : > { %5694 = vmatmul.mubr.bf16.vlgmr.msra.gmra.mrb[0].mxu0 %v2769_v3  ;;  %5453 = vmatprep.mubr.bf16.mxu1 %v6851_v41  ;;  %v6307_v41 = vld [vmem:[#allocation5 + $0x1d8] sm:$0xff]   ;;  %v7061_v3 = vld [vmem:[%s6723_s11 + $0x88] sm:$0xff]  }
  0xe2   : > { %5697 = vmatprep.mubr.bf16.mxu0 %v2771_v58  ;;  %5730 = vmatpush3.bf16.msra.mxu0 %v6935_v18  ;;  %v6312_v18 = vld [vmem:[#allocation5 + $0x1e0] sm:$0xff]  }
  0xe3   : > { %5731 = vmatprep.subr.bf16.mxu0 %v6299_v1  ;;  %v6344_v58 = vld [vmem:[%s6723_s11 + $0x20] sm:$0xff]  }
  0xe6   : > { %5732 = vmatpush3.bf16.msra.mxu0 %v6299_v1  ;;  %v1041_v1 = vrot.slane %v6344_v58, 1  ;;  %v3129_v58 = vshrl.u32 %v6974_v29, 16 }
  0xe7   : > { %5733 = vmatprep.subr.bf16.mxu0 %v6303_v61 }
  0xe8   : > { %5454 = vmatmul.mubr.bf16.gmra.mrb[20].mxu1 %v6858_v49  ;;  %v2779_v49 = vsel %vm2302_vm2, %v2776_v46, %v2778_v48  ;;  %v7072_v48 = vld [vmem:[%s6723_s11 + $0x90] sm:$0xff]  }
  0xe9   : > { %5698 = vmatmul.mubr.bf16.gmra.mrb[4].mxu0 %v2773_v44  ;;  %5457 = vmatprep.mubr.bf16.mxu1 %v6867_v59  ;;  %v6316_v59 = vld [vmem:[#allocation5 + $0x1e8] sm:$0xff]   ;;  %v6319_v44 = vld [vmem:[#allocation5 + $0xd0] sm:$0xff]  }
  0xea   : > { %5701 = vmatprep.mubr.bf16.mxu0 %v2775_v32  ;;  %5734 = vmatpush3.bf16.msra.mxu0 %v6303_v61  ;;  %v1043_v61 = vrot.slane %v6345_v43, 1  ;;  %v2794_v32 = vrot.slane %v7061_v3, 2 }
  0xeb   : > { %5735 = vmatprep.subr.bf16.mxu0 %v6307_v41 }
  0xec   : > { %v1044_v46 = vsel %vm1033_vm3, %v1041_v1, %v1043_v61 }
  0xee   : > { %5736 = vmatpush3.bf16.msra.mxu0 %v6307_v41  ;;  %v1042_v41 = vsel %vm1033_vm3, %v1039_v19, %v1041_v1  ;;  %v3132_v1 = vshll.u32 %v6974_v29, 16 }
  0xef   : > { %5737 = vmatprep.subr.bf16.mxu0 %v6312_v18 }
  0xf0   : > { %5458 = vmatmul.mubr.bf16.gmra.mrb[24].mxu1 %v6872_v8  ;;  %v4901_v8 = vcombine.low %v1013_v63, %v6340_v2  ;;  %v6347_v63 = vld [vmem:[%s6723_s11 + $0x38] sm:$0xff]  }
  0xf1   : > { %5702 = vmatmul.mubr.bf16.gmra.mrb[8].mxu0 %v2777_v24  ;;  %5461 = vmatprep.mubr.bf16.mxu1 %v6883_v22  ;;  %v7029_v22 = vld [vmem:[%s6723_s11 + $0x68] sm:$0xff]   ;;  %v7076_v24 = vld [vmem:[%s6723_s11 + $0x98] sm:$0xff]  }
  0xf2   : > { %5705 = vmatprep.mubr.bf16.mxu0 %v2779_v49  ;;  %5738 = vmatpush3.bf16.msra.mxu0 %v6312_v18  ;;  %v1034_v15 = vrot.slane %v4901_v8, 1  ;;  %v2786_v7 = vrot.slane %v7029_v22, 2  ;;  %v2795_v18 = vsel %vm2302_vm2, %v2792_v42, %v2794_v32  ;;  %v6323_v49 = vld [vmem:[#allocation5 + $0xd8] sm:$0xff]   ;;  %v2798_v2 = vrot.slane %v7076_v24, 2 }
  0xf3   : > { %5739 = vmatprep.subr.bf16.mxu0 %v6316_v59  ;;  %v3106_v8 = vshll.u32 %v6963_v60, 16 }
  0xf4   : > { %v2787_v38 = vsel %vm2302_vm2, %v2784_v6, %v2786_v7  ;;  %v2789_v21 = vsel %vm2302_vm2, %v2786_v7, %v2788_v56  ;;  %v6322_v7 = vld [vmem:[%s6723_s11 + $0xa0] ss:$0 sps:$4 sm:$0x33]  }
  0xf5   : > { %v6348_v56 = vld [vmem:[%s6723_s11 + $0x40] sm:$0xff]  }
  0xf6   : > { %5740 = vmatpush3.bf16.msra.mxu0 %v6316_v59  ;;  %v6346_v59 = vld [vmem:[%s6723_s11 + $0x30] sm:$0xff]   ;;  %v1049_v17 = vrot.slane %v6348_v56, 1 }
  0xf7   : > { %5741 = vmatprep.subr.bf16.mxu0 %v6320_v0  ;;  %v1045_v54 = vrot.slane %v6346_v59, 1  ;;  %v6350_v59 = vld [vmem:[%s6723_s11 + $0x50] sm:$0xff]  }
  0xf8   : > { %5462 = vmatmul.mubr.bf16.gmra.mrb[28].mxu1 %v6887_v33  ;;  %v2785_v33 = vsel %vm2302_vm2, %v2782_v57, %v2784_v6  ;;  %v2796_v57 = vrot.slane %v7072_v48, 2  ;;  %v6325_v6 = vld [vmem:[#allocation5 + $0xe0] sm:$0xff]  }
  0xf9   : > { %5706 = vmatmul.mubr.bf16.gmra.mrb[12].mxu0 %v2781_v14  ;;  %5465 = vmatprep.mubr.bf16.mxu1 %v6899_v47  ;;  %v1036_v47 = vsel %vm1033_vm3, %v1034_v15, %v1035_v25  ;;  %v3103_v14 = vshrl.u32 %v6963_v60, 16  ;;  %v1046_v15 = vsel %vm1033_vm3, %v1043_v61, %v1045_v54 }
  0xfa   : > { %5709 = vmatprep.mubr.bf16.mxu0 %v2783_v4  ;;  %5742 = vmatpush3.bf16.msra.mxu0 %v6320_v0  ;;  %v1047_v0 = vrot.slane %v6347_v63, 1  ;;  %v3111_v4 = vshrl.u32 %v6959_v13, 16  ;;  %v2797_v55 = vsel %vm2302_vm2, %v2794_v32, %v2796_v57  ;;  %v6351_v63 = vld [vmem:[%s6723_s11 + $0x58] sm:$0xff]  }
  0xfb   : > { %5743 = vmatprep.subr.bf16.mxu0 %v6324_v5 }
  0xfc   : > { %v1048_v25 = vsel %vm1033_vm3, %v1045_v54, %v1047_v0  ;;  %v3113_v60 = vrot.slane %v3111_v4, 2  ;;  %v1050_v43 = vsel %vm1033_vm3, %v1047_v0, %v1049_v17  ;;  %v1053_v54 = vrot.slane %v6350_v59, 1 }
  0xfd   : > { %v1055_v0 = vrot.slane %v6351_v63, 1  ;;  %v3147_v4 = vshrl.u32 %v6988_v40, 16 }
  0xfe   : > { %5744 = vmatpush3.bf16.msra.mxu0 %v6324_v5  ;;  %v3114_v5 = vshll.u32 %v6959_v13, 16 }
  0xff   : > { %5781 = vmatprep.subr.bf16.mxu0 %v7036_v62 }
 0x100   : > { %5466 = vmatmul.mubr.bf16.gmra.mrb[32].mxu1 %v6903_v51  ;;  %v1040_v51 = vsel %vm1033_vm3, %v1037_v16, %v1039_v19  ;;  %v3116_v53 = vrot.slane %v3114_v5, 3  ;;  %v6327_v16 = vld [vmem:[#allocation5 + $0xe8] sm:$0xff]   ;;  %v2800_v19 = vrot.slane %v6322_v7, 2  ;;  %v3150_v5 = vshll.u32 %v6988_v40, 16 }
 0x101   : > { %5710 = vmatmul.mubr.bf16.gmra.mrb[16].mxu0 %v2785_v33  ;;  %5485 = vmatprep.mubr.bf16.mxu1 %v1036_v47  ;;  %v3105_v33 = vrot.slane %v3103_v14, 2  ;;  %v2799_v47 = vsel %vm2302_vm2, %v2796_v57, %v2798_v2  ;;  %v3138_v14 = vshrl.u32 %v6985_v39, 16 }
 0x102   : > { %5713 = vmatprep.mubr.bf16.mxu0 %v2787_v38  ;;  %v3108_v38 = vrot.slane %v3106_v8, 3  ;;  %v2801_v61 = vsel %vm2302_vm2, %v2798_v2, %v2800_v19  ;;  %v3141_v2 = vshll.u32 %v6985_v39, 16 }
 0x104   : > { %v3143_v7 = vrot.slane %v3141_v2, 3  ;;  %v3174_v2 = vshrl.u32 %v7011_v50, 16 }
 0x108   : > { %5486 = vmatmul.mubr.bf16.vlgmr.msra.gmra.mrb[0].mxu1 %v1038_v26 }
 0x109   : > { %5714 = vmatmul.mubr.bf16.gmra.mrb[20].mxu0 %v2789_v21  ;;  %5522 = vmatpush3.bf16.msra.mxu1 %v6981_v36  ;;  %v2793_v36 = vsel %vm2302_vm2, %v2790_v20, %v2792_v42  ;;  %v6349_v20 = vld [vmem:[%s6723_s11 + $0x48] sm:$0xff]   ;;  %v3120_v21 = vshrl.u32 %v6971_v27, 16  ;;  %v6329_v42 = vld [vmem:[#allocation5 + $0xf0] sm:$0xff]  }
 0x10a   : > { %5489 = vmatprep.mubr.bf16.mxu1 %v1040_v51  ;;  %5717 = vmatprep.mubr.bf16.mxu0 %v2791_v30  ;;  %v1051_v26 = vrot.slane %v6349_v20, 1  ;;  %v3123_v51 = vshll.u32 %v6971_v27, 16  ;;  %v3109_v30 = vor.u32 %v3108_v38, %v3105_v33  ;;  %v3152_v38 = vrot.slane %v3150_v5, 3 }
 0x10b   : > { %5523 = vmatprep.subr.bf16.mxu1 %v6315_v34  ;;  %v3122_v32 = vrot.slane %v3120_v21, 2  ;;  %v3159_v21 = vshll.u32 %v6999_v45, 16  ;;  %v3183_v5 = vshrl.u32 %v7015_v52, 16 }
 0x10d   : > { %5524 = vmatpush3.bf16.msra.mxu1 %v6315_v34  ;;  %v3117_v34 = vor.u32 %v3116_v53, %v3113_v60  ;;  %v6328_v60 = vld [vmem:[#allocation5 + $0x208] sm:$0xff]   ;;  %v7111_v53 = vld [vmem:[#allocation5 + $0x100] sm:$0xff]  }
 0x10e   : > { %5525 = vmatprep.subr.bf16.mxu1 %v6319_v44 }
 0x110   : > { %5490 = vmatmul.mubr.bf16.gmra.mrb[4].mxu1 %v1042_v41  ;;  %v3125_v41 = vrot.slane %v3123_v51, 3 }
 0x111   : > { %5718 = vmatmul.mubr.bf16.gmra.mrb[24].mxu0 %v2793_v36  ;;  %5493 = vmatprep.mubr.bf16.mxu1 %v1044_v46  ;;  %v3118_v36 = vsel %vm3101_vm4, %v3109_v30, %v3117_v34  ;;  %v3131_v46 = vrot.slane %v3129_v58, 2  ;;  %v3165_v30 = vshrl.u32 %v7003_v28, 16  ;;  %v6330_v58 = vld [vmem:[#allocation5 + $0x210] sm:$0xff]  }
 0x112   : > { %5721 = vmatprep.mubr.bf16.mxu0 %v2795_v18  ;;  %5526 = vmatpush3.bf16.msra.mxu1 %v6319_v44  ;;  %v1052_v44 = vsel %vm1033_vm3, %v1049_v17, %v1051_v26  ;;  %v3134_v18 = vrot.slane %v3132_v1, 3  ;;  %v3126_v57 = vor.u32 %v3125_v41, %v3122_v32  ;;  %v6354_v17 = vld [vmem:[%s6723_s11 + $0x68] sm:$0xff]   ;;  %v7122_v1 = vld [vmem:[%s6723_s11 + $0xa0] ss:$0 sps:$4 sm:$0x77]   ;;  %v3161_v32 = vrot.slane %v3159_v21, 3 }
 0x113   : > { %5527 = vmatprep.subr.bf16.mxu1 %v6323_v49  ;;  %v1059_v19 = vrot.slane %v6354_v17, 1  ;;  %v3607_v41 = vrot.slane %v7122_v1, 3  ;;  %v6357_v17 = vld [vmem:[%s6723_s11 + $0x80] sm:$0xff]  }
 0x114   : > { %v3135_v8 = vor.u32 %v3134_v18, %v3131_v46  ;;  %v3167_v46 = vrot.slane %v3165_v30, 2  ;;  %v3195_v30 = vshll.u32 %v7024_v35, 16 }
 0x116   : > { %5528 = vmatpush3.bf16.msra.mxu1 %v6323_v49  ;;  %v6331_v49 = vld [vmem:[#allocation5 + $0xf8] sm:$0xff]   ;;  %v3136_v33 = vsel %vm3101_vm4, %v3126_v57, %v3135_v8 }
 0x117   : > { %5529 = vmatprep.subr.bf16.mxu1 %v6325_v6 }
 0x118   : > { %5494 = vmatmul.mubr.bf16.gmra.mrb[8].mxu1 %v1046_v15  ;;  %v3127_v15 = vsel %vm3101_vm4, %v3117_v34, %v3126_v57  ;;  %v3168_v34 = vshll.u32 %v7003_v28, 16 }
 0x119   : > { %5722 = vmatmul.mubr.bf16.gmra.mrb[28].mxu0 %v2797_v55  ;;  %5497 = vmatprep.mubr.bf16.mxu1 %v1048_v25  ;;  %v1056_v55 = vsel %vm1033_vm3, %v1053_v54, %v1055_v0  ;;  %v3140_v25 = vrot.slane %v3138_v14, 2 }
 0x11a   : > { %5725 = vmatprep.mubr.bf16.mxu0 %v2799_v47  ;;  %5530 = vmatpush3.bf16.msra.mxu1 %v6325_v6  ;;  %v1054_v6 = vsel %vm1033_vm3, %v1051_v26, %v1053_v54  ;;  %v3149_v47 = vrot.slane %v3147_v4, 2  ;;  %v3156_v26 = vshrl.u32 %v6999_v45, 16  ;;  %v3170_v18 = vrot.slane %v3168_v34, 3  ;;  %v6355_v54 = vld [vmem:[%s6723_s11 + $0x70] sm:$0xff]  }
 0x11b   : > { %5531 = vmatprep.subr.bf16.mxu1 %v6327_v16  ;;  %v3144_v20 = vor.u32 %v3143_v7, %v3140_v25  ;;  %v1061_v57 = vrot.slane %v6355_v54, 1  ;;  %v6337_v54 = vld [vmem:[#allocation5 + $0x238] sm:$0xff]  }
 0x11c   : > { %v3153_v51 = vor.u32 %v3152_v38, %v3149_v47  ;;  %v3171_v4 = vor.u32 %v3170_v18, %v3167_v46 }
 0x11e   : > { %5532 = vmatpush3.bf16.msra.mxu1 %v6327_v16  ;;  %v6353_v16 = vld [vmem:[%s6723_s11 + $0x60] sm:$0xff]  }
 0x11f   : > { %5533 = vmatprep.subr.bf16.mxu1 %v6329_v42  ;;  %v1057_v56 = vrot.slane %v6353_v16, 1 }
 0x120   : > { %5498 = vmatmul.mubr.bf16.gmra.mrb[12].mxu1 %v1050_v43 }
 0x121   : > { %5726 = vmatmul.mubr.bf16.gmra.mrb[32].mxu0 %v2801_v61  ;;  %5501 = vmatprep.mubr.bf16.mxu1 %v1052_v44  ;;  %v1058_v43 = vsel %vm1033_vm3, %v1055_v0, %v1057_v56  ;;  %v1060_v61 = vsel %vm1033_vm3, %v1057_v56, %v1059_v19  ;;  %v3158_v44 = vrot.slane %v3156_v26, 2  ;;  %v6356_v0 = vld [vmem:[%s6723_s11 + $0x78] sm:$0xff]   ;;  %v6334_v56 = vld [vmem:[#allocation5 + $0x228] sm:$0xff]  }
 0x122   : > { %5745 = vmatprep.mubr.bf16.mxu0 %v3118_v36  ;;  %5534 = vmatpush3.bf16.msra.mxu1 %v6329_v42  ;;  %v3605_v42 = vrot.slane %v7076_v24, 3  ;;  %v3154_v36 = vsel %vm3101_vm4, %v3144_v20, %v3153_v51  ;;  %v1063_v14 = vrot.slane %v6356_v0, 1  ;;  %v6358_v26 = vld [vmem:[%s6723_s11 + $0x88] sm:$0xff]  }
 0x123   : > { %5535 = vmatprep.subr.bf16.mxu1 %v6331_v49  ;;  %v3162_v63 = vor.u32 %v3161_v32, %v3158_v44  ;;  %v1067_v21 = vrot.slane %v6358_v26, 1 }
 0x124   : > { %v7133_v59 = vsel %vm3571_vm5, %v3605_v42, %v3607_v41  ;;  %v1064_v7 = vsel %vm1033_vm3, %v1061_v57, %v1063_v14 }
 0x125   : > { %v3163_v25 = vsel %vm3101_vm4, %v3153_v51, %v3162_v63  ;;  %v3172_v38 = vsel %vm3101_vm4, %v3162_v63, %v3171_v4  ;;  %v3192_v51 = vshrl.u32 %v7024_v35, 16  ;;  %v1496_v63 = vrot.slane %v6748_v23, 1 }
 0x126   : > { %5536 = vmatpush3.bf16.msra.mxu1 %v6331_v49  ;;  %v6332_v49 = vld [vmem:[#allocation5 + $0x218] sm:$0xff]  }
 0x127   : > { %5833 = vmatprep.subr.bf16.mxu1 %v7111_v53  ;;  %v3194_v41 = vrot.slane %v3192_v51, 2  ;;  %v3237_v51 = vshrl.u32 %v7061_v3, 16 }
 0x128   : > { %5502 = vmatmul.mubr.bf16.gmra.mrb[16].mxu1 %v1054_v6  ;;  %v3186_v6 = vshll.u32 %v7015_v52, 16 }
 0x129   : > { %5746 = vmatmul.mubr.bf16.vlgmr.msra.gmra.mrb[0].mxu0 %v3127_v15  ;;  %5505 = vmatprep.mubr.bf16.mxu1 %v1056_v55  ;;  %v6333_v15 = vld [vmem:[#allocation5 + $0x220] sm:$0xff]   ;;  %v1062_v55 = vsel %vm1033_vm3, %v1059_v19, %v1061_v57  ;;  %v1069_v57 = vrot.slane %v6919_v10, 1 }
 0x12a   : > { %5749 = vmatprep.mubr.bf16.mxu0 %v3136_v33  ;;  %5782 = vmatpush3.bf16.msra.mxu0 %v7036_v62  ;;  %v3145_v62 = vsel %vm3101_vm4, %v3135_v8, %v3144_v20  ;;  %v3177_v8 = vshll.u32 %v7011_v50, 16  ;;  %v3176_v33 = vrot.slane %v3174_v2, 2  ;;  %v3188_v16 = vrot.slane %v3186_v6, 3 }
 0x12b   : > { %5783 = vmatprep.subr.bf16.mxu0 %v6328_v60  ;;  %v1065_v20 = vrot.slane %v6357_v17, 1  ;;  %v3219_v6 = vshrl.u32 %v7045_v12, 16  ;;  %v1070_v10 = vsel %vm1033_vm3, %v1067_v21, %v1069_v57  ;;  %v3228_v17 = vshrl.u32 %v7056_v31, 16 }
 0x12c   : > { %v3179_v47 = vrot.slane %v3177_v8, 3  ;;  %v3210_v8 = vshrl.u32 %v7041_v9, 16  ;;  %v3246_v57 = vshrl.u32 %v7072_v48, 16 }
 0x12d   : > { %v1068_v32 = vsel %vm1033_vm3, %v1065_v20, %v1067_v21 }
 0x12e   : > { %5784 = vmatpush3.bf16.msra.mxu0 %v6328_v60  ;;  %v3185_v60 = vrot.slane %v3183_v5, 2  ;;  %v3180_v19 = vor.u32 %v3179_v47, %v3176_v33  ;;  %v3221_v47 = vrot.slane %v3219_v6, 2  ;;  %v3248_v6 = vrot.slane %v3246_v57, 2 }
 0x12f   : > { %5785 = vmatprep.subr.bf16.mxu0 %v6330_v58 }
 0x130   : > { %5506 = vmatmul.mubr.bf16.gmra.mrb[20].mxu1 %v1058_v43  ;;  %v3189_v34 = vor.u32 %v3188_v16, %v3185_v60  ;;  %v3204_v43 = vshll.u32 %v7029_v22, 16  ;;  %v3181_v44 = vsel %vm3101_vm4, %v3171_v4, %v3180_v19  ;;  %v3213_v4 = vshll.u32 %v7041_v9, 16  ;;  %v6360_v60 = vld [vmem:[%s6723_s11 + $0x18] sm:$0xff]  }
 0x131   : > { %5750 = vmatmul.mubr.bf16.gmra.mrb[4].mxu0 %v3145_v62  ;;  %5509 = vmatprep.mubr.bf16.mxu1 %v1060_v61  ;;  %v6335_v61 = vld [vmem:[#allocation5 + $0x230] sm:$0xff]   ;;  %v1066_v62 = vsel %vm1033_vm3, %v1063_v14, %v1065_v20  ;;  %v1499_v16 = vrot.slane %v6360_v60, 1  ;;  %v3231_v20 = vshll.u32 %v7056_v31, 16 }
 0x132   : > { %5753 = vmatprep.mubr.bf16.mxu0 %v3154_v36  ;;  %5786 = vmatpush3.bf16.msra.mxu0 %v6330_v58  ;;  %v3201_v58 = vshrl.u32 %v7029_v22, 16  ;;  %v3197_v36 = vrot.slane %v3195_v30, 3  ;;  %v3190_v46 = vsel %vm3101_vm4, %v3180_v19, %v3189_v34  ;;  %v6359_v14 = vld [vmem:[%s6723_s11 + $0x10] sm:$0xff]   ;;  %v6361_v19 = vld [vmem:[%s6723_s11 + $0x20] sm:$0xff]   ;;  %v3240_v30 = vshll.u32 %v7061_v3, 16 }
 0x133   : > { %5787 = vmatprep.subr.bf16.mxu0 %v6332_v49  ;;  %v1497_v2 = vrot.slane %v6359_v14, 1  ;;  %v1501_v26 = vrot.slane %v6361_v19, 1  ;;  %v3551_v19 = vld [vmem:[%s6723_s11 + $0x10] sm:$0x8] }
 0x134   : > { %v3203_v18 = vrot.slane %v3201_v58, 2  ;;  %v3198_v0 = vor.u32 %v3197_v36, %v3194_v41  ;;  %v3242_v41 = vrot.slane %v3240_v30, 3  ;;  %v6362_v36 = vld [vmem:[%s6723_s11 + $0x28] sm:$0xff]  }
 0x136   : > { %5788 = vmatpush3.bf16.msra.mxu0 %v6332_v49  ;;  %v3206_v49 = vrot.slane %v3204_v43, 3  ;;  %v3199_v23 = vsel %vm3101_vm4, %v3189_v34, %v3198_v0  ;;  %v1500_v34 = vsel %vm1033_vm3, %v1497_v2, %v1499_v16  ;;  %v3230_v43 = vrot.slane %v3228_v17, 2 }
 0x137   : > { %5789 = vmatprep.subr.bf16.mxu0 %v6333_v15 }
 0x138   : > { %5510 = vmatmul.mubr.bf16.gmra.mrb[24].mxu1 %v1062_v55  ;;  %v3207_v5 = vor.u32 %v3206_v49, %v3203_v18  ;;  %v1498_v55 = vsel %vm1033_vm3, %v1496_v63, %v1497_v2  ;;  %v6363_v49 = vld [vmem:[%s6723_s11 + $0x30] sm:$0xff]   ;;  %v3249_v63 = vshll.u32 %v7072_v48, 16  ;;  %v3255_v2 = vshrl.u32 %v7076_v24, 16 }
 0x139   : > { %5754 = vmatmul.mubr.bf16.gmra.mrb[8].mxu0 %v3163_v25  ;;  %5513 = vmatprep.mubr.bf16.mxu1 %v1064_v7  ;;  %v3212_v25 = vrot.slane %v3210_v8, 2  ;;  %v3215_v7 = vrot.slane %v3213_v4, 3  ;;  %v3258_v8 = vshll.u32 %v7076_v24, 16 }
 0x13a   : > { %5757 = vmatprep.mubr.bf16.mxu0 %v3172_v38  ;;  %5790 = vmatpush3.bf16.msra.mxu0 %v6333_v15  ;;  %v3222_v15 = vshll.u32 %v7045_v12, 16  ;;  %v3208_v33 = vsel %vm3101_vm4, %v3198_v0, %v3207_v5  ;;  %v6364_v0 = vld [vmem:[#allocation5 + $0x108] sm:$0xff]  }
 0x13b   : > { %5791 = vmatprep.subr.bf16.mxu0 %v6334_v56 }
 0x13c   : > { %v3224_v38 = vrot.slane %v3222_v15, 3  ;;  %v3251_v15 = vrot.slane %v3249_v63, 3  ;;  %v6373_v63 = vld [vmem:[#allocation5 + $0x130] sm:$0xff]  }
 0x13e   : > { %5792 = vmatpush3.bf16.msra.mxu0 %v6334_v56  ;;  %v3216_v56 = vor.u32 %v3215_v7, %v3212_v25  ;;  %v3225_v21 = vor.u32 %v3224_v38, %v3221_v47  ;;  %v3260_v25 = vrot.slane %v3258_v8, 3  ;;  %v6366_v7 = vld [vmem:[%s6723_s11 + $0x38] sm:$0xff]   ;;  %v3252_v47 = vor.u32 %v3251_v15, %v3248_v6  ;;  %v6367_v38 = vld [vmem:[%s6723_s11 + $0x40] sm:$0xff]  }
 0x13f   : > { %5793 = vmatprep.subr.bf16.mxu0 %v6335_v61  ;;  %v1509_v60 = vrot.slane %v6367_v38, 1 }
 0x140   : > { %5514 = vmatmul.mubr.bf16.gmra.mrb[28].mxu1 %v1066_v62  ;;  %v3217_v58 = vsel %vm3101_vm4, %v3207_v5, %v3216_v56  ;;  %v1502_v62 = vsel %vm1033_vm3, %v1499_v16, %v1501_v26  ;;  %v3264_v16 = vshrl.u32 %v7122_v1, 16 }
 0x141   : > { %5758 = vmatmul.mubr.bf16.gmra.mrb[12].mxu0 %v3181_v44  ;;  %5517 = vmatprep.mubr.bf16.mxu1 %v1068_v32  ;;  %v3226_v44 = vsel %vm3101_vm4, %v3216_v56, %v3225_v21  ;;  %v3239_v32 = vrot.slane %v3237_v51, 2  ;;  %v3267_v56 = vshll.u32 %v7122_v1, 16  ;;  %v6369_v1 = vld [vmem:[#allocation5 + $0x120] sm:$0xff]  }
 0x142   : > { %5761 = vmatprep.mubr.bf16.mxu0 %v3190_v46  ;;  %5794 = vmatpush3.bf16.msra.mxu0 %v6335_v61  ;;  %v3233_v61 = vrot.slane %v3231_v20, 3  ;;  %v1503_v46 = vrot.slane %v6362_v36, 1  ;;  %v6368_v20 = vld [vmem:[#allocation5 + $0x118] sm:$0xff]   ;;  %v3266_v30 = vrot.slane %v3264_v16, 2 }
 0x143   : > { %5795 = vmatprep.subr.bf16.mxu0 %v6337_v54  ;;  %v3243_v14 = vor.u32 %v3242_v41, %v3239_v32  ;;  %v7199_v32 = vld [vmem:[%s6723_s11 + $0x50] sm:$0xff]   ;;  %v7236_v16 = vld [vmem:[%s6723_s11 + $0x78] sm:$0xff]  }
 0x144   : > { %v3234_v18 = vor.u32 %v3233_v61, %v3230_v43  ;;  %v4991_v43 = vcombine.low %v3551_v19, %v6955_v11  ;;  %v6370_v61 = vld [vmem:[%s6723_s11 + $0x48] sm:$0xff]   ;;  %v1513_v41 = vrot.slane %v7199_v32, 1 }
 0x146   : > { %5796 = vmatpush3.bf16.msra.mxu0 %v6337_v54  ;;  %v1505_v54 = vrot.slane %v6363_v49, 1  ;;  %v3235_v4 = vsel %vm3101_vm4, %v3225_v21, %v3234_v18  ;;  %v3253_v21 = vsel %vm3101_vm4, %v3243_v14, %v3252_v47  ;;  %v3572_v36 = vrot.slane %v4991_v43, 3 }
 0x147   : > { %v1914_v43 = vshrl.u32 %v7199_v32, 16 }
 0x148   : > { %5518 = vmatmul.mubr.bf16.gmra.mrb[32].mxu1 %v1070_v10  ;;  %v1506_v5 = vsel %vm1033_vm3, %v1503_v46, %v1505_v54  ;;  %v6365_v10 = vld [vmem:[#allocation5 + $0x110] sm:$0xff]  }
 0x149   : > { %5762 = vmatmul.mubr.bf16.gmra.mrb[16].mxu0 %v3199_v23  ;;  %5537 = vmatprep.mubr.bf16.mxu1 %v1498_v55  ;;  %v3244_v23 = vsel %vm3101_vm4, %v3234_v18, %v3243_v14  ;;  %v3257_v55 = vrot.slane %v3255_v2, 2  ;;  %v6372_v18 = vld [vmem:[#allocation5 + $0x128] sm:$0xff]   ;;  %v3575_v14 = vrot.slane %v6971_v27, 3  ;;  %v7213_v2 = vld [vmem:[%s6723_s11 + $0x60] sm:$0xff]  }
 0x14a   : > { %5765 = vmatprep.mubr.bf16.mxu0 %v3208_v33  ;;  %v1507_v33 = vrot.slane %v6366_v7, 1  ;;  %v1517_v8 = vrot.slane %v7213_v2, 1  ;;  %v7222_v27 = vld [vmem:[%s6723_s11 + $0x68] sm:$0xff]   ;;  %v3581_v7 = vrot.slane %v6988_v40, 3  ;;  %v3583_v40 = vrot.slane %v6999_v45, 3 }
 0x14b   : > { %v3261_v17 = vor.u32 %v3260_v25, %v3257_v55  ;;  %v7227_v55 = vld [vmem:[%s6723_s11 + $0x70] sm:$0xff]  }
 0x14c   : > { %v1510_v51 = vsel %vm1033_vm3, %v1507_v33, %v1509_v60  ;;  %v1521_v25 = vrot.slane %v7227_v55, 1 }
 0x150   : > { %5538 = vmatmul.mubr.bf16.vlgmr.msra.gmra.mrb[0].mxu1 %v1500_v34  ;;  %v3269_v34 = vrot.slane %v3267_v56, 3  ;;  %v7241_v56 = vld [vmem:[%s6723_s11 + $0x80] sm:$0xff]  }
 0x151   : > { %5766 = vmatmul.mubr.bf16.gmra.mrb[20].mxu0 %v3217_v58  ;;  %5841 = vmatpush3.bf16.msra.mxu1 %v7111_v53  ;;  %v1504_v53 = vsel %vm1033_vm3, %v1501_v26, %v1503_v46  ;;  %v1508_v26 = vsel %vm1033_vm3, %v1505_v54, %v1507_v33  ;;  %v3262_v58 = vsel %vm3101_vm4, %v3252_v47, %v3261_v17  ;;  %v3573_v46 = vrot.slane %v6959_v13, 3 }
 0x152   : > { %5541 = vmatprep.mubr.bf16.mxu1 %v1502_v62  ;;  %5769 = vmatprep.mubr.bf16.mxu0 %v3226_v44  ;;  %v1511_v62 = vrot.slane %v6370_v61, 1  ;;  %v3270_v44 = vor.u32 %v3269_v34, %v3266_v30  ;;  %v7250_v30 = vld [vmem:[%s6723_s11 + $0x88] sm:$0xff]   ;;  %v3587_v34 = vrot.slane %v7011_v50, 3  ;;  %v3589_v61 = vrot.slane %v7015_v52, 3 }
 0x153   : > { %5834 = vmatprep.subr.bf16.mxu1 %v6364_v0  ;;  %v3574_v57 = vsel %vm3571_vm5, %v3572_v36, %v3573_v46  ;;  %v3576_v6 = vsel %vm3571_vm5, %v3573_v46, %v3575_v14  ;;  %v1527_v45 = vrot.slane %v7250_v30, 1  ;;  %v1916_v46 = vrot.slane %v1914_v43, 1 }
 0x154   : > { %v1512_v11 = vsel %vm1033_vm3, %v1509_v60, %v1511_v62  ;;  %v3271_v49 = vsel %vm3101_vm4, %v3261_v17, %v3270_v44  ;;  %v1514_v54 = vsel %vm1033_vm3, %v1511_v62, %v1513_v41  ;;  %v1525_v17 = vrot.slane %v7241_v56, 1  ;;  %v6339_v44 = vld [vmem:[%s6723_s11 + $0x98] ss:$0 sps:$4 sm:$0x11]  }
 0x155   : > { %5842 = vmatpush3.bf16.msra.mxu1 %v6364_v0  ;;  %v7208_v0 = vld [vmem:[%s6723_s11 + $0x58] sm:$0xff]   ;;  %v3590_v50 = vsel %vm3571_vm5, %v3587_v34, %v3589_v61  ;;  %v3591_v52 = vrot.slane %v7024_v35, 3 }
 0x156   : > { %5835 = vmatprep.subr.bf16.mxu1 %v6365_v10  ;;  %v1515_v13 = vrot.slane %v7208_v0, 1  ;;  %v1528_v62 = vsel %vm1033_vm3, %v1525_v17, %v1527_v45 }
 0x158   : > { %5542 = vmatmul.mubr.bf16.gmra.mrb[4].mxu1 %v1504_v53  ;;  %v3577_v53 = vrot.slane %v6974_v29, 3  ;;  %v1518_v15 = vsel %vm1033_vm3, %v1515_v13, %v1517_v8  ;;  %v3579_v29 = vrot.slane %v6985_v39, 3  ;;  %v1523_v39 = vrot.slane %v7236_v16, 1 }
 0x159   : > { %5770 = vmatmul.mubr.bf16.gmra.mrb[24].mxu0 %v3235_v4  ;;  %5545 = vmatprep.mubr.bf16.mxu1 %v1506_v5  ;;  %v6376_v4 = vld [vmem:[#allocation5 + $0x138] sm:$0xff]   ;;  %v1516_v5 = vsel %vm1033_vm3, %v1513_v41, %v1515_v13  ;;  %v3593_v13 = vrot.slane %v7029_v22, 3  ;;  %v1944_v22 = vshll.u32 %v7222_v27, 16 }
 0x15a   : > { %5773 = vmatprep.mubr.bf16.mxu0 %v3244_v23  ;;  %5843 = vmatpush3.bf16.msra.mxu1 %v6365_v10  ;;  %v3578_v10 = vsel %vm3571_vm5, %v3575_v14, %v3577_v53  ;;  %v1519_v23 = vrot.slane %v7222_v27, 1  ;;  %v3580_v47 = vsel %vm3571_vm5, %v3577_v53, %v3579_v29  ;;  %v3582_v60 = vsel %vm3571_vm5, %v3579_v29, %v3581_v7 }
 0x15b   : > { %5836 = vmatprep.subr.bf16.mxu1 %v6368_v20  ;;  %v1524_v19 = vsel %vm1033_vm3, %v1521_v25, %v1523_v39  ;;  %v3594_v35 = vsel %vm3571_vm5, %v3591_v52, %v3593_v13  ;;  %v1950_v29 = vshrl.u32 %v7227_v55, 16 }
 0x15c   : > { %v1520_v33 = vsel %vm1033_vm3, %v1517_v8, %v1519_v23  ;;  %v1522_v38 = vsel %vm1033_vm3, %v1519_v23, %v1521_v25  ;;  %v3597_v25 = vrot.slane %v7045_v12, 3  ;;  %v1962_v12 = vshll.u32 %v7236_v16, 16 }
 0x15e   : > { %5844 = vmatpush3.bf16.msra.mxu1 %v6368_v20  ;;  %v3585_v20 = vrot.slane %v7003_v28, 3  ;;  %v7255_v28 = vld [vmem:[%s6723_s11 + $0x90] sm:$0xff]  }
 0x15f   : > { %5837 = vmatprep.subr.bf16.mxu1 %v6369_v1 }
 0x160   : > { %5546 = vmatmul.mubr.bf16.gmra.mrb[8].mxu1 %v1508_v26  ;;  %v3584_v26 = vsel %vm3571_vm5, %v3581_v7, %v3583_v40  ;;  %v3588_v41 = vsel %vm3571_vm5, %v3585_v20, %v3587_v34  ;;  %v1964_v34 = vrot.slane %v1962_v12, 2 }
 0x161   : > { %5774 = vmatmul.mubr.bf16.gmra.mrb[28].mxu0 %v3253_v21  ;;  %5549 = vmatprep.mubr.bf16.mxu1 %v1510_v51  ;;  %v1526_v21 = vsel %vm1033_vm3, %v1523_v39, %v1525_v17  ;;  %v3586_v51 = vsel %vm3571_vm5, %v3583_v40, %v3585_v20  ;;  %v1952_v39 = vrot.slane %v1950_v29, 1  ;;  %v3599_v17 = vrot.slane %v7056_v31, 3 }
 0x162   : > { %5777 = vmatprep.mubr.bf16.mxu0 %v3262_v58  ;;  %5845 = vmatpush3.bf16.msra.mxu1 %v6369_v1  ;;  %v1529_v58 = vrot.slane %v7255_v28, 1  ;;  %v1917_v1 = vshll.u32 %v7199_v32, 16  ;;  %v1926_v32 = vshll.u32 %v7208_v0, 16 }
 0x163   : > { %5838 = vmatprep.subr.bf16.mxu1 %v6372_v18 }
 0x164   : > { %v1530_v36 = vsel %vm1033_vm3, %v1527_v45, %v1529_v58  ;;  %v1928_v53 = vrot.slane %v1926_v32, 2 }
 0x166   : > { %5846 = vmatpush3.bf16.msra.mxu1 %v6372_v18  ;;  %v1919_v18 = vrot.slane %v1917_v1, 2 }
 0x167   : > { %5839 = vmatprep.subr.bf16.mxu1 %v6373_v63 }
 0x168   : > { %5550 = vmatmul.mubr.bf16.gmra.mrb[12].mxu1 %v1512_v11  ;;  %v1531_v11 = vrot.slane %v6339_v44, 1 }
 0x169   : > { %5778 = vmatmul.mubr.bf16.gmra.mrb[32].mxu0 %v3271_v49  ;;  %5553 = vmatprep.mubr.bf16.mxu1 %v1514_v54  ;;  %v1923_v49 = vshrl.u32 %v7208_v0, 16  ;;  %v1920_v54 = vor.u32 %v1919_v18, %v1916_v46 }
 0x16a   : > { %5797 = vmatprep.mubr.bf16.mxu0 %v3574_v57  ;;  %5847 = vmatpush3.bf16.msra.mxu1 %v6373_v63  ;;  %v1932_v57 = vshrl.u32 %v7213_v2, 16  ;;  %v1935_v63 = vshll.u32 %v7213_v2, 16  ;;  %v1532_v14 = vsel %vm1033_vm3, %v1529_v58, %v1531_v11  ;;  %v1941_v2 = vshrl.u32 %v7222_v27, 16 }
 0x16b   : > { %5840 = vmatprep.subr.bf16.mxu1 %v6376_v4  ;;  %v1925_v8 = vrot.slane %v1923_v49, 1  ;;  %v3600_v58 = vsel %vm3571_vm5, %v3597_v25, %v3599_v17 }
 0x16c   : > { %v1934_v0 = vrot.slane %v1932_v57, 1 }
 0x16e   : > { %5848 = vmatpush3.bf16.msra.mxu1 %v6376_v4  ;;  %v3592_v4 = vsel %vm3571_vm5, %v3589_v61, %v3591_v52 }
 0x170   : > { %5554 = vmatmul.mubr.bf16.gmra.mrb[16].mxu1 %v1516_v5  ;;  %v1921_v5 = vsel %vm1832_vm1, %v6846_v37, %v1920_v54  ;;  %v1953_v37 = vshll.u32 %v7227_v55, 16  ;;  %v1959_v55 = vshrl.u32 %v7236_v16, 16 }
 0x171   : > { %5798 = vmatmul.mubr.bf16.vlgmr.msra.gmra.mrb[0].mxu0 %v3576_v6  ;;  %5557 = vmatprep.mubr.bf16.mxu1 %v1518_v15  ;;  %v1937_v6 = vrot.slane %v1935_v63, 2  ;;  %v1929_v15 = vor.u32 %v1928_v53, %v1925_v8 }
 0x172   : > { %5801 = vmatprep.mubr.bf16.mxu0 %v3578_v10  ;;  %v3595_v10 = vrot.slane %v7041_v9, 3  ;;  %v1955_v27 = vrot.slane %v1953_v37, 2  ;;  %v1961_v45 = vrot.slane %v1959_v55, 1 }
 0x173   : > { %v1938_v23 = vor.u32 %v1937_v6, %v1934_v0  ;;  %v1930_v7 = vsel %vm1832_vm1, %v1920_v54, %v1929_v15  ;;  %v6383_v54 = vld [vmem:[%s6723_s11 + $0x98] ss:$0 sps:$4 sm:$0x33]  }
 0x174   : > { %v3598_v40 = vsel %vm3571_vm5, %v3595_v10, %v3597_v25  ;;  %v1956_v20 = vor.u32 %v1955_v27, %v1952_v39  ;;  %v1965_v31 = vor.u32 %v1964_v34, %v1961_v45  ;;  %v1998_v57 = vshll.u32 %v6383_v54, 16 }
 0x176   : > { %v1966_v46 = vsel %vm1832_vm1, %v1956_v20, %v1965_v31  ;;  %v2000_v8 = vrot.slane %v1998_v57, 2 }
 0x178   : > { %5558 = vmatmul.mubr.bf16.gmra.mrb[20].mxu1 %v1520_v33  ;;  %v1943_v33 = vrot.slane %v1941_v2, 1 }
 0x179   : > { %5802 = vmatmul.mubr.bf16.gmra.mrb[4].mxu0 %v3580_v47  ;;  %5561 = vmatprep.mubr.bf16.mxu1 %v1522_v38  ;;  %v1946_v47 = vrot.slane %v1944_v22, 2  ;;  %v3596_v38 = vsel %vm3571_vm5, %v3593_v13, %v3595_v10 }
 0x17a   : > { %5805 = vmatprep.mubr.bf16.mxu0 %v3582_v60  ;;  %v1939_v60 = vsel %vm1832_vm1, %v1929_v15, %v1938_v23 }
 0x17b   : > { %v1947_v9 = vor.u32 %v1946_v47, %v1943_v33 }
 0x17d   : > { %v1957_v43 = vsel %vm1832_vm1, %v1947_v9, %v1956_v20 }
 0x180   : > { %5562 = vmatmul.mubr.bf16.gmra.mrb[24].mxu1 %v1524_v19  ;;  %v1968_v19 = vshrl.u32 %v7241_v56, 16 }
 0x181   : > { %5806 = vmatmul.mubr.bf16.gmra.mrb[8].mxu0 %v3584_v26  ;;  %5565 = vmatprep.mubr.bf16.mxu1 %v1526_v21  ;;  %v1971_v26 = vshll.u32 %v7241_v56, 16  ;;  %v3601_v21 = vrot.slane %v7061_v3, 3  ;;  %v1977_v56 = vshrl.u32 %v7250_v30, 16  ;;  %v1980_v3 = vshll.u32 %v7250_v30, 16 }
 0x182   : > { %5809 = vmatprep.mubr.bf16.mxu0 %v3586_v51  ;;  %v1948_v51 = vsel %vm1832_vm1, %v1938_v23, %v1947_v9  ;;  %v1970_v1 = vrot.slane %v1968_v19, 1 }
 0x183   : > { %v1973_v16 = vrot.slane %v1971_v26, 2  ;;  %v3602_v61 = vsel %vm3571_vm5, %v3599_v17, %v3601_v21  ;;  %v1979_v18 = vrot.slane %v1977_v56, 1 }
 0x185   : > { %v1974_v44 = vor.u32 %v1973_v16, %v1970_v1 }
 0x187   : > { %v1975_v49 = vsel %vm1832_vm1, %v1965_v31, %v1974_v44 }
 0x188   : > { %5566 = vmatmul.mubr.bf16.gmra.mrb[28].mxu1 %v1528_v62  ;;  %v3603_v62 = vrot.slane %v7072_v48, 3 }
 0x189   : > { %5810 = vmatmul.mubr.bf16.gmra.mrb[12].mxu0 %v3588_v41  ;;  %5569 = vmatprep.mubr.bf16.mxu1 %v1530_v36  ;;  %v1986_v41 = vshrl.u32 %v7255_v28, 16  ;;  %v1989_v36 = vshll.u32 %v7255_v28, 16  ;;  %v1995_v28 = vshrl.u32 %v6383_v54, 16 }
 0x18a   : > { %5813 = vmatprep.mubr.bf16.mxu0 %v3590_v50  ;;  %v1982_v50 = vrot.slane %v1980_v3, 2  ;;  %v3604_v11 = vsel %vm3571_vm5, %v3601_v21, %v3603_v62  ;;  %v3606_v48 = vsel %vm3571_vm5, %v3603_v62, %v3605_v42 }
 0x18b   : > { %v1988_v32 = vrot.slane %v1986_v41, 1  ;;  %v1991_v52 = vrot.slane %v1989_v36, 2 }
 0x18c   : > { %v1983_v30 = vor.u32 %v1982_v50, %v1979_v18 }
 0x18d   : > { %v1992_v63 = vor.u32 %v1991_v52, %v1988_v32 }
 0x18e   : > { %v1984_v13 = vsel %vm1832_vm1, %v1974_v44, %v1983_v30 }
 0x18f   : > { %v1993_v53 = vsel %vm1832_vm1, %v1983_v30, %v1992_v63 }
 0x190   : > { %5570 = vmatmul.mubr.bf16.gmra.mrb[32].mxu1 %v1532_v14  ;;  %v1997_v14 = vrot.slane %v1995_v28, 1 }
 0x191   : > { %5814 = vmatmul.mubr.bf16.gmra.mrb[16].mxu0 %v3592_v4  ;;  %5605 = vmatprep.mubr.bf16.mxu1 %v1921_v5 }
 0x192   : > { %5817 = vmatprep.mubr.bf16.mxu0 %v3594_v35  ;;  %v2001_v24 = vor.u32 %v2000_v8, %v1997_v14 }
 0x194   : > { %v2002_v42 = vsel %vm1832_vm1, %v1992_v63, %v2001_v24 }
 0x198   : > { %5606 = vmatmul.mubr.bf16.vlgmr.msra.gmra.mrb[16].mxu1 %v1930_v7 }
 0x199   : > { %5818 = vmatmul.mubr.bf16.gmra.mrb[20].mxu0 %v3596_v38  ;;  %5609 = vmatprep.mubr.bf16.mxu1 %v1939_v60 }
 0x19a   : > { %5821 = vmatprep.mubr.bf16.mxu0 %v3598_v40 }
 0x1a0   : > { %5610 = vmatmul.mubr.bf16.gmra.mrb[20].mxu1 %v1948_v51 }
 0x1a1   : > { %5822 = vmatmul.mubr.bf16.gmra.mrb[24].mxu0 %v3600_v58  ;;  %5613 = vmatprep.mubr.bf16.mxu1 %v1957_v43 }
 0x1a2   : > { %5825 = vmatprep.mubr.bf16.mxu0 %v3602_v61 }
 0x1a8   : > { %5614 = vmatmul.mubr.bf16.gmra.mrb[24].mxu1 %v1966_v46 }
 0x1a9   : > { %5826 = vmatmul.mubr.bf16.gmra.mrb[28].mxu0 %v3604_v11  ;;  %5617 = vmatprep.mubr.bf16.mxu1 %v1975_v49 }
 0x1aa   : > { %5829 = vmatprep.mubr.bf16.mxu0 %v3606_v48 }
 0x1b0   : > { %5618 = vmatmul.mubr.bf16.gmra.mrb[28].mxu1 %v1984_v13 }
 0x1b1   : > { %5830 = vmatmul.mubr.bf16.gmra.mrb[32].mxu0 %v7133_v59  ;;  %5621 = vmatprep.mubr.bf16.mxu1 %v1993_v53 }
 0x1b8   : > { %5622 = vmatmul.mubr.bf16.gmra.mrb[32].mxu1 %v2002_v42 }
 0x223   : > { %v5539_v4 = vpop.f32.mrb[0].mxu1 }
 0x224   : > { %v1633_v5 = vpop.f32.mrb[1].mxu1 }
 0x225   : > { %v5540_v0 = vpop.f32.mrb[2].mxu1 }
 0x226   : > { %v1636_v6 = vpop.f32.mrb[3].mxu1 }
 0x22b   : > { %v5543_v35 = vpop.f32.mrb[4].mxu1 }
 0x22c   : > { %v1649_v15 = vpop.f32.mrb[5].mxu1 }
 0x22d   : > { %v7313_v2 = vpop.f32.mrb[6].mxu1 }
 0x22e   : > { %v7315_v22 = vpop.f32.mrb[7].mxu1 }
 0x233   : > { %v7317_v10 = vpop.f32.mrb[8].mxu1 }
 0x234   : > { %v7319_v23 = vpop.f32.mrb[9].mxu1 }
 0x235   : > { %v7321_v59 = vpop.f32.mrb[10].mxu1 }
 0x236   : > { %v7323_v29 = vpop.f32.mrb[11].mxu1 }
 0x23b   : > { %v7325_v37 = vpop.f32.mrb[12].mxu1 }
 0x23c   : > { %v7327_v25 = vpop.f32.mrb[13].mxu1 }
 0x23d   : > { %v7329_v7 = vpop.f32.mrb[14].mxu1 }
 0x23e   : > { %v7331_v33 = vpop.f32.mrb[15].mxu1 }
 0x244   : > { %v5799_v47 = vpop.f32.mrb[0].mxu0 }
 0x245   : > { %v5849_v38 = vadd.f32 %v5799_v47, %v5539_v4  ;;  %v3709_v60 = vpop.f32.mrb[1].mxu0 }
 0x246   : > { %v5850_v39 = vadd.f32 %v3709_v60, %v1633_v5  ;;  %v5800_v27 = vpop.f32.mrb[2].mxu0 }
 0x247   : > { %v5065_v40 = vpack.c.bf16 %v5849_v38, %v5849_v38  ;;  %v5851_v9 = vadd.f32 %v5800_v27, %v5540_v0  ;;  %v3712_v55 = vpop.f32.mrb[3].mxu0  ;;  %v3959_v12 = vmul.f32 %v5849_v38, %v5849_v38  ;;  %v3944_v20 = vrot.slane %v5849_v38, 2 }
 0x248   : > { %v5852_v17 = vadd.f32 %v3712_v55, %v1636_v6  ;;  %v3906_v19 = vmul.f32 %v5850_v39, %v5850_v39 }
 0x249   : > { %v5066_v26 = vpack.c.bf16 %v5851_v9, %v5851_v9  ;;  %v3945_v21 = vrot.slane %v5851_v9, 2  ;;  %v7338_v45 = vmul.f32 %v5851_v9, %v5851_v9  ;;  %v5005_v1 = vrot.slane %v5065_v40, 9 }
 0x24a   : > { %v5111_v34 = vpack.c.bf16 %v5852_v17, %v5850_v39  ;;  %v3898_v58 = vadd.f32 %v5852_v17, %v5850_v39  ;;  %v3907_v43 = vmul.f32 %v5852_v17, %v5852_v17  ;;  %v3965_v31 = vrot.slane %v3959_v12, 2 }
 0x24b   : > { %v3931_v16 = vrot.slane %v5066_v26, 5  ;;  %v3946_v61 = vsel %vm2302_vm2, %v3944_v20, %v3945_v21  ;;  %v3966_v56 = vrot.slane %v7338_v45, 2 }
 0x24c   : > { %5112 = vst [vmem:[%s7342_s20] sm:$0xff] %v5111_v34   ;;  %v3899_v3 = vrot.slane %v3898_v58, 4  ;;  %v3908_v62 = vadd.f32 %v3907_v43, %v3906_v19  ;;  %v5803_v44 = vpop.f32.mrb[4].mxu0 }
 0x24d   : > { %v3932_v41 = vsel %vm7334_vm8, %v5005_v1, %v3931_v16  ;;  %v3933_v36 = vrot.slane %v3931_v16, 4  ;;  %v7347_v46 = vadd.f32 %v5803_v44, %v5543_v35  ;;  %v3725_v18 = vpop.f32.mrb[5].mxu0  ;;  %v3967_v50 = vsel %vm2302_vm2, %v3965_v31, %v3966_v56 }
 0x24e   : > { %3938 = vst [vmem:[%s7342_s20 + $0x8] sm:$0xf] %v3932_v41  ;;  %v3900_v11 = vadd.f32 %v3899_v3, %v3898_v58  ;;  %v3909_v49 = vrot.slane %v3908_v62, 4  ;;  %v7351_v32 = vadd.f32 %v3725_v18, %v1649_v15  ;;  %v5804_v52 = vpop.f32.mrb[6].mxu0 }
 0x24f   : > { %v7355_v48 = vpack.c.bf16 %v7347_v46, %v7347_v46  ;;  %v4010_v30 = vrot.slane %v7347_v46, 4  ;;  %v7360_v54 = vmul.f32 %v7347_v46, %v7347_v46  ;;  %v4068_v28 = vrot.slane %v7347_v46, 6  ;;  %v3728_v57 = vpop.f32.mrb[7].mxu0 }
 0x250   : > { %v3901_v63 = vrot.slane %v3900_v11, 2  ;;  %v3910_v13 = vadd.f32 %v3909_v49, %v3908_v62  ;;  %v5067_v14 = vpack.c.bf16 %v7351_v32, %v7351_v32  ;;  %v3947_v8 = vrot.slane %v7351_v32, 2 }
 0x251   : > { %v3998_v53 = vrot.slane %v7355_v48, 6  ;;  %v4029_v24 = vrot.slane %v7360_v54, 4  ;;  %v5013_v42 = vrot.slane %v7355_v48, 11  ;;  %v4087_v4 = vrot.slane %v7360_v54, 6 }
 0x252   : > { %v3902_v5 = vadd.f32 %v3901_v63, %v3900_v11  ;;  %v3911_v0 = vrot.slane %v3910_v13, 2  ;;  %v3934_v6 = vrot.slane %v5067_v14, 5  ;;  %v3948_v35 = vsel %vm2302_vm2, %v3945_v21, %v3947_v8 }
 0x253   : > { %v3951_v15 = vadd.f32 %v3948_v35, %v3946_v61  ;;  %v3961_v47 = vmul.f32 %v7351_v32, %v7351_v32  ;;  %v5009_v38 = vrot.slane %v5067_v14, 10  ;;  %v4007_v60 = vrot.slane %v7351_v32, 4 }
 0x254   : > { %v3903_v39 = vrot.slane %v3902_v5, 1  ;;  %v3912_v27 = vadd.f32 %v3911_v0, %v3910_v13  ;;  %v3935_v40 = vsel %vm7334_vm8, %v3933_v36, %v3934_v6  ;;  %v7377_v9 = vadd.f32 %v5804_v52, %v7313_v2  ;;  %v5807_v55 = vpop.f32.mrb[8].mxu0 }
 0x255   : > { %3939 = vst [vmem:[%s7342_s20 + $0xc] sm:$0xf] %v3935_v40  ;;  %v3952_v12 = vrot.slane %v3951_v15, 4  ;;  %v3968_v17 = vrot.slane %v3961_v47, 2  ;;  %v4026_v20 = vrot.slane %v3961_v47, 4  ;;  %v5856_v19 = vadd.f32 %v3728_v57, %v7315_v22  ;;  %v3741_v26 = vpop.f32.mrb[9].mxu0 }
 0x256   : > { %v7381_v21 = vadd.f32 %v3903_v39, %v3902_v5  ;;  %v3913_v45 = vrot.slane %v3912_v27, 1  ;;  %v5072_v34 = vpack.c.bf16 %v7377_v9, %v7377_v9  ;;  %v4069_v58 = vrot.slane %v7377_v9, 6  ;;  %v5808_v43 = vpop.f32.mrb[10].mxu0 }
 0x257   : > { %v3953_v1 = vadd.f32 %v3952_v12, %v3951_v15  ;;  %v3969_v2 = vsel %vm2302_vm2, %v3966_v56, %v3968_v17  ;;  %v7395_v22 = vmul.f32 %v7377_v9, %v7377_v9  ;;  %v5069_v61 = vpack.c.bf16 %v5856_v19, %v5856_v19  ;;  %v3744_v31 = vpop.f32.mrb[11].mxu0 }
 0x258   : > { %v7397_v3 = vadd.f32 %v3913_v45, %v3912_v27  ;;  %v3972_v62 = vadd.f32 %v3969_v2, %v3967_v50  ;;  %v4056_v44 = vrot.slane %v5072_v34, 7  ;;  %v4070_v41 = vsel %vm3990_vm11, %v4068_v28, %v4069_v58 }
 0x259   : > { %v3954_v36 = vrot.slane %v3953_v1, 2  ;;  %v4088_v18 = vrot.slane %v7395_v22, 6  ;;  %v3995_v11 = vrot.slane %v5069_v61, 6  ;;  %v4008_v49 = vrot.slane %v5856_v19, 4 }
 0x25a   : > { %v3973_v32 = vrot.slane %v3972_v62, 4  ;;  %v4057_v52 = vsel %vm7389_vm14, %v5013_v42, %v4056_v44  ;;  %v4058_v50 = vrot.slane %v4056_v44, 4  ;;  %v4022_v48 = vmul.f32 %v5856_v19, %v5856_v19 }
 0x25b   : > { %v3955_v57 = vadd.f32 %v3954_v36, %v3953_v1  ;;  %4063 = vst [vmem:[%s7342_s20 + $0x18] sm:$0xf] %v4057_v52  ;;  %v4089_v28 = vsel %vm3990_vm11, %v4087_v4, %v4088_v18  ;;  %v3996_v63 = vsel %vm7402_vm15, %v5009_v38, %v3995_v11  ;;  %v3997_v13 = vrot.slane %v3995_v11, 4 }
 0x25c   : > { %v3974_v14 = vadd.f32 %v3973_v32, %v3972_v62  ;;  %4002 = vst [vmem:[%s7342_s20 + $0x10] sm:$0xf] %v3996_v63  ;;  %v4009_v8 = vsel %vm4006_vm13, %v4007_v60, %v4008_v49  ;;  %v4011_v5 = vsel %vm4006_vm13, %v4008_v49, %v4010_v30  ;;  %v4027_v42 = vrot.slane %v4022_v48, 4  ;;  %v7418_v0 = vpop.f32.mrb[12].mxu0 }
 0x25d   : > { %v3956_v6 = vrot.slane %v3955_v57, 1  ;;  %v3999_v35 = vsel %vm7402_vm15, %v3997_v13, %v3998_v53  ;;  %v4014_v4 = vadd.f32 %v4011_v5, %v4009_v8  ;;  %v5857_v15 = vadd.f32 %v5807_v55, %v7317_v10  ;;  %v3757_v47 = vpop.f32.mrb[13].mxu0 }
 0x25e   : > { %v3975_v38 = vrot.slane %v3974_v14, 2  ;;  %4003 = vst [vmem:[%s7342_s20 + $0x14] sm:$0xf] %v3999_v35  ;;  %v4028_v39 = vsel %vm4006_vm13, %v4026_v20, %v4027_v42  ;;  %v4030_v46 = vsel %vm4006_vm13, %v4027_v42, %v4029_v24  ;;  %v5858_v30 = vadd.f32 %v3741_v26, %v7319_v23  ;;  %v7429_v60 = vpop.f32.mrb[14].mxu0 }
 0x25f   : > { %v3957_v27 = vadd.f32 %v3956_v6, %v3955_v57  ;;  %v4015_v40 = vrot.slane %v4014_v4, 4  ;;  %v4033_v9 = vadd.f32 %v4030_v46, %v4028_v39  ;;  %v4121_v53 = vmul.f32 %v5857_v15, %v5857_v15  ;;  %v7431_v12 = vpop.f32.mrb[15].mxu0 }
 0x260   : > { %v3976_v10 = vadd.f32 %v3975_v38, %v3974_v14  ;;  %v5073_v55 = vpack.c.bf16 %v5858_v30, %v5858_v30  ;;  %v4071_v17 = vrot.slane %v5858_v30, 6  ;;  %v4084_v19 = vmul.f32 %v5858_v30, %v5858_v30 }
 0x261   : > { %v4016_v45 = vadd.f32 %v4015_v40, %v4014_v4  ;;  %v4034_v20 = vrot.slane %v4033_v9, 4  ;;  %v7434_v54 = vadd.f32 %v5808_v43, %v7321_v59  ;;  %v5860_v24 = vadd.f32 %v3744_v31, %v7323_v29 }
 0x262   : > { %v3977_v23 = vrot.slane %v3976_v10, 1  ;;  %v4059_v26 = vrot.slane %v5073_v55, 7  ;;  %v4072_v34 = vsel %vm3990_vm11, %v4069_v58, %v4071_v17  ;;  %v4090_v1 = vrot.slane %v4084_v19, 6 }
 0x263   : > { %v4017_v2 = vrot.slane %v4016_v45, 2  ;;  %v4035_v22 = vadd.f32 %v4034_v20, %v4033_v9  ;;  %v4075_v61 = vadd.f32 %v4072_v34, %v4070_v41  ;;  %v5076_v62 = vpack.c.bf16 %v7434_v54, %v7434_v54 }
 0x264   : > { %v3978_v44 = vadd.f32 %v3977_v23, %v3976_v10  ;;  %v4060_v36 = vsel %vm7389_vm14, %v4058_v50, %v4059_v26  ;;  %v4091_v59 = vsel %vm3990_vm11, %v4088_v18, %v4090_v1  ;;  %v4154_v29 = vrot.slane %v7434_v54, 2  ;;  %v7444_v43 = vpop.f32.mrb[16].mxu0 }
 0x265   : > { %v4018_v31 = vadd.f32 %v4017_v2, %v4016_v45  ;;  %v4036_v11 = vrot.slane %v4035_v22, 2  ;;  %4064 = vst [vmem:[%s7342_s20 + $0x1c] sm:$0xf] %v4060_v36  ;;  %v4076_v58 = vrot.slane %v4075_v61, 4  ;;  %v4094_v49 = vadd.f32 %v4091_v59, %v4089_v28  ;;  %v7447_v32 = vpop.f32.mrb[17].mxu0 }
 0x266   : > { %v7449_v41 = vrot.slane %v5076_v62, 9  ;;  %v7453_v52 = vmul.f32 %v7434_v54, %v7434_v54  ;;  %v3958_v50 = vadd.f32 %v3957_v27, %v7381_v21  ;;  %v3979_v18 = vadd.f32 %v3978_v44, %v7397_v3  ;;  %v7457_v48 = vpop.f32.mrb[18].mxu0 }
 0x267   : > { %v4019_v57 = vrot.slane %v4018_v31, 1  ;;  %v4037_v63 = vadd.f32 %v4036_v11, %v4035_v22  ;;  %v4077_v13 = vadd.f32 %v4076_v58, %v4075_v61  ;;  %v4095_v14 = vrot.slane %v4094_v49, 4  ;;  %v7459_v28 = vpop.f32.mrb[19].mxu0 }
 0x268   : > { %v4175_v8 = vrot.slane %v7453_v52, 2  ;;  %v5116_v5 = vpack.c.bf16 %v5857_v15, %v5860_v24  ;;  %v4112_v42 = vadd.f32 %v5860_v24, %v5857_v15  ;;  %v4120_v6 = vmul.f32 %v5860_v24, %v5860_v24 }
 0x269   : > { %v4020_v35 = vadd.f32 %v4019_v57, %v4018_v31  ;;  %v4038_v4 = vrot.slane %v4037_v63, 1  ;;  %v4078_v38 = vrot.slane %v4077_v13, 2  ;;  %v4096_v21 = vadd.f32 %v4095_v14, %v4094_v49 }
 0x26a   : > { %5128 = vst [vmem:[%s7342_s20 + $0x20] sm:$0xff] %v5116_v5   ;;  %v4113_v39 = vrot.slane %v4112_v42, 4  ;;  %v4122_v3 = vadd.f32 %v4121_v53, %v4120_v6  ;;  %v7465_v46 = vadd.f32 %v7418_v0, %v7325_v37  ;;  %v7468_v30 = vadd.f32 %v3757_v47, %v7327_v25 }
 0x26b   : > { %v4039_v27 = vadd.f32 %v4038_v4, %v4037_v63  ;;  %v4079_v40 = vadd.f32 %v4078_v38, %v4077_v13  ;;  %v4097_v9 = vrot.slane %v4096_v21, 2  ;;  %v4021_v10 = vadd.f32 %v4020_v35, %v3958_v50  ;;  %v5607_v15 = vpop.f32.mrb[16].mxu1 }
 0x26c   : > { %v4114_v55 = vadd.f32 %v4113_v39, %v4112_v42  ;;  %v4123_v17 = vrot.slane %v4122_v3, 4  ;;  %v5080_v19 = vpack.c.bf16 %v7465_v46, %v7465_v46  ;;  %v4214_v45 = vrot.slane %v7465_v46, 4  ;;  %v7473_v53 = vpop.f32.mrb[20].mxu0  ;;  %v2167_v20 = vpop.f32.mrb[17].mxu1 }
 0x26d   : > { %v4080_v37 = vrot.slane %v4079_v40, 1  ;;  %v4098_v0 = vadd.f32 %v4097_v9, %v4096_v21  ;;  %v4040_v24 = vadd.f32 %v4039_v27, %v3979_v18  ;;  %v7477_v25 = vmul.f32 %v7465_v46, %v7465_v46  ;;  %v7479_v47 = vpop.f32.mrb[21].mxu0  ;;  %v7481_v23 = vpop.f32.mrb[18].mxu1 }
 0x26e   : > { %v4115_v26 = vrot.slane %v4114_v55, 2  ;;  %v4124_v34 = vadd.f32 %v4123_v17, %v4122_v3  ;;  %v7483_v1 = vrot.slane %v5080_v19, 6  ;;  %v5077_v2 = vpack.c.bf16 %v7468_v30, %v7468_v30  ;;  %v7487_v22 = vpop.f32.mrb[22].mxu0  ;;  %v7489_v61 = vpop.f32.mrb[19].mxu1 }
 0x26f   : > { %v4081_v62 = vadd.f32 %v4080_v37, %v4079_v40  ;;  %v4099_v44 = vrot.slane %v4098_v0, 1  ;;  %v4233_v36 = vrot.slane %v7477_v25, 4  ;;  %v4155_v59 = vrot.slane %v7468_v30, 2  ;;  %v7493_v31 = vpop.f32.mrb[23].mxu0 }
 0x270   : > { %v4116_v11 = vadd.f32 %v4115_v26, %v4114_v55  ;;  %v4125_v58 = vrot.slane %v4124_v34, 2  ;;  %v4204_v49 = vrot.slane %v7483_v1, 4  ;;  %v4142_v50 = vrot.slane %v5077_v2, 5 }
 0x271   : > { %v4100_v18 = vadd.f32 %v4099_v44, %v4098_v0  ;;  %v4082_v57 = vadd.f32 %v4081_v62, %v4021_v10  ;;  %v4156_v63 = vsel %vm2302_vm2, %v4154_v29, %v4155_v59  ;;  %v7501_v13 = vmul.f32 %v7468_v30, %v7468_v30 }
 0x272   : > { %v4117_v14 = vrot.slane %v4116_v11, 1  ;;  %v4126_v5 = vadd.f32 %v4125_v58, %v4124_v34  ;;  %v4143_v42 = vsel %vm7334_vm8, %v7449_v41, %v4142_v50  ;;  %v4144_v6 = vrot.slane %v4142_v50, 4 }
 0x273   : > { %v4101_v35 = vadd.f32 %v4100_v18, %v4040_v24  ;;  %4149 = vst [vmem:[%s7342_s20 + $0x28] sm:$0xf] %v4143_v42  ;;  %v4176_v4 = vrot.slane %v7501_v13, 2  ;;  %v7510_v54 = vadd.f32 %v7429_v60, %v7329_v7  ;;  %v5864_v29 = vadd.f32 %v7431_v12, %v7331_v33  ;;  %v7514_v38 = vpop.f32.mrb[20].mxu1 }
 0x274   : > { %v4118_v21 = vadd.f32 %v4117_v14, %v4116_v11  ;;  %v4127_v39 = vrot.slane %v4126_v5, 1  ;;  %v7517_v3 = vadd.f32 %v7444_v43, %v5607_v15  ;;  %v7520_v41 = vadd.f32 %v7447_v32, %v2167_v20  ;;  %v7522_v30 = vpop.f32.mrb[24].mxu0  ;;  %v7524_v27 = vpop.f32.mrb[21].mxu1 }
 0x275   : > { %v4177_v7 = vsel %vm2302_vm2, %v4175_v8, %v4176_v4  ;;  %v7531_v33 = vpack.c.bf16 %v7510_v54, %v7510_v54  ;;  %v4216_v60 = vrot.slane %v7510_v54, 4  ;;  %v7536_v12 = vmul.f32 %v7510_v54, %v7510_v54  ;;  %v7538_v43 = vpop.f32.mrb[25].mxu0  ;;  %v7540_v32 = vpop.f32.mrb[22].mxu1 }
 0x276   : > { %v7542_v40 = vadd.f32 %v4118_v21, %v4082_v57  ;;  %v4128_v9 = vadd.f32 %v4127_v39, %v4126_v5  ;;  %v4270_v52 = vrot.slane %v7510_v54, 6  ;;  %v5078_v8 = vpack.c.bf16 %v5864_v29, %v5864_v29  ;;  %v7545_v10 = vpop.f32.mrb[26].mxu0  ;;  %v7547_v15 = vpop.f32.mrb[23].mxu1 }
 0x277   : > { %v4205_v55 = vrot.slane %v7531_v33, 6  ;;  %v4217_v17 = vsel %vm4006_vm13, %v4214_v45, %v4216_v60  ;;  %v4235_v19 = vrot.slane %v7536_v12, 4  ;;  %v5027_v20 = vrot.slane %v7531_v33, 11  ;;  %v7555_v37 = vpop.f32.mrb[27].mxu0 }
 0x278   : > { %v7557_v0 = vadd.f32 %v4128_v9, %v4101_v35  ;;  %v4289_v24 = vrot.slane %v7536_v12, 6  ;;  %v4145_v26 = vrot.slane %v5078_v8, 5  ;;  %v4157_v34 = vrot.slane %v5864_v29, 2 }
 0x279   : > { %v4206_v2 = vsel %vm7402_vm15, %v4204_v49, %v4205_v55  ;;  %v4236_v62 = vsel %vm4006_vm13, %v4233_v36, %v4235_v19  ;;  %v4171_v44 = vmul.f32 %v5864_v29, %v5864_v29  ;;  %v5023_v11 = vrot.slane %v5078_v8, 10 }
 0x27a   : > { %4210 = vst [vmem:[%s7342_s20 + $0x34] sm:$0xf] %v4206_v2  ;;  %v4146_v58 = vsel %vm7334_vm8, %v4144_v6, %v4145_v26  ;;  %v4158_v50 = vsel %vm2302_vm2, %v4155_v59, %v4157_v34  ;;  %v4213_v18 = vrot.slane %v5864_v29, 4  ;;  %v4322_v57 = vmul.f32 %v7517_v3, %v7517_v3 }
 0x27b   : > { %4150 = vst [vmem:[%s7342_s20 + $0x2c] sm:$0xf] %v4146_v58  ;;  %v4161_v13 = vadd.f32 %v4158_v50, %v4156_v63  ;;  %v4178_v14 = vrot.slane %v4171_v44, 2  ;;  %v4203_v49 = vsel %vm7402_vm15, %v5023_v11, %v7483_v1  ;;  %v4232_v5 = vrot.slane %v4171_v44, 4  ;;  %v7575_v42 = vpop.f32.mrb[24].mxu1 }
 0x27c   : > { %4209 = vst [vmem:[%s7342_s20 + $0x30] sm:$0xf] %v4203_v49  ;;  %v4215_v6 = vsel %vm4006_vm13, %v4213_v18, %v4214_v45  ;;  %v5083_v59 = vpack.c.bf16 %v7520_v41, %v7520_v41  ;;  %v4271_v35 = vrot.slane %v7520_v41, 6  ;;  %v7586_v63 = vmul.f32 %v7520_v41, %v7520_v41  ;;  %v7588_v54 = vpop.f32.mrb[28].mxu0  ;;  %v7590_v1 = vpop.f32.mrb[25].mxu1 }
 0x27d   : > { %v4162_v29 = vrot.slane %v4161_v13, 4  ;;  %v4179_v21 = vsel %vm2302_vm2, %v4176_v4, %v4178_v14  ;;  %v4220_v39 = vadd.f32 %v4217_v17, %v4215_v6  ;;  %v4234_v46 = vsel %vm4006_vm13, %v4232_v5, %v4233_v36  ;;  %v7596_v45 = vpop.f32.mrb[29].mxu0  ;;  %v7598_v33 = vpop.f32.mrb[26].mxu1 }
 0x27e   : > { %v4182_v60 = vadd.f32 %v4179_v21, %v4177_v7  ;;  %v4239_v12 = vadd.f32 %v4236_v62, %v4234_v46  ;;  %v4259_v41 = vrot.slane %v5083_v59, 7  ;;  %v4272_v9 = vsel %vm3990_vm11, %v4270_v52, %v4271_v35  ;;  %v7601_v8 = vpop.f32.mrb[30].mxu0  ;;  %v7603_v55 = vpop.f32.mrb[27].mxu1 }
 0x27f   : > { %v4163_v4 = vadd.f32 %v4162_v29, %v4161_v13  ;;  %v4221_v17 = vrot.slane %v4220_v39, 4  ;;  %v4290_v25 = vrot.slane %v7586_v63, 6  ;;  %v5867_v36 = vadd.f32 %v7457_v48, %v7481_v23  ;;  %v7608_v19 = vpop.f32.mrb[31].mxu0 }
 0x280   : > { %v4183_v7 = vrot.slane %v4182_v60, 4  ;;  %v4240_v26 = vrot.slane %v4239_v12, 4  ;;  %v4260_v34 = vsel %vm7389_vm14, %v5027_v20, %v4259_v41  ;;  %v4261_v52 = vrot.slane %v4259_v41, 4 }
 0x281   : > { %v4164_v2 = vrot.slane %v4163_v4, 2  ;;  %v4222_v62 = vadd.f32 %v4221_v17, %v4220_v39  ;;  %4266 = vst [vmem:[%s7342_s20 + $0x38] sm:$0xf] %v4260_v34  ;;  %v7616_v44 = vsel %vm3990_vm11, %v4289_v24, %v4290_v25  ;;  %v5121_v11 = vpack.c.bf16 %v5867_v36, %v7517_v3 }
 0x282   : > { %v4184_v48 = vadd.f32 %v4183_v7, %v4182_v60  ;;  %v4241_v23 = vadd.f32 %v4240_v26, %v4239_v12  ;;  %v4314_v58 = vadd.f32 %v5867_v36, %v7517_v3  ;;  %v4323_v50 = vmul.f32 %v5867_v36, %v5867_v36 }
 0x283   : > { %v4165_v18 = vadd.f32 %v4164_v2, %v4163_v4  ;;  %v4223_v13 = vrot.slane %v4222_v62, 2  ;;  %5129 = vst [vmem:[%s7342_s20 + $0x40] sm:$0xff] %v5121_v11   ;;  %v5868_v20 = vadd.f32 %v7459_v28, %v7489_v61  ;;  %v7625_v14 = vadd.f32 %v7473_v53, %v7514_v38  ;;  %v7627_v49 = vpop.f32.mrb[28].mxu1 }
 0x284   : > { %v4185_v24 = vrot.slane %v4184_v48, 2  ;;  %v4242_v5 = vrot.slane %v4241_v23, 2  ;;  %v4315_v6 = vrot.slane %v4314_v58, 4  ;;  %v4324_v59 = vadd.f32 %v4323_v50, %v4322_v57  ;;  %v7629_v29 = vpop.f32.mrb[32].mxu0  ;;  %v7631_v3 = vpop.f32.mrb[29].mxu1 }
 0x285   : > { %v4166_v21 = vrot.slane %v4165_v18, 1  ;;  %v4224_v39 = vadd.f32 %v4223_v13, %v4222_v62  ;;  %v5084_v46 = vpack.c.bf16 %v5868_v20, %v5868_v20  ;;  %v4273_v60 = vrot.slane %v5868_v20, 6  ;;  %v7633_v12 = vpop.f32.mrb[33].mxu0  ;;  %v7635_v28 = vpop.f32.mrb[30].mxu1 }
 0x286   : > { %v4186_v53 = vadd.f32 %v4185_v24, %v4184_v48  ;;  %v4243_v61 = vadd.f32 %v4242_v5, %v4241_v23  ;;  %v4316_v38 = vadd.f32 %v4315_v6, %v4314_v58  ;;  %v4325_v41 = vrot.slane %v4324_v59, 4  ;;  %v7637_v4 = vpop.f32.mrb[34].mxu0  ;;  %v7639_v17 = vpop.f32.mrb[31].mxu1 }
 0x287   : > { %v4167_v57 = vadd.f32 %v4166_v21, %v4165_v18  ;;  %v4225_v36 = vrot.slane %v4224_v39, 1  ;;  %v4262_v7 = vrot.slane %v5084_v46, 7  ;;  %v4274_v26 = vsel %vm3990_vm11, %v4271_v35, %v4273_v60  ;;  %v7642_v34 = vpop.f32.mrb[35].mxu0 }
 0x288   : > { %v4187_v2 = vrot.slane %v4186_v53, 1  ;;  %v4244_v62 = vrot.slane %v4243_v61, 1  ;;  %v4317_v11 = vrot.slane %v4316_v38, 2  ;;  %v4326_v50 = vadd.f32 %v4325_v41, %v4324_v59 }
 0x289   : > { %v4168_v48 = vadd.f32 %v4167_v57, %v7542_v40  ;;  %v4226_v23 = vadd.f32 %v4225_v36, %v4224_v39  ;;  %v4263_v58 = vsel %vm7389_vm14, %v4261_v52, %v4262_v7  ;;  %v4277_v13 = vadd.f32 %v4274_v26, %v4272_v9 }
 0x28a   : > { %v4188_v24 = vadd.f32 %v4187_v2, %v4186_v53  ;;  %v4245_v18 = vadd.f32 %v4244_v62, %v4243_v61  ;;  %v4318_v5 = vadd.f32 %v4317_v11, %v4316_v38  ;;  %v4327_v6 = vrot.slane %v4326_v50, 2  ;;  %4267 = vst [vmem:[%s7342_s20 + $0x3c] sm:$0xf] %v4263_v58 }
 0x28b   : > { %v4227_v21 = vadd.f32 %v4226_v23, %v4168_v48  ;;  %v4278_v35 = vrot.slane %v4277_v13, 4  ;;  %v4286_v46 = vmul.f32 %v5868_v20, %v5868_v20  ;;  %v7650_v60 = vpack.c.bf16 %v7625_v14, %v7625_v14  ;;  %v7652_v59 = vpop.f32.mrb[32].mxu1 }
 0x28c   : > { %v4319_v40 = vrot.slane %v4318_v5, 1  ;;  %v4328_v39 = vadd.f32 %v4327_v6, %v4326_v50  ;;  %v4189_v41 = vadd.f32 %v4188_v24, %v7557_v0  ;;  %v4359_v9 = vrot.slane %v7625_v14, 2  ;;  %v7656_v52 = vpop.f32.mrb[33].mxu1 }
 0x28d   : > { %v4279_v53 = vadd.f32 %v4278_v35, %v4277_v13  ;;  %v4292_v61 = vrot.slane %v4286_v46, 6  ;;  %v4347_v38 = vrot.slane %v7650_v60, 5  ;;  %v4373_v20 = vmul.f32 %v7625_v14, %v7625_v14  ;;  %v7661_v57 = vpop.f32.mrb[34].mxu1 }
 0x28e   : > { %v4320_v36 = vadd.f32 %v4319_v40, %v4318_v5  ;;  %v4329_v7 = vrot.slane %v4328_v39, 1  ;;  %v7663_v26 = vadd.f32 %v4245_v18, %v4189_v41  ;;  %v5037_v2 = vrot.slane %v7650_v60, 10  ;;  %v7666_v0 = vpop.f32.mrb[35].mxu1 }
 0x28f   : > { %v4280_v62 = vrot.slane %v4279_v53, 2  ;;  %v4293_v11 = vsel %vm3990_vm11, %v4290_v25, %v4292_v61  ;;  %v4380_v50 = vrot.slane %v4373_v20, 2  ;;  %v4415_v48 = vrot.slane %v7625_v14, 4 }
 0x290   : > { %v7672_v23 = vadd.f32 %v4329_v7, %v4328_v39  ;;  %v4296_v58 = vadd.f32 %v4293_v11, %v7616_v44  ;;  %v4434_v13 = vrot.slane %v4373_v20, 4  ;;  %v5870_v24 = vadd.f32 %v7479_v47, %v7524_v27 }
 0x291   : > { %v4281_v18 = vadd.f32 %v4280_v62, %v4279_v53  ;;  %v7679_v5 = vadd.f32 %v7487_v22, %v7540_v32  ;;  %v5872_v63 = vadd.f32 %v7493_v31, %v7547_v15  ;;  %v7685_v25 = vadd.f32 %v7522_v30, %v7575_v42 }
 0x292   : > { %v4297_v14 = vrot.slane %v4296_v58, 4  ;;  %v5087_v6 = vpack.c.bf16 %v5870_v24, %v5870_v24  ;;  %v4356_v35 = vrot.slane %v5870_v24, 2  ;;  %v4371_v44 = vmul.f32 %v5870_v24, %v5870_v24 }
 0x293   : > { %v4282_v46 = vrot.slane %v4281_v18, 1  ;;  %v5091_v47 = vpack.c.bf16 %v7679_v5, %v7679_v5  ;;  %v4416_v27 = vrot.slane %v7679_v5, 4  ;;  %v7692_v22 = vmul.f32 %v7679_v5, %v7679_v5 }
 0x294   : > { %v4298_v32 = vadd.f32 %v4297_v14, %v4296_v58  ;;  %v5033_v31 = vrot.slane %v5087_v6, 9  ;;  %v4377_v15 = vrot.slane %v4371_v44, 2  ;;  %v5088_v30 = vpack.c.bf16 %v5872_v63, %v5872_v63 }
 0x295   : > { %v4283_v42 = vadd.f32 %v4282_v46, %v4281_v18  ;;  %v4404_v60 = vrot.slane %v5091_v47, 6  ;;  %v4417_v40 = vsel %vm4006_vm13, %v4415_v48, %v4416_v27  ;;  %v4435_v39 = vrot.slane %v7692_v22, 4 }
 0x296   : > { %v4299_v41 = vrot.slane %v4298_v32, 2  ;;  %v4344_v53 = vrot.slane %v5088_v30, 5  ;;  %v4357_v61 = vrot.slane %v5872_v63, 2  ;;  %v4372_v20 = vmul.f32 %v5872_v63, %v5872_v63 }
 0x297   : > { %v4284_v7 = vadd.f32 %v4283_v42, %v4227_v21  ;;  %v4405_v62 = vsel %vm7402_vm15, %v5037_v2, %v4404_v60  ;;  %v4406_v11 = vrot.slane %v4404_v60, 4  ;;  %v4436_v58 = vsel %vm4006_vm13, %v4434_v13, %v4435_v39 }
 0x298   : > { %v4300_v24 = vadd.f32 %v4299_v41, %v4298_v32  ;;  %4411 = vst [vmem:[%s7342_s20 + $0x50] sm:$0xf] %v4405_v62  ;;  %v4345_v48 = vsel %vm7334_vm8, %v5033_v31, %v4344_v53  ;;  %v4346_v18 = vrot.slane %v4344_v53, 4  ;;  %v4358_v5 = vsel %vm2302_vm2, %v4356_v35, %v4357_v61 }
 0x299   : > { %v7703_v14 = vadd.f32 %v4320_v36, %v4284_v7  ;;  %4351 = vst [vmem:[%s7342_s20 + $0x48] sm:$0xf] %v4345_v48  ;;  %v4360_v21 = vsel %vm2302_vm2, %v4357_v61, %v4359_v9  ;;  %v4378_v63 = vrot.slane %v4372_v20, 2  ;;  %v5095_v2 = vpack.c.bf16 %v7685_v25, %v7685_v25 }
 0x29a   : > { %v4301_v6 = vrot.slane %v4300_v24, 1  ;;  %v4348_v13 = vsel %vm7334_vm8, %v4346_v18, %v4347_v38  ;;  %v4363_v44 = vadd.f32 %v4360_v21, %v4358_v5  ;;  %v4475_v46 = vrot.slane %v7685_v25, 6 }
 0x29b   : > { %4352 = vst [vmem:[%s7342_s20 + $0x4c] sm:$0xf] %v4348_v13  ;;  %v4379_v47 = vsel %vm2302_vm2, %v4377_v15, %v4378_v63  ;;  %v4381_v36 = vsel %vm2302_vm2, %v4378_v63, %v4380_v50  ;;  %v4464_v35 = vrot.slane %v5095_v2, 7  ;;  %v4488_v9 = vmul.f32 %v7685_v25, %v7685_v25 }
 0x29c   : > { %v4302_v22 = vadd.f32 %v4301_v6, %v4300_v24  ;;  %v4364_v32 = vrot.slane %v4363_v44, 4  ;;  %v4384_v31 = vadd.f32 %v4381_v36, %v4379_v47  ;;  %v5874_v30 = vadd.f32 %v7538_v43, %v7590_v1 }
 0x29d   : > { %v4494_v42 = vrot.slane %v4488_v9, 6  ;;  %v7721_v38 = vadd.f32 %v7545_v10, %v7598_v33  ;;  %v5876_v15 = vadd.f32 %v7555_v37, %v7603_v55  ;;  %v7727_v50 = vadd.f32 %v7588_v54, %v7627_v49 }
 0x29e   : > { %v4303_v25 = vadd.f32 %v4302_v22, %v7663_v26  ;;  %v4365_v60 = vadd.f32 %v4364_v32, %v4363_v44  ;;  %v4385_v41 = vrot.slane %v4384_v31, 4  ;;  %v5092_v53 = vpack.c.bf16 %v5874_v30, %v5874_v30 }
 0x29f   : > { %v4418_v61 = vrot.slane %v5874_v30, 4  ;;  %v4431_v43 = vmul.f32 %v5874_v30, %v5874_v30  ;;  %v4472_v1 = vrot.slane %v5874_v30, 6  ;;  %v7732_v10 = vmul.f32 %v7721_v38, %v7721_v38 }
 0x2a0   : > { %v4331_v33 = vadd.f32 %v7672_v23, %v4303_v25  ;;  %v4366_v37 = vrot.slane %v4365_v60, 2  ;;  %v4386_v55 = vadd.f32 %v4385_v41, %v4384_v31  ;;  %v4407_v20 = vrot.slane %v5092_v53, 6 }
 0x2a1   : > { %v4419_v54 = vsel %vm4006_vm13, %v4416_v27, %v4418_v61  ;;  %v4437_v49 = vrot.slane %v4431_v43, 4  ;;  %v5041_v26 = vrot.slane %v5092_v53, 11  ;;  %v4491_v7 = vrot.slane %v4431_v43, 6 }
 0x2a2   : > { %v4367_v62 = vadd.f32 %v4366_v37, %v4365_v60  ;;  %v4387_v24 = vrot.slane %v4386_v55, 2  ;;  %v4408_v48 = vsel %vm7402_vm15, %v4406_v11, %v4407_v20  ;;  %v4422_v18 = vadd.f32 %v4419_v54, %v4417_v40 }
 0x2a3   : > { %4412 = vst [vmem:[%s7342_s20 + $0x54] sm:$0xf] %v4408_v48  ;;  %v4438_v5 = vsel %vm4006_vm13, %v4435_v39, %v4437_v49  ;;  %v5094_v21 = vpack.c.bf16 %v5876_v15, %v5876_v15  ;;  %v4473_v63 = vrot.slane %v5876_v15, 6  ;;  %v4487_v23 = vmul.f32 %v5876_v15, %v5876_v15 }
 0x2a4   : > { %v4368_v2 = vrot.slane %v4367_v62, 1  ;;  %v4388_v6 = vadd.f32 %v4387_v24, %v4386_v55  ;;  %v4423_v13 = vrot.slane %v4422_v18, 4  ;;  %v4441_v44 = vadd.f32 %v4438_v5, %v4436_v58 }
 0x2a5   : > { %v4461_v27 = vrot.slane %v5094_v21, 7  ;;  %v4474_v47 = vsel %vm3990_vm11, %v4472_v1, %v4473_v63  ;;  %v4476_v36 = vsel %vm3990_vm11, %v4473_v63, %v4475_v46  ;;  %v4492_v9 = vrot.slane %v4487_v23, 6 }
 0x2a6   : > { %v4369_v22 = vadd.f32 %v4368_v2, %v4367_v62  ;;  %v4389_v11 = vrot.slane %v4388_v6, 1  ;;  %v4424_v40 = vadd.f32 %v4423_v13, %v4422_v18  ;;  %v4442_v32 = vrot.slane %v4441_v44, 4 }
 0x2a7   : > { %v4462_v39 = vsel %vm7389_vm14, %v5041_v26, %v4461_v27  ;;  %v4463_v31 = vrot.slane %v4461_v27, 4  ;;  %v4479_v30 = vadd.f32 %v4476_v36, %v4474_v47  ;;  %v4493_v15 = vsel %vm3990_vm11, %v4491_v7, %v4492_v9 }
 0x2a8   : > { %v4370_v58 = vadd.f32 %v4369_v22, %v7703_v14  ;;  %v4390_v25 = vadd.f32 %v4389_v11, %v4388_v6  ;;  %v4425_v60 = vrot.slane %v4424_v40, 2  ;;  %v4443_v41 = vadd.f32 %v4442_v32, %v4441_v44  ;;  %4468 = vst [vmem:[%s7342_s20 + $0x58] sm:$0xf] %v4462_v39 }
 0x2a9   : > { %v4465_v46 = vsel %vm7389_vm14, %v4463_v31, %v4464_v35  ;;  %v4480_v53 = vrot.slane %v4479_v30, 4  ;;  %v4495_v61 = vsel %vm3990_vm11, %v4492_v9, %v4494_v42  ;;  %v5099_v43 = vpack.c.bf16 %v7727_v50, %v7727_v50 }
 0x2aa   : > { %v4391_v1 = vadd.f32 %v4390_v25, %v4331_v33  ;;  %v4426_v37 = vadd.f32 %v4425_v60, %v4424_v40  ;;  %v4444_v55 = vrot.slane %v4443_v41, 2  ;;  %4469 = vst [vmem:[%s7342_s20 + $0x5c] sm:$0xf] %v4465_v46  ;;  %v4498_v20 = vadd.f32 %v4495_v61, %v4493_v15 }
 0x2ab   : > { %v4481_v54 = vadd.f32 %v4480_v53, %v4479_v30  ;;  %v7753_v14 = vrot.slane %v5099_v43, 5  ;;  %v4559_v49 = vrot.slane %v7727_v50, 2  ;;  %v7758_v26 = vmul.f32 %v7727_v50, %v7727_v50 }
 0x2ac   : > { %v4427_v35 = vrot.slane %v4426_v37, 1  ;;  %v4445_v7 = vadd.f32 %v4444_v55, %v4443_v41  ;;  %v4499_v42 = vrot.slane %v4498_v20, 4  ;;  %v5878_v62 = vadd.f32 %v7596_v45, %v7631_v3 }
 0x2ad   : > { %v4482_v33 = vrot.slane %v4481_v54, 2  ;;  %v4548_v24 = vrot.slane %v7753_v14, 4  ;;  %v4580_v48 = vrot.slane %v7758_v26, 2  ;;  %v7766_v18 = vadd.f32 %v7601_v8, %v7635_v28 }
 0x2ae   : > { %v4446_v5 = vrot.slane %v4445_v7, 1  ;;  %v4500_v21 = vadd.f32 %v4499_v42, %v4498_v20  ;;  %v4428_v50 = vadd.f32 %v4427_v35, %v4426_v37  ;;  %v5126_v63 = vpack.c.bf16 %v5878_v62, %v7721_v38 }
 0x2af   : > { %v4483_v23 = vadd.f32 %v4482_v33, %v4481_v54  ;;  %v4516_v2 = vadd.f32 %v5878_v62, %v7721_v38  ;;  %v4525_v6 = vmul.f32 %v5878_v62, %v5878_v62  ;;  %v7772_v45 = vpack.c.bf16 %v7766_v18, %v7766_v18 }
 0x2b0   : > { %v4501_v3 = vrot.slane %v4500_v21, 2  ;;  %v4429_v13 = vadd.f32 %v4428_v50, %v4370_v58  ;;  %v4447_v44 = vadd.f32 %v4446_v5, %v4445_v7  ;;  %5130 = vst [vmem:[%s7342_s20 + $0x60] sm:$0xff] %v5126_v63   ;;  %v4561_v8 = vrot.slane %v7766_v18, 2 }
 0x2b1   : > { %v4484_v28 = vrot.slane %v4483_v23, 1  ;;  %v4517_v27 = vrot.slane %v4516_v2, 4  ;;  %v4526_v47 = vadd.f32 %v4525_v6, %v7732_v10  ;;  %v4549_v36 = vrot.slane %v7772_v45, 5 }
 0x2b2   : > { %v4502_v9 = vadd.f32 %v4501_v3, %v4500_v21  ;;  %v4448_v38 = vadd.f32 %v4447_v44, %v4391_v1  ;;  %v7780_v22 = vmul.f32 %v7766_v18, %v7766_v18  ;;  %v5051_v11 = vrot.slane %v7772_v45, 10 }
 0x2b3   : > { %v4485_v40 = vadd.f32 %v4484_v28, %v4483_v23  ;;  %v4518_v32 = vadd.f32 %v4517_v27, %v4516_v2  ;;  %v4527_v39 = vrot.slane %v4526_v47, 4  ;;  %v4550_v31 = vsel %vm7334_vm8, %v4548_v24, %v4549_v36 }
 0x2b4   : > { %v4503_v30 = vrot.slane %v4502_v9, 1  ;;  %4554 = vst [vmem:[%s7342_s20 + $0x6c] sm:$0xf] %v4550_v31  ;;  %v4582_v10 = vrot.slane %v7780_v22, 2  ;;  %v4617_v15 = vrot.slane %v7766_v18, 4  ;;  %v4636_v58 = vrot.slane %v7780_v22, 4 }
 0x2b5   : > { %v4486_v25 = vadd.f32 %v4485_v40, %v4429_v13  ;;  %v4519_v60 = vrot.slane %v4518_v32, 2  ;;  %v4528_v41 = vadd.f32 %v4527_v39, %v4526_v47  ;;  %v5880_v46 = vadd.f32 %v7608_v19, %v7639_v17 }
 0x2b6   : > { %v4504_v53 = vadd.f32 %v4503_v30, %v4502_v9  ;;  %v4562_v61 = vsel %vm2302_vm2, %v4559_v49, %v4561_v8  ;;  %v4583_v43 = vsel %vm2302_vm2, %v4580_v48, %v4582_v10  ;;  %v7797_v1 = vadd.f32 %v7629_v29, %v7652_v59 }
 0x2b7   : > { %v4520_v37 = vadd.f32 %v4519_v60, %v4518_v32  ;;  %v4529_v55 = vrot.slane %v4528_v41, 2  ;;  %v5098_v20 = vpack.c.bf16 %v5880_v46, %v5880_v46  ;;  %v4558_v54 = vrot.slane %v5880_v46, 2 }
 0x2b8   : > { %v4505_v35 = vadd.f32 %v4504_v53, %v4448_v38  ;;  %v4573_v7 = vmul.f32 %v5880_v46, %v5880_v46  ;;  %v5105_v19 = vpack.c.bf16 %v7797_v1, %v7797_v1  ;;  %v4675_v17 = vrot.slane %v7797_v1, 6 }
 0x2b9   : > { %v4521_v42 = vrot.slane %v4520_v37, 1  ;;  %v4530_v62 = vadd.f32 %v4529_v55, %v4528_v41  ;;  %v5047_v33 = vrot.slane %v5098_v20, 9  ;;  %v4560_v24 = vsel %vm2302_vm2, %v4558_v54, %v4559_v49 }
 0x2ba   : > { %v4565_v18 = vadd.f32 %v4562_v61, %v4560_v24  ;;  %v4579_v29 = vrot.slane %v4573_v7, 2  ;;  %v4663_v59 = vrot.slane %v5105_v19, 7  ;;  %v7805_v5 = vmul.f32 %v7797_v1, %v7797_v1 }
 0x2bb   : > { %v4522_v21 = vadd.f32 %v4521_v42, %v4520_v37  ;;  %v4531_v50 = vrot.slane %v4530_v62, 1  ;;  %v4547_v63 = vsel %vm7334_vm8, %v5047_v33, %v7753_v14  ;;  %v5882_v23 = vadd.f32 %v7633_v12, %v7656_v52 }
 0x2bc   : > { %4553 = vst [vmem:[%s7342_s20 + $0x68] sm:$0xf] %v4547_v63  ;;  %v4566_v2 = vrot.slane %v4565_v18, 4  ;;  %v4581_v49 = vsel %vm2302_vm2, %v4579_v29, %v4580_v48  ;;  %v4665_v6 = vrot.slane %v4663_v59, 4  ;;  %v4694_v45 = vrot.slane %v7805_v5, 6 }
 0x2bd   : > { %v4523_v3 = vadd.f32 %v4522_v21, %v4486_v25  ;;  %v4532_v13 = vadd.f32 %v4531_v50, %v4530_v62  ;;  %v4586_v44 = vadd.f32 %v4583_v43, %v4581_v49  ;;  %v5102_v8 = vpack.c.bf16 %v5882_v23, %v5882_v23 }
 0x2be   : > { %v4567_v28 = vadd.f32 %v4566_v2, %v4565_v18  ;;  %v4618_v27 = vrot.slane %v5882_v23, 4  ;;  %v4632_v51 = vmul.f32 %v5882_v23, %v5882_v23  ;;  %v5883_v12 = vadd.f32 %v7637_v4, %v7661_v57 }
 0x2bf   : > { %v7819_v52 = vadd.f32 %v4532_v13, %v4505_v35  ;;  %v4587_v14 = vrot.slane %v4586_v44, 4  ;;  %v4606_v26 = vrot.slane %v5102_v8, 6  ;;  %v5884_v48 = vadd.f32 %v7642_v34, %v7666_v0 }
 0x2c0   : > { %v4568_v47 = vrot.slane %v4567_v28, 2  ;;  %v4619_v36 = vsel %vm4006_vm13, %v4617_v15, %v4618_v27  ;;  %v4637_v9 = vrot.slane %v4632_v51, 4  ;;  %v5106_v38 = vpack.c.bf16 %v5883_v12, %v5883_v12 }
 0x2c1   : > { %v4588_v22 = vadd.f32 %v4587_v14, %v4586_v44  ;;  %v4607_v40 = vsel %vm7402_vm15, %v5051_v11, %v4606_v26  ;;  %v4608_v32 = vrot.slane %v4606_v26, 4  ;;  %v4677_v4 = vrot.slane %v5883_v12, 6 }
 0x2c2   : > { %v4569_v57 = vadd.f32 %v4568_v47, %v4567_v28  ;;  %4613 = vst [vmem:[%s7342_s20 + $0x70] sm:$0xf] %v4607_v40  ;;  %v4638_v39 = vsel %vm4006_vm13, %v4636_v58, %v4637_v9  ;;  %v4666_v31 = vrot.slane %v5106_v38, 7  ;;  %v4690_v30 = vmul.f32 %v5883_v12, %v5883_v12 }
 0x2c3   : > { %v4589_v34 = vrot.slane %v4588_v22, 2  ;;  %v4678_v0 = vsel %vm3990_vm11, %v4675_v17, %v4677_v4  ;;  %v5103_v10 = vpack.c.bf16 %v5884_v48, %v5884_v48  ;;  %v4620_v15 = vrot.slane %v5884_v48, 4 }
 0x2c4   : > { %v4570_v25 = vrot.slane %v4569_v57, 1  ;;  %v4667_v11 = vsel %vm7389_vm14, %v4665_v6, %v4666_v31  ;;  %v4696_v60 = vrot.slane %v4690_v30, 6  ;;  %v4633_v41 = vmul.f32 %v5884_v48, %v5884_v48 }
 0x2c5   : > { %v4590_v46 = vadd.f32 %v4589_v34, %v4588_v22  ;;  %4671 = vst [vmem:[%s7342_s20 + $0x7c] sm:$0xf] %v4667_v11  ;;  %v4609_v58 = vrot.slane %v5103_v10, 6  ;;  %v4621_v53 = vsel %vm4006_vm13, %v4618_v27, %v4620_v15  ;;  %v5055_v61 = vrot.slane %v5103_v10, 11 }
 0x2c6   : > { %v4571_v43 = vadd.f32 %v4570_v25, %v4569_v57  ;;  %v4697_v37 = vsel %vm3990_vm11, %v4694_v45, %v4696_v60  ;;  %v4624_v55 = vadd.f32 %v4621_v53, %v4619_v36  ;;  %v4639_v20 = vrot.slane %v4633_v41, 4 }
 0x2c7   : > { %v4591_v54 = vrot.slane %v4590_v46, 1  ;;  %v4610_v35 = vsel %vm7402_vm15, %v4608_v32, %v4609_v58  ;;  %v4664_v7 = vsel %vm7389_vm14, %v5055_v61, %v4663_v59  ;;  %v4674_v19 = vrot.slane %v5884_v48, 6 }
 0x2c8   : > { %4614 = vst [vmem:[%s7342_s20 + $0x74] sm:$0xf] %v4610_v35  ;;  %v4625_v42 = vrot.slane %v4624_v55, 4  ;;  %v4640_v62 = vsel %vm4006_vm13, %v4637_v9, %v4639_v20  ;;  %4670 = vst [vmem:[%s7342_s20 + $0x78] sm:$0xf] %v4664_v7  ;;  %v4693_v33 = vrot.slane %v4633_v41, 6  ;;  %v4572_v24 = vadd.f32 %v4571_v43, %v4523_v3 }
 0x2c9   : > { %v4592_v18 = vadd.f32 %v4591_v54, %v4590_v46  ;;  %v4643_v29 = vadd.f32 %v4640_v62, %v4638_v39  ;;  %v4676_v56 = vsel %vm3990_vm11, %v4674_v19, %v4675_v17 }
 0x2ca   : > { %6455 = shalt.err (!%p6452_p7)
}
 0x2cb   : > { %s6456_s26 = scalar_lea.hbm %s7840_s4, 2048  ;;  %s6460_s10 = scalar_lea.hbm %s7936_s2, 4096 }
 0x2cc   : > { %p6457_p9 = scmp.ne.s32.totalorder %s7840_s4, %s6456_s26  ;;  %p6461_p5 = scmp.lt.u32.totalorder %s7840_s4, %s7936_s2 }
 0x2cd   : > { %p6462_p13 = scmp.lt.u32.totalorder %s6460_s10, %s6456_s26  ;;  %p6464_p4 = scmp.lt.u32.totalorder %s6456_s26, %s7840_s4 }
 0x2ce   : > { %p6458_p1 = pnand %p6457_p9, %p6668_p12 }
 0x2cf   : > { %p6463_p2 = por %p6462_p13, %p6461_p5 }
 0x2d0   : > { %p6459_p0 = pneg %p6458_p1 }
 0x2d1   : > { %p6465_p6 = por %p6464_p4, %p6463_p2 }
 0x2d3   : > { %p6466_p8 = pnand %p6465_p6, %p6459_p0 }
 0x2d5   : > { %6469 = shalt.err (!%p6466_p8)
}
 0x2d6   : > { %s6551_s20 = smov 64   ;;  %s6552_s8 = smov 4   ;;  %v4626_v16 = vadd.f32 %v4625_v42, %v4624_v55  ;;  %v4681_v1 = vadd.f32 %v4678_v0, %v4676_v56  ;;  %v4695_v17 = vsel %vm3990_vm11, %v4693_v33, %v4694_v45  ;;  %v4644_v59 = vrot.slane %v4643_v29, 4 }
 0x2d7   : > { %6146 = dma.vmem_to_hbm [thread:$0]  (%p6668_p12), %s7842_s9, 2048, %s7840_s4, %s4711_s5, %s6551_s20, %s6551_s20, %s6552_s8   ;;  %v4700_v21 = vadd.f32 %v4697_v37, %v4695_v17  ;;  %v4593_v50 = vadd.f32 %v4592_v18, %v7819_v52 }
 0x2d8   : > { %v4627_v63 = vrot.slane %v4626_v16, 2  ;;  %v4682_v23 = vrot.slane %v4681_v1, 4  ;;  %v4645_v2 = vadd.f32 %v4644_v59, %v4643_v29  ;;  %s4865_s9 = sshll.u32 %s6719_s6, 3  ;;  %s5060_s29 = sshll.u32 %s6595_s16, 7 }
 0x2d9   : > { %v4701_v49 = vrot.slane %v4700_v21, 4  ;;  %s214_s25 = scalar_lea.vmem [#allocation8], %s4865_s9  ;;  %s7890_s22 = scalar_lea.hbm %s7937_s3, %s5060_s29 }
 0x2da   : > { %v4628_v6 = vadd.f32 %v4627_v63, %v4626_v16  ;;  %v4683_v3 = vadd.f32 %v4682_v23, %v4681_v1  ;;  %v4646_v13 = vrot.slane %v4645_v2, 2  ;;  %s4745_s4 = sshll.u32 %s214_s25, 4  ;;  %s4716_s23 = scalar_lea.sflag [#allocation9], %s6719_s6  ;;  %s7892_s4 = int_to_ptr.vmem [resolvable:$true] %s4745_s4 }
 0x2db   : > { %v4702_v44 = vadd.f32 %v4701_v49, %v4700_v21  ;;  %s6470_s16 = scalar_lea.vmem %s7892_s4, 128  ;;  %s6553_s28 = smov [#allocation8]  }
 0x2dc   : > { %v4684_v8 = vrot.slane %v4683_v3, 2  ;;  %v4629_v28 = vrot.slane %v4628_v6, 1  ;;  %v4647_v27 = vadd.f32 %v4646_v13, %v4645_v2  ;;  %p6471_p10 = scmp.ne.s32.totalorder %s7892_s4, %s6470_s16  ;;  %s6474_s26 = sshll.u32 %s6553_s28, 4  ;;  %s6475_s26 = int_to_ptr.vmem [resolvable:$false] %s6474_s26 }
 0x2dd   : > { %v4703_v5 = vrot.slane %v4702_v44, 2  ;;  %s6476_s30 = scalar_lea.vmem %s6475_s26, 256  ;;  %p6477_p7 = scmp.lt.s32.totalorder %s7892_s4, %s6475_s26 }
 0x2de   : > { %v4630_v51 = vadd.f32 %v4629_v28, %v4628_v6  ;;  %v4685_v45 = vadd.f32 %v4684_v8, %v4683_v3  ;;  %v4648_v12 = vrot.slane %v4647_v27, 1  ;;  %p6472_p11 = pnand %p6471_p10, %p6668_p12  ;;  %p6478_p9 = scmp.lt.s32.totalorder %s6476_s30, %s6470_s16 }
 0x2df   : > { %v4704_v14 = vadd.f32 %v4703_v5, %v4702_v44 }
 0x2e0   : > { %v4631_v26 = vadd.f32 %v4630_v51, %v4572_v24  ;;  %v4686_v52 = vrot.slane %v4685_v45, 1  ;;  %v4649_v48 = vadd.f32 %v4648_v12, %v4647_v27  ;;  %p6473_p3 = pneg %p6472_p11  ;;  %p6479_p1 = por %p6478_p9, %p6477_p7 }
 0x2e1   : > { %v4705_v47 = vrot.slane %v4704_v14, 1 }
 0x2e2   : > { %v4687_v36 = vadd.f32 %v4686_v52, %v4685_v45  ;;  %v4650_v9 = vadd.f32 %v4649_v48, %v4593_v50  ;;  %p6480_p0 = pnand %p6479_p1, %p6473_p3 }
 0x2e3   : > { %v4706_v38 = vadd.f32 %v4705_v47, %v4704_v14 }
 0x2e4   : > { %v4688_v22 = vadd.f32 %v4687_v36, %v4631_v26 }
 0x2e5   : > { %v4707_v40 = vadd.f32 %v4706_v38, %v4650_v9 }
 0x2e6   : > { %4708 = vst [vmem:[%s214_s25] sm:$0x1] %v4688_v22 }
 0x2e7   : > { %4709 = vst [vmem:[%s214_s25 + $0x1] sm:$0x1] %v4707_v40 }
 0x2e8   : > { %6483 = shalt.err (!%p6480_p0)
}
 0x2e9   : > { %s6484_s6 = scalar_lea.hbm %s7890_s22, 128  ;;  %s6488_s11 = scalar_lea.hbm %s7937_s3, 256 }
 0x2ea   : > { %p6485_p5 = scmp.ne.s32.totalorder %s7890_s22, %s6484_s6  ;;  %p6489_p4 = scmp.lt.u32.totalorder %s7890_s22, %s7937_s3 }
 0x2eb   : > { %p6490_p6 = scmp.lt.u32.totalorder %s6488_s11, %s6484_s6  ;;  %p6492_p10 = scmp.lt.u32.totalorder %s6484_s6, %s7890_s22 }
 0x2ec   : > { %p6486_p13 = pnand %p6485_p5, %p6668_p12 }
 0x2ed   : > { %p6491_p8 = por %p6490_p6, %p6489_p4 }
 0x2ee   : > { %p6487_p2 = pneg %p6486_p13 }
 0x2ef   : > { %p6493_p11 = por %p6492_p10, %p6491_p8 }
 0x2f1   : > { %p6494_p3 = pnand %p6493_p11, %p6487_p2 }
 0x2f3   : > { %6497 = shalt.err (!%p6494_p3)
}
 0x2f4   : > { %6147 = dma.vmem_to_hbm [thread:$0]  (%p6668_p12), %s7892_s4, 128, %s7890_s22, %s4716_s23  }
 0x2f5 PF: > { %s4757_s8 = sand.u32 1, %s6532_s12   ;;  %p7958_p7 = scmp.ne.s32.totalorder %s7942_s19, 0 }
 0x2f6   : > { %p7959_p9 = scmp.ge.s32.totalorder %s6544_s15, 2  ;;  %s4758_s9 = scalar_lea.sflag [#allocation4], %s4757_s8 }
 0x2f8   : > { %p6159_p1 = pnand %p7959_p9, %p7958_p7 }
 0x2fa   : > { %6523 = dma.done.wait (!%p6159_p1), %s4758_s9, 2048  }
 0x2fb   : > { %6525 = vsyncadd (!%p6159_p1), %s4758_s9, 4294965248  ;;  %s4767_s29 = scalar_lea.sflag [#allocation9], %s4757_s8 }
 0x2fc   : > { %6527 = dma.done.wait (!%p6159_p1), %s4767_s29, 128  }
 0x2fd   : > { %6529 = vsyncadd (!%p6159_p1), %s4767_s29, 4294967168  ;;  %p21_p12 = scmp.ge.s32.totalorder %s6630_s24, 4   ;;  %s7960_s12 = smov %s6536_s13 }
 0x2fe   : > { %s7961_s13 = smov %s6540_s14  ;;  %s7962_s14 = smov %s6664_s17 }
 0x2ff   : > { %s7963_s15 = smov %s6630_s24  ;;  %23 = sbr.rel (!%p21_p12) target bundleno = 8 (0x8), region = 94 }
 0x306   :  { %4772 = vsyncpa [#allocation3], 1 }
 0x307   :  { %4774 = vsyncpa [#allocation3 + $0x1], 1 }
 0x308   :  { %4775 = vsyncpa [#allocation6], 1 }
 0x309   :  { %4776 = vsyncpa [#allocation4], 1 }
 0x30a   :  { %4778 = vsyncpa [#allocation4 + $0x1], 1 }
 0x30b   :  { %4779 = vsyncpa [#allocation9], 1 }
 0x30c   :  { %4781 = vsyncpa [#allocation9 + $0x1], 1 }

</bundles_post_ra>
